<compile_context>
chip_gen: v6e
topology: v6e:2x2x1
jax: 0.10.0
libtpu: 0.0.40
codegen_flags: <defaults>
</compile_context>

<pallas_src>
import functools

import jax
import jax.numpy as jnp
from jax import lax
from jax.experimental import pallas as pl
from jax.experimental.pallas import tpu as pltpu

BN_EPS = 1e-5
COUT_PAD = 128                      # lane-dense output width for every conv
VMEM_LIMIT = 32 * 1024 * 1024       # explicit (v5e default scoped VMEM is 16 MiB)


# ----------------------------------------------------------------------------
# Fused conv3x3(stride 2, pad 1) + BN + ReLU kernel.
#
# One grid step = one batch sample.  The input has already been decomposed
# into the 2x2 "phases" of the stride-2 grid, so each of the 9 conv taps is a
# contiguous (ho, wo, cin) slice of one phase slab, which becomes the LHS of
# a (ho*wo, cin) @ (cin, 128) bf16 MXU matmul accumulated in f32.
# ----------------------------------------------------------------------------
def _conv_bn_relu_kernel(ph_ref, w_ref, scale_ref, bias_ref, o_ref, *,
                         ho, wo, cin, cout):
    # ph_ref:   (4, Hq, Wq, cin) f32   phase slabs of this sample (Hq=ho+1)
    # w_ref:    (9, cin, cout)   bf16  per-tap weight matrices (cout padded)
    # scale_ref/bias_ref: (1, cout) f32  folded BN scale / (conv-bias+BN) bias
    # o_ref:    (ho*wo, cout)    f32   rows ordered (oh, ow)
    m = ho * wo
    acc = jnp.zeros((m, cout), jnp.float32)
    for rh in range(2):
        for rw in range(2):
            slab = ph_ref[rh * 2 + rw]                 # (Hq, Wq, cin)
            for dh in range(2):
                kh = 2 * dh + rh
                if kh > 2:
                    continue
                for dw in range(2):
                    kw = 2 * dw + rw
                    if kw > 2:
                        continue
                    tap = slab[dh:dh + ho, dw:dw + wo, :]          # (ho, wo, cin)
                    a = tap.reshape(m, cin).astype(jnp.bfloat16)   # GEMM LHS
                    acc = acc + jnp.dot(a, w_ref[kh * 3 + kw],
                                        preferred_element_type=jnp.float32)
    out = jnp.maximum(acc * scale_ref[...] + bias_ref[...], 0.0)
    o_ref[...] = out


def conv_bn_relu_pallas(x_nhwc, w, b, gamma, beta, mean, var, cout_pad=COUT_PAD):
    """Fused conv(3x3,s2,p1)+BN(inference)+ReLU. Returns (N, H/2, W/2, cout_pad)."""
    n, h, wdim, cin = x_nhwc.shape
    cout = w.shape[0]
    cin_real = w.shape[1]
    assert h % 2 == 0 and wdim % 2 == 0
    ho, wo = h // 2, wdim // 2
    hq, wq = ho + 1, wo + 1

    # Phase decomposition: pad spatially by 1 and de-interleave even/odd rows
    # and columns so stride-2 tap selection becomes a contiguous slice.
    xp = jnp.pad(x_nhwc, ((0, 0), (1, 1), (1, 1), (0, 0)))
    ph = xp.reshape(n, hq, 2, wq, 2, cin).transpose(0, 2, 4, 1, 3, 5)
    ph = ph.reshape(n * 4, hq, wq, cin).astype(jnp.float32)

    # Weights -> (9, cin, cout_pad) bf16; zero-pad cin (carried zero channels
    # from the previous layer) and cout (lane-dense 128-wide outputs).
    wk = jnp.transpose(w, (2, 3, 1, 0)).reshape(9, cin_real, cout)
    w9 = jnp.zeros((9, cin, cout_pad), jnp.bfloat16)
    w9 = w9.at[:, :cin_real, :cout].set(wk.astype(jnp.bfloat16))

    # Fold BN (inference) + conv bias into a per-channel scale / bias.
    inv_std = 1.0 / jnp.sqrt(var + BN_EPS)
    scale = gamma * inv_std
    bias = scale * (b - mean) + beta
    scale_p = jnp.zeros((1, cout_pad), jnp.float32).at[0, :cout].set(scale)
    bias_p = jnp.zeros((1, cout_pad), jnp.float32).at[0, :cout].set(bias)
    # padded channels: scale=0, bias=0 -> relu(0) = 0 exactly.

    kern = functools.partial(_conv_bn_relu_kernel,
                             ho=ho, wo=wo, cin=cin, cout=cout_pad)
    out = pl.pallas_call(
        kern,
        out_shape=jax.ShapeDtypeStruct((n * ho * wo, cout_pad), jnp.float32),
        grid_spec=pltpu.PrefetchScalarGridSpec(
            num_scalar_prefetch=0,
            grid=(n,),                                     # one sample / step
            in_specs=[
                pl.BlockSpec((4, hq, wq, cin), lambda i: (i, 0, 0, 0)),
                pl.BlockSpec((9, cin, cout_pad), lambda i: (0, 0, 0)),
                pl.BlockSpec((1, cout_pad), lambda i: (0, 0)),
                pl.BlockSpec((1, cout_pad), lambda i: (0, 0)),
            ],
            out_specs=pl.BlockSpec((ho * wo, cout_pad), lambda i: (i, 0)),
        ),
        compiler_params=pltpu.CompilerParams(
            dimension_semantics=("parallel",),             # megacore / v7x 2-TC
            vmem_limit_bytes=VMEM_LIMIT,
        ),
    )(ph, w9, scale_p, bias_p)
    return out.reshape(n, ho, wo, cout_pad)


# ----------------------------------------------------------------------------
# Fused Linear kernel: out = A @ B + bias   (bf16 MXU, f32 accumulate).
# No scale multiply, no padding, no post-slice.
# ----------------------------------------------------------------------------
def _linear_kernel(a_ref, b_ref, bias_ref, o_ref):
    a = a_ref[...].astype(jnp.bfloat16)
    acc = jnp.dot(a, b_ref[...], preferred_element_type=jnp.float32)
    o_ref[...] = acc + bias_ref[...]


def linear_pallas(a, b_kl, bias):
    m, k = a.shape
    k2, nl = b_kl.shape
    assert k == k2
    return pl.pallas_call(
        _linear_kernel,
        out_shape=jax.ShapeDtypeStruct((m, nl), jnp.float32),
        grid_spec=pltpu.PrefetchScalarGridSpec(
            num_scalar_prefetch=0,
            grid=(1,),
            in_specs=[
                pl.BlockSpec((m, k), lambda i: (0, 0)),
                pl.BlockSpec((k, nl), lambda i: (0, 0)),
                pl.BlockSpec((1, nl), lambda i: (0, 0)),
            ],
            out_specs=pl.BlockSpec((m, nl), lambda i: (0, 0)),
        ),
        compiler_params=pltpu.CompilerParams(
            dimension_semantics=("arbitrary",),
            vmem_limit_bytes=VMEM_LIMIT,
        ),
    )(a.astype(jnp.float32), b_kl.astype(jnp.bfloat16),
      bias.reshape(1, nl).astype(jnp.float32))


# ----------------------------------------------------------------------------
# Parameter construction (deterministic, PyTorch shape conventions)
# ----------------------------------------------------------------------------
def make_params(key, in_channels, latent_dim):
    params = {}
    channels = [in_channels, 32, 64, 128]
    keys = jax.random.split(key, 20)
    ki = 0
    for li in range(3):
        cin, cout = channels[li], channels[li + 1]
        params[f"conv{li+1}_w"] = 0.1 * jax.random.normal(
            keys[ki], (cout, cin, 3, 3), jnp.float32); ki += 1
        params[f"conv{li+1}_b"] = 0.1 * jax.random.normal(
            keys[ki], (cout,), jnp.float32); ki += 1
        params[f"bn{li+1}_gamma"] = 1.0 + 0.1 * jax.random.normal(
            keys[ki], (cout,), jnp.float32); ki += 1
        params[f"bn{li+1}_beta"] = 0.1 * jax.random.normal(
            keys[ki], (cout,), jnp.float32); ki += 1
        params[f"bn{li+1}_mean"] = 0.1 * jax.random.normal(
            keys[ki], (cout,), jnp.float32); ki += 1
        params[f"bn{li+1}_var"] = jax.random.uniform(
            keys[ki], (cout,), jnp.float32, 0.5, 1.5); ki += 1
    fc_in = 128 * 4 * 4
    params["fc_w"] = 0.02 * jax.random.normal(
        keys[ki], (latent_dim, fc_in), jnp.float32); ki += 1
    params["fc_b"] = 0.02 * jax.random.normal(keys[ki], (latent_dim,), jnp.float32)
    return params


# ----------------------------------------------------------------------------
# Encoder forward on the Pallas kernels
# ----------------------------------------------------------------------------
def encoder_forward_pallas(x_nchw, params):
    x = jnp.transpose(x_nchw, (0, 2, 3, 1)).astype(jnp.float32)   # -> NHWC
    for li in range(3):
        x = conv_bn_relu_pallas(
            x,
            params[f"conv{li+1}_w"], params[f"conv{li+1}_b"],
            params[f"bn{li+1}_gamma"], params[f"bn{li+1}_beta"],
            params[f"bn{li+1}_mean"], params[f"bn{li+1}_var"])

    # x: (N, 4, 4, 128).  Flatten in (h, w, c) order = free row-major reshape;
    # the PyTorch NCHW flatten order is absorbed into the FC weight rows.
    n, hh, ww_, cc = x.shape
    flat = x.reshape(n, hh * ww_ * cc)

    fc_w = params["fc_w"]                                  # (latent, C*H*W)
    latent = fc_w.shape[0]
    w_perm = jnp.transpose(fc_w.reshape(latent, cc, hh, ww_),
                           (2, 3, 1, 0)).reshape(hh * ww_ * cc, latent)
    return linear_pallas(flat, w_perm, params["fc_b"])


# ----------------------------------------------------------------------------
# Pure-JAX f32 reference (for correctness check)
# ----------------------------------------------------------------------------
def encoder_forward_ref(x_nchw, params):
    x = x_nchw
    for li in range(3):
        w = params[f"conv{li+1}_w"]
        b = params[f"conv{li+1}_b"]
        x = lax.conv_general_dilated(
            x, w, window_strides=(2, 2), padding=[(1, 1), (1, 1)],
            dimension_numbers=("NCHW", "OIHW", "NCHW"))
        x = x + b[None, :, None, None]
        gamma = params[f"bn{li+1}_gamma"][None, :, None, None]
        beta = params[f"bn{li+1}_beta"][None, :, None, None]
        mean = params[f"bn{li+1}_mean"][None, :, None, None]
        var = params[f"bn{li+1}_var"][None, :, None, None]
        x = gamma * (x - mean) / jnp.sqrt(var + BN_EPS) + beta
        x = jnp.maximum(x, 0.0)
    flat = x.reshape(x.shape[0], -1)
    return flat @ params["fc_w"].T + params["fc_b"]


if __name__ == "__main__":
    key = jax.random.PRNGKey(0)
    k_x, k_p = jax.random.split(key)

    in_channels, latent_dim = 3, 128
    # 32x32 input -> 16 -> 8 -> 4 spatial, matching fc_input_size = 128*4*4
    x = jax.random.normal(k_x, (2, in_channels, 32, 32), jnp.float32)
    params = make_params(k_p, in_channels, latent_dim)

    fwd = jax.jit(encoder_forward_pallas)
    out = jax.block_until_ready(fwd(x, params))

    ref = encoder_forward_ref(x, params)
    assert out.shape == (2, latent_dim), out.shape
    # bf16 MXU inputs -> relaxed tolerance vs the f32 reference.
    assert jnp.allclose(out, ref, atol=5e-2, rtol=5e-2), \
        float(jnp.max(jnp.abs(out - ref)))

    print("KERNEL_OK")
</pallas_src>

<mosaic_0001>
module attributes {stable_mosaic.version = 11 : i64} {
  func.func @_conv_bn_relu_kernel(%arg0: i32, %arg1: memref<4x17x17x3xf32, #tpu.memory_space<vmem>>, %arg2: memref<9x3x128xbf16, #tpu.memory_space<vmem>>, %arg3: memref<1x128xf32, #tpu.memory_space<vmem>>, %arg4: memref<1x128xf32, #tpu.memory_space<vmem>>, %arg5: memref<256x128xf32, #tpu.memory_space<vmem>>) attributes {dimension_semantics = [#tpu.dimension_semantics<parallel>], iteration_bounds = array<i64: 2>, scalar_prefetch = 0 : i64, scratch_operands = 0 : i64, tpu.core_type = #tpu.core_type<tc>, window_params = [{transform_indices = @transform_0, window_bounds = array<i64: 4, 17, 17, 3>}, {pipeline_mode = #tpu.pipeline_mode<synchronous>, transform_indices = @transform_1, window_bounds = array<i64: 9, 3, 128>}, {pipeline_mode = #tpu.pipeline_mode<synchronous>, transform_indices = @transform_2, window_bounds = array<i64: 1, 128>}, {pipeline_mode = #tpu.pipeline_mode<synchronous>, transform_indices = @transform_3, window_bounds = array<i64: 1, 128>}, {transform_indices = @transform_4, window_bounds = array<i64: 256, 128>}]} {
    %cst = arith.constant 0.000000e+00 : f32
    %0 = vector.broadcast %cst : f32 to vector<256x128xf32>
    %c0 = arith.constant 0 : index
    %c0_0 = arith.constant 0 : index
    %c0_1 = arith.constant 0 : index
    %c0_2 = arith.constant 0 : index
    %1 = vector.load %arg1[%c0, %c0_0, %c0_1, %c0_2] : memref<4x17x17x3xf32, #tpu.memory_space<vmem>>, vector<1x17x17x3xf32>
    %2 = vector.shape_cast %1 : vector<1x17x17x3xf32> to vector<17x17x3xf32>
    %3 = vector.extract_strided_slice %2 {offsets = [0, 0, 0], sizes = [16, 16, 3], strides = [1, 1, 1]} : vector<17x17x3xf32> to vector<16x16x3xf32>
    %4 = vector.shape_cast %3 : vector<16x16x3xf32> to vector<256x3xf32>
    %5 = arith.truncf %4 : vector<256x3xf32> to vector<256x3xbf16>
    %c0_3 = arith.constant 0 : index
    %c0_4 = arith.constant 0 : index
    %c0_5 = arith.constant 0 : index
    %6 = vector.load %arg2[%c0_3, %c0_4, %c0_5] : memref<9x3x128xbf16, #tpu.memory_space<vmem>>, vector<1x3x128xbf16>
    %7 = vector.shape_cast %6 : vector<1x3x128xbf16> to vector<3x128xbf16>
    %cst_6 = arith.constant dense<0.000000e+00> : vector<256x128xf32>
    %8 = tpu.matmul %5, %7, %cst_6 {dimension_numbers = #tpu.dot_dimension_numbers<[1], [0], [0], [1], [0, 0, 1, 1], [], []>} : vector<256x3xbf16>, vector<3x128xbf16>, vector<256x128xf32> -> vector<256x128xf32>
    %9 = arith.addf %0, %8 : vector<256x128xf32>
    %10 = vector.extract_strided_slice %2 {offsets = [0, 1, 0], sizes = [16, 16, 3], strides = [1, 1, 1]} : vector<17x17x3xf32> to vector<16x16x3xf32>
    %11 = vector.shape_cast %10 : vector<16x16x3xf32> to vector<256x3xf32>
    %12 = arith.truncf %11 : vector<256x3xf32> to vector<256x3xbf16>
    %c2 = arith.constant 2 : index
    %c0_7 = arith.constant 0 : index
    %c0_8 = arith.constant 0 : index
    %13 = vector.load %arg2[%c2, %c0_7, %c0_8] : memref<9x3x128xbf16, #tpu.memory_space<vmem>>, vector<1x3x128xbf16>
    %14 = vector.shape_cast %13 : vector<1x3x128xbf16> to vector<3x128xbf16>
    %cst_9 = arith.constant dense<0.000000e+00> : vector<256x128xf32>
    %15 = tpu.matmul %12, %14, %cst_9 {dimension_numbers = #tpu.dot_dimension_numbers<[1], [0], [0], [1], [0, 0, 1, 1], [], []>} : vector<256x3xbf16>, vector<3x128xbf16>, vector<256x128xf32> -> vector<256x128xf32>
    %16 = arith.addf %9, %15 : vector<256x128xf32>
    %17 = vector.extract_strided_slice %2 {offsets = [1, 0, 0], sizes = [16, 16, 3], strides = [1, 1, 1]} : vector<17x17x3xf32> to vector<16x16x3xf32>
    %18 = vector.shape_cast %17 : vector<16x16x3xf32> to vector<256x3xf32>
    %19 = arith.truncf %18 : vector<256x3xf32> to vector<256x3xbf16>
    %c6 = arith.constant 6 : index
    %c0_10 = arith.constant 0 : index
    %c0_11 = arith.constant 0 : index
    %20 = vector.load %arg2[%c6, %c0_10, %c0_11] : memref<9x3x128xbf16, #tpu.memory_space<vmem>>, vector<1x3x128xbf16>
    %21 = vector.shape_cast %20 : vector<1x3x128xbf16> to vector<3x128xbf16>
    %cst_12 = arith.constant dense<0.000000e+00> : vector<256x128xf32>
    %22 = tpu.matmul %19, %21, %cst_12 {dimension_numbers = #tpu.dot_dimension_numbers<[1], [0], [0], [1], [0, 0, 1, 1], [], []>} : vector<256x3xbf16>, vector<3x128xbf16>, vector<256x128xf32> -> vector<256x128xf32>
    %23 = arith.addf %16, %22 : vector<256x128xf32>
    %24 = vector.extract_strided_slice %2 {offsets = [1, 1, 0], sizes = [16, 16, 3], strides = [1, 1, 1]} : vector<17x17x3xf32> to vector<16x16x3xf32>
    %25 = vector.shape_cast %24 : vector<16x16x3xf32> to vector<256x3xf32>
    %26 = arith.truncf %25 : vector<256x3xf32> to vector<256x3xbf16>
    %c8 = arith.constant 8 : index
    %c0_13 = arith.constant 0 : index
    %c0_14 = arith.constant 0 : index
    %27 = vector.load %arg2[%c8, %c0_13, %c0_14] : memref<9x3x128xbf16, #tpu.memory_space<vmem>>, vector<1x3x128xbf16>
    %28 = vector.shape_cast %27 : vector<1x3x128xbf16> to vector<3x128xbf16>
    %cst_15 = arith.constant dense<0.000000e+00> : vector<256x128xf32>
    %29 = tpu.matmul %26, %28, %cst_15 {dimension_numbers = #tpu.dot_dimension_numbers<[1], [0], [0], [1], [0, 0, 1, 1], [], []>} : vector<256x3xbf16>, vector<3x128xbf16>, vector<256x128xf32> -> vector<256x128xf32>
    %30 = arith.addf %23, %29 : vector<256x128xf32>
    %c1 = arith.constant 1 : index
    %c0_16 = arith.constant 0 : index
    %c0_17 = arith.constant 0 : index
    %c0_18 = arith.constant 0 : index
    %31 = vector.load %arg1[%c1, %c0_16, %c0_17, %c0_18] : memref<4x17x17x3xf32, #tpu.memory_space<vmem>>, vector<1x17x17x3xf32>
    %32 = vector.shape_cast %31 : vector<1x17x17x3xf32> to vector<17x17x3xf32>
    %33 = vector.extract_strided_slice %32 {offsets = [0, 0, 0], sizes = [16, 16, 3], strides = [1, 1, 1]} : vector<17x17x3xf32> to vector<16x16x3xf32>
    %34 = vector.shape_cast %33 : vector<16x16x3xf32> to vector<256x3xf32>
    %35 = arith.truncf %34 : vector<256x3xf32> to vector<256x3xbf16>
    %c1_19 = arith.constant 1 : index
    %c0_20 = arith.constant 0 : index
    %c0_21 = arith.constant 0 : index
    %36 = vector.load %arg2[%c1_19, %c0_20, %c0_21] : memref<9x3x128xbf16, #tpu.memory_space<vmem>>, vector<1x3x128xbf16>
    %37 = vector.shape_cast %36 : vector<1x3x128xbf16> to vector<3x128xbf16>
    %cst_22 = arith.constant dense<0.000000e+00> : vector<256x128xf32>
    %38 = tpu.matmul %35, %37, %cst_22 {dimension_numbers = #tpu.dot_dimension_numbers<[1], [0], [0], [1], [0, 0, 1, 1], [], []>} : vector<256x3xbf16>, vector<3x128xbf16>, vector<256x128xf32> -> vector<256x128xf32>
    %39 = arith.addf %30, %38 : vector<256x128xf32>
    %40 = vector.extract_strided_slice %32 {offsets = [1, 0, 0], sizes = [16, 16, 3], strides = [1, 1, 1]} : vector<17x17x3xf32> to vector<16x16x3xf32>
    %41 = vector.shape_cast %40 : vector<16x16x3xf32> to vector<256x3xf32>
    %42 = arith.truncf %41 : vector<256x3xf32> to vector<256x3xbf16>
    %c7 = arith.constant 7 : index
    %c0_23 = arith.constant 0 : index
    %c0_24 = arith.constant 0 : index
    %43 = vector.load %arg2[%c7, %c0_23, %c0_24] : memref<9x3x128xbf16, #tpu.memory_space<vmem>>, vector<1x3x128xbf16>
    %44 = vector.shape_cast %43 : vector<1x3x128xbf16> to vector<3x128xbf16>
    %cst_25 = arith.constant dense<0.000000e+00> : vector<256x128xf32>
    %45 = tpu.matmul %42, %44, %cst_25 {dimension_numbers = #tpu.dot_dimension_numbers<[1], [0], [0], [1], [0, 0, 1, 1], [], []>} : vector<256x3xbf16>, vector<3x128xbf16>, vector<256x128xf32> -> vector<256x128xf32>
    %46 = arith.addf %39, %45 : vector<256x128xf32>
    %c2_26 = arith.constant 2 : index
    %c0_27 = arith.constant 0 : index
    %c0_28 = arith.constant 0 : index
    %c0_29 = arith.constant 0 : index
    %47 = vector.load %arg1[%c2_26, %c0_27, %c0_28, %c0_29] : memref<4x17x17x3xf32, #tpu.memory_space<vmem>>, vector<1x17x17x3xf32>
    %48 = vector.shape_cast %47 : vector<1x17x17x3xf32> to vector<17x17x3xf32>
    %49 = vector.extract_strided_slice %48 {offsets = [0, 0, 0], sizes = [16, 16, 3], strides = [1, 1, 1]} : vector<17x17x3xf32> to vector<16x16x3xf32>
    %50 = vector.shape_cast %49 : vector<16x16x3xf32> to vector<256x3xf32>
    %51 = arith.truncf %50 : vector<256x3xf32> to vector<256x3xbf16>
    %c3 = arith.constant 3 : index
    %c0_30 = arith.constant 0 : index
    %c0_31 = arith.constant 0 : index
    %52 = vector.load %arg2[%c3, %c0_30, %c0_31] : memref<9x3x128xbf16, #tpu.memory_space<vmem>>, vector<1x3x128xbf16>
    %53 = vector.shape_cast %52 : vector<1x3x128xbf16> to vector<3x128xbf16>
    %cst_32 = arith.constant dense<0.000000e+00> : vector<256x128xf32>
    %54 = tpu.matmul %51, %53, %cst_32 {dimension_numbers = #tpu.dot_dimension_numbers<[1], [0], [0], [1], [0, 0, 1, 1], [], []>} : vector<256x3xbf16>, vector<3x128xbf16>, vector<256x128xf32> -> vector<256x128xf32>
    %55 = arith.addf %46, %54 : vector<256x128xf32>
    %56 = vector.extract_strided_slice %48 {offsets = [0, 1, 0], sizes = [16, 16, 3], strides = [1, 1, 1]} : vector<17x17x3xf32> to vector<16x16x3xf32>
    %57 = vector.shape_cast %56 : vector<16x16x3xf32> to vector<256x3xf32>
    %58 = arith.truncf %57 : vector<256x3xf32> to vector<256x3xbf16>
    %c5 = arith.constant 5 : index
    %c0_33 = arith.constant 0 : index
    %c0_34 = arith.constant 0 : index
    %59 = vector.load %arg2[%c5, %c0_33, %c0_34] : memref<9x3x128xbf16, #tpu.memory_space<vmem>>, vector<1x3x128xbf16>
    %60 = vector.shape_cast %59 : vector<1x3x128xbf16> to vector<3x128xbf16>
    %cst_35 = arith.constant dense<0.000000e+00> : vector<256x128xf32>
    %61 = tpu.matmul %58, %60, %cst_35 {dimension_numbers = #tpu.dot_dimension_numbers<[1], [0], [0], [1], [0, 0, 1, 1], [], []>} : vector<256x3xbf16>, vector<3x128xbf16>, vector<256x128xf32> -> vector<256x128xf32>
    %62 = arith.addf %55, %61 : vector<256x128xf32>
    %c3_36 = arith.constant 3 : index
    %c0_37 = arith.constant 0 : index
    %c0_38 = arith.constant 0 : index
    %c0_39 = arith.constant 0 : index
    %63 = vector.load %arg1[%c3_36, %c0_37, %c0_38, %c0_39] : memref<4x17x17x3xf32, #tpu.memory_space<vmem>>, vector<1x17x17x3xf32>
    %64 = vector.shape_cast %63 : vector<1x17x17x3xf32> to vector<17x17x3xf32>
    %65 = vector.extract_strided_slice %64 {offsets = [0, 0, 0], sizes = [16, 16, 3], strides = [1, 1, 1]} : vector<17x17x3xf32> to vector<16x16x3xf32>
    %66 = vector.shape_cast %65 : vector<16x16x3xf32> to vector<256x3xf32>
    %67 = arith.truncf %66 : vector<256x3xf32> to vector<256x3xbf16>
    %c4 = arith.constant 4 : index
    %c0_40 = arith.constant 0 : index
    %c0_41 = arith.constant 0 : index
    %68 = vector.load %arg2[%c4, %c0_40, %c0_41] : memref<9x3x128xbf16, #tpu.memory_space<vmem>>, vector<1x3x128xbf16>
    %69 = vector.shape_cast %68 : vector<1x3x128xbf16> to vector<3x128xbf16>
    %cst_42 = arith.constant dense<0.000000e+00> : vector<256x128xf32>
    %70 = tpu.matmul %67, %69, %cst_42 {dimension_numbers = #tpu.dot_dimension_numbers<[1], [0], [0], [1], [0, 0, 1, 1], [], []>} : vector<256x3xbf16>, vector<3x128xbf16>, vector<256x128xf32> -> vector<256x128xf32>
    %71 = arith.addf %62, %70 : vector<256x128xf32>
    %c0_43 = arith.constant 0 : index
    %c0_44 = arith.constant 0 : index
    %72 = vector.load %arg3[%c0_43, %c0_44] : memref<1x128xf32, #tpu.memory_space<vmem>>, vector<1x128xf32>
    %73 = vector.broadcast %72 : vector<1x128xf32> to vector<256x128xf32>
    %74 = arith.mulf %71, %73 : vector<256x128xf32>
    %c0_45 = arith.constant 0 : index
    %c0_46 = arith.constant 0 : index
    %75 = vector.load %arg4[%c0_45, %c0_46] : memref<1x128xf32, #tpu.memory_space<vmem>>, vector<1x128xf32>
    %76 = vector.broadcast %75 : vector<1x128xf32> to vector<256x128xf32>
    %77 = arith.addf %74, %76 : vector<256x128xf32>
    %cst_47 = arith.constant 0.000000e+00 : f32
    %78 = vector.broadcast %cst_47 : f32 to vector<256x128xf32>
    %79 = arith.maximumf %77, %78 : vector<256x128xf32>
    %c0_48 = arith.constant 0 : index
    %c0_49 = arith.constant 0 : index
    %80 = vector.load %arg5[%c0_48, %c0_49] : memref<256x128xf32, #tpu.memory_space<vmem>>, vector<256x128xf32>
    tpu.vector_store %arg5[%c0_48, %c0_49], %79 {strides = array<i32>} : memref<256x128xf32, #tpu.memory_space<vmem>>, vector<256x128xf32>,
    return
  }
  func.func @transform_0(%arg0: i32) -> (i32, i32, i32, i32) {
    %c0_i32 = arith.constant 0 : i32
    %c0_i32_0 = arith.constant 0 : i32
    %c0_i32_1 = arith.constant 0 : i32
    %c0_i32_2 = arith.constant 0 : i32
    return %arg0, %c0_i32, %c0_i32_0, %c0_i32_1 : i32, i32, i32, i32
  }
  func.func @transform_1(%arg0: i32) -> (i32, i32, i32) {
    %c0_i32 = arith.constant 0 : i32
    %c0_i32_0 = arith.constant 0 : i32
    %c0_i32_1 = arith.constant 0 : i32
    %c0_i32_2 = arith.constant 0 : i32
    return %c0_i32, %c0_i32_0, %c0_i32_1 : i32, i32, i32
  }
  func.func @transform_2(%arg0: i32) -> (i32, i32) {
    %c0_i32 = arith.constant 0 : i32
    %c0_i32_0 = arith.constant 0 : i32
    %c0_i32_1 = arith.constant 0 : i32
    return %c0_i32, %c0_i32_0 : i32, i32
  }
  func.func @transform_3(%arg0: i32) -> (i32, i32) {
    %c0_i32 = arith.constant 0 : i32
    %c0_i32_0 = arith.constant 0 : i32
    %c0_i32_1 = arith.constant 0 : i32
    return %c0_i32, %c0_i32_0 : i32, i32
  }
  func.func @transform_4(%arg0: i32) -> (i32, i32) {
    %c0_i32 = arith.constant 0 : i32
    %c0_i32_0 = arith.constant 0 : i32
    return %arg0, %c0_i32 : i32, i32
  }
}

module attributes {stable_mosaic.version = 11 : i64} {
  func.func @_conv_bn_relu_kernel(%arg0: i32, %arg1: memref<4x9x9x128xf32, #tpu.memory_space<vmem>>, %arg2: memref<9x128x128xbf16, #tpu.memory_space<vmem>>, %arg3: memref<1x128xf32, #tpu.memory_space<vmem>>, %arg4: memref<1x128xf32, #tpu.memory_space<vmem>>, %arg5: memref<64x128xf32, #tpu.memory_space<vmem>>) attributes {dimension_semantics = [#tpu.dimension_semantics<parallel>], iteration_bounds = array<i64: 2>, scalar_prefetch = 0 : i64, scratch_operands = 0 : i64, tpu.core_type = #tpu.core_type<tc>, window_params = [{transform_indices = @transform_0, window_bounds = array<i64: 4, 9, 9, 128>}, {pipeline_mode = #tpu.pipeline_mode<synchronous>, transform_indices = @transform_1, window_bounds = array<i64: 9, 128, 128>}, {pipeline_mode = #tpu.pipeline_mode<synchronous>, transform_indices = @transform_2, window_bounds = array<i64: 1, 128>}, {pipeline_mode = #tpu.pipeline_mode<synchronous>, transform_indices = @transform_3, window_bounds = array<i64: 1, 128>}, {transform_indices = @transform_4, window_bounds = array<i64: 64, 128>}]} {
    %cst = arith.constant 0.000000e+00 : f32
    %0 = vector.broadcast %cst : f32 to vector<64x128xf32>
    %c0 = arith.constant 0 : index
    %c0_0 = arith.constant 0 : index
    %c0_1 = arith.constant 0 : index
    %c0_2 = arith.constant 0 : index
    %1 = vector.load %arg1[%c0, %c0_0, %c0_1, %c0_2] : memref<4x9x9x128xf32, #tpu.memory_space<vmem>>, vector<1x9x9x128xf32>
    %2 = vector.shape_cast %1 : vector<1x9x9x128xf32> to vector<9x9x128xf32>
    %3 = vector.extract_strided_slice %2 {offsets = [0, 0, 0], sizes = [8, 8, 128], strides = [1, 1, 1]} : vector<9x9x128xf32> to vector<8x8x128xf32>
    %4 = vector.shape_cast %3 : vector<8x8x128xf32> to vector<64x128xf32>
    %5 = arith.truncf %4 : vector<64x128xf32> to vector<64x128xbf16>
    %c0_3 = arith.constant 0 : index
    %c0_4 = arith.constant 0 : index
    %c0_5 = arith.constant 0 : index
    %6 = vector.load %arg2[%c0_3, %c0_4, %c0_5] : memref<9x128x128xbf16, #tpu.memory_space<vmem>>, vector<1x128x128xbf16>
    %7 = vector.shape_cast %6 : vector<1x128x128xbf16> to vector<128x128xbf16>
    %cst_6 = arith.constant dense<0.000000e+00> : vector<64x128xf32>
    %8 = tpu.matmul %5, %7, %cst_6 {dimension_numbers = #tpu.dot_dimension_numbers<[1], [0], [0], [1], [0, 0, 1, 1], [], []>} : vector<64x128xbf16>, vector<128x128xbf16>, vector<64x128xf32> -> vector<64x128xf32>
    %9 = arith.addf %0, %8 : vector<64x128xf32>
    %10 = vector.extract_strided_slice %2 {offsets = [0, 1, 0], sizes = [8, 8, 128], strides = [1, 1, 1]} : vector<9x9x128xf32> to vector<8x8x128xf32>
    %11 = vector.shape_cast %10 : vector<8x8x128xf32> to vector<64x128xf32>
    %12 = arith.truncf %11 : vector<64x128xf32> to vector<64x128xbf16>
    %c2 = arith.constant 2 : index
    %c0_7 = arith.constant 0 : index
    %c0_8 = arith.constant 0 : index
    %13 = vector.load %arg2[%c2, %c0_7, %c0_8] : memref<9x128x128xbf16, #tpu.memory_space<vmem>>, vector<1x128x128xbf16>
    %14 = vector.shape_cast %13 : vector<1x128x128xbf16> to vector<128x128xbf16>
    %cst_9 = arith.constant dense<0.000000e+00> : vector<64x128xf32>
    %15 = tpu.matmul %12, %14, %cst_9 {dimension_numbers = #tpu.dot_dimension_numbers<[1], [0], [0], [1], [0, 0, 1, 1], [], []>} : vector<64x128xbf16>, vector<128x128xbf16>, vector<64x128xf32> -> vector<64x128xf32>
    %16 = arith.addf %9, %15 : vector<64x128xf32>
    %17 = vector.extract_strided_slice %2 {offsets = [1, 0, 0], sizes = [8, 8, 128], strides = [1, 1, 1]} : vector<9x9x128xf32> to vector<8x8x128xf32>
    %18 = vector.shape_cast %17 : vector<8x8x128xf32> to vector<64x128xf32>
    %19 = arith.truncf %18 : vector<64x128xf32> to vector<64x128xbf16>
    %c6 = arith.constant 6 : index
    %c0_10 = arith.constant 0 : index
    %c0_11 = arith.constant 0 : index
    %20 = vector.load %arg2[%c6, %c0_10, %c0_11] : memref<9x128x128xbf16, #tpu.memory_space<vmem>>, vector<1x128x128xbf16>
    %21 = vector.shape_cast %20 : vector<1x128x128xbf16> to vector<128x128xbf16>
    %cst_12 = arith.constant dense<0.000000e+00> : vector<64x128xf32>
    %22 = tpu.matmul %19, %21, %cst_12 {dimension_numbers = #tpu.dot_dimension_numbers<[1], [0], [0], [1], [0, 0, 1, 1], [], []>} : vector<64x128xbf16>, vector<128x128xbf16>, vector<64x128xf32> -> vector<64x128xf32>
    %23 = arith.addf %16, %22 : vector<64x128xf32>
    %24 = vector.extract_strided_slice %2 {offsets = [1, 1, 0], sizes = [8, 8, 128], strides = [1, 1, 1]} : vector<9x9x128xf32> to vector<8x8x128xf32>
    %25 = vector.shape_cast %24 : vector<8x8x128xf32> to vector<64x128xf32>
    %26 = arith.truncf %25 : vector<64x128xf32> to vector<64x128xbf16>
    %c8 = arith.constant 8 : index
    %c0_13 = arith.constant 0 : index
    %c0_14 = arith.constant 0 : index
    %27 = vector.load %arg2[%c8, %c0_13, %c0_14] : memref<9x128x128xbf16, #tpu.memory_space<vmem>>, vector<1x128x128xbf16>
    %28 = vector.shape_cast %27 : vector<1x128x128xbf16> to vector<128x128xbf16>
    %cst_15 = arith.constant dense<0.000000e+00> : vector<64x128xf32>
    %29 = tpu.matmul %26, %28, %cst_15 {dimension_numbers = #tpu.dot_dimension_numbers<[1], [0], [0], [1], [0, 0, 1, 1], [], []>} : vector<64x128xbf16>, vector<128x128xbf16>, vector<64x128xf32> -> vector<64x128xf32>
    %30 = arith.addf %23, %29 : vector<64x128xf32>
    %c1 = arith.constant 1 : index
    %c0_16 = arith.constant 0 : index
    %c0_17 = arith.constant 0 : index
    %c0_18 = arith.constant 0 : index
    %31 = vector.load %arg1[%c1, %c0_16, %c0_17, %c0_18] : memref<4x9x9x128xf32, #tpu.memory_space<vmem>>, vector<1x9x9x128xf32>
    %32 = vector.shape_cast %31 : vector<1x9x9x128xf32> to vector<9x9x128xf32>
    %33 = vector.extract_strided_slice %32 {offsets = [0, 0, 0], sizes = [8, 8, 128], strides = [1, 1, 1]} : vector<9x9x128xf32> to vector<8x8x128xf32>
    %34 = vector.shape_cast %33 : vector<8x8x128xf32> to vector<64x128xf32>
    %35 = arith.truncf %34 : vector<64x128xf32> to vector<64x128xbf16>
    %c1_19 = arith.constant 1 : index
    %c0_20 = arith.constant 0 : index
    %c0_21 = arith.constant 0 : index
    %36 = vector.load %arg2[%c1_19, %c0_20, %c0_21] : memref<9x128x128xbf16, #tpu.memory_space<vmem>>, vector<1x128x128xbf16>
    %37 = vector.shape_cast %36 : vector<1x128x128xbf16> to vector<128x128xbf16>
    %cst_22 = arith.constant dense<0.000000e+00> : vector<64x128xf32>
    %38 = tpu.matmul %35, %37, %cst_22 {dimension_numbers = #tpu.dot_dimension_numbers<[1], [0], [0], [1], [0, 0, 1, 1], [], []>} : vector<64x128xbf16>, vector<128x128xbf16>, vector<64x128xf32> -> vector<64x128xf32>
    %39 = arith.addf %30, %38 : vector<64x128xf32>
    %40 = vector.extract_strided_slice %32 {offsets = [1, 0, 0], sizes = [8, 8, 128], strides = [1, 1, 1]} : vector<9x9x128xf32> to vector<8x8x128xf32>
    %41 = vector.shape_cast %40 : vector<8x8x128xf32> to vector<64x128xf32>
    %42 = arith.truncf %41 : vector<64x128xf32> to vector<64x128xbf16>
    %c7 = arith.constant 7 : index
    %c0_23 = arith.constant 0 : index
    %c0_24 = arith.constant 0 : index
    %43 = vector.load %arg2[%c7, %c0_23, %c0_24] : memref<9x128x128xbf16, #tpu.memory_space<vmem>>, vector<1x128x128xbf16>
    %44 = vector.shape_cast %43 : vector<1x128x128xbf16> to vector<128x128xbf16>
    %cst_25 = arith.constant dense<0.000000e+00> : vector<64x128xf32>
    %45 = tpu.matmul %42, %44, %cst_25 {dimension_numbers = #tpu.dot_dimension_numbers<[1], [0], [0], [1], [0, 0, 1, 1], [], []>} : vector<64x128xbf16>, vector<128x128xbf16>, vector<64x128xf32> -> vector<64x128xf32>
    %46 = arith.addf %39, %45 : vector<64x128xf32>
    %c2_26 = arith.constant 2 : index
    %c0_27 = arith.constant 0 : index
    %c0_28 = arith.constant 0 : index
    %c0_29 = arith.constant 0 : index
    %47 = vector.load %arg1[%c2_26, %c0_27, %c0_28, %c0_29] : memref<4x9x9x128xf32, #tpu.memory_space<vmem>>, vector<1x9x9x128xf32>
    %48 = vector.shape_cast %47 : vector<1x9x9x128xf32> to vector<9x9x128xf32>
    %49 = vector.extract_strided_slice %48 {offsets = [0, 0, 0], sizes = [8, 8, 128], strides = [1, 1, 1]} : vector<9x9x128xf32> to vector<8x8x128xf32>
    %50 = vector.shape_cast %49 : vector<8x8x128xf32> to vector<64x128xf32>
    %51 = arith.truncf %50 : vector<64x128xf32> to vector<64x128xbf16>
    %c3 = arith.constant 3 : index
    %c0_30 = arith.constant 0 : index
    %c0_31 = arith.constant 0 : index
    %52 = vector.load %arg2[%c3, %c0_30, %c0_31] : memref<9x128x128xbf16, #tpu.memory_space<vmem>>, vector<1x128x128xbf16>
    %53 = vector.shape_cast %52 : vector<1x128x128xbf16> to vector<128x128xbf16>
    %cst_32 = arith.constant dense<0.000000e+00> : vector<64x128xf32>
    %54 = tpu.matmul %51, %53, %cst_32 {dimension_numbers = #tpu.dot_dimension_numbers<[1], [0], [0], [1], [0, 0, 1, 1], [], []>} : vector<64x128xbf16>, vector<128x128xbf16>, vector<64x128xf32> -> vector<64x128xf32>
    %55 = arith.addf %46, %54 : vector<64x128xf32>
    %56 = vector.extract_strided_slice %48 {offsets = [0, 1, 0], sizes = [8, 8, 128], strides = [1, 1, 1]} : vector<9x9x128xf32> to vector<8x8x128xf32>
    %57 = vector.shape_cast %56 : vector<8x8x128xf32> to vector<64x128xf32>
    %58 = arith.truncf %57 : vector<64x128xf32> to vector<64x128xbf16>
    %c5 = arith.constant 5 : index
    %c0_33 = arith.constant 0 : index
    %c0_34 = arith.constant 0 : index
    %59 = vector.load %arg2[%c5, %c0_33, %c0_34] : memref<9x128x128xbf16, #tpu.memory_space<vmem>>, vector<1x128x128xbf16>
    %60 = vector.shape_cast %59 : vector<1x128x128xbf16> to vector<128x128xbf16>
    %cst_35 = arith.constant dense<0.000000e+00> : vector<64x128xf32>
    %61 = tpu.matmul %58, %60, %cst_35 {dimension_numbers = #tpu.dot_dimension_numbers<[1], [0], [0], [1], [0, 0, 1, 1], [], []>} : vector<64x128xbf16>, vector<128x128xbf16>, vector<64x128xf32> -> vector<64x128xf32>
    %62 = arith.addf %55, %61 : vector<64x128xf32>
    %c3_36 = arith.constant 3 : index
    %c0_37 = arith.constant 0 : index
    %c0_38 = arith.constant 0 : index
    %c0_39 = arith.constant 0 : index
    %63 = vector.load %arg1[%c3_36, %c0_37, %c0_38, %c0_39] : memref<4x9x9x128xf32, #tpu.memory_space<vmem>>, vector<1x9x9x128xf32>
    %64 = vector.shape_cast %63 : vector<1x9x9x128xf32> to vector<9x9x128xf32>
    %65 = vector.extract_strided_slice %64 {offsets = [0, 0, 0], sizes = [8, 8, 128], strides = [1, 1, 1]} : vector<9x9x128xf32> to vector<8x8x128xf32>
    %66 = vector.shape_cast %65 : vector<8x8x128xf32> to vector<64x128xf32>
    %67 = arith.truncf %66 : vector<64x128xf32> to vector<64x128xbf16>
    %c4 = arith.constant 4 : index
    %c0_40 = arith.constant 0 : index
    %c0_41 = arith.constant 0 : index
    %68 = vector.load %arg2[%c4, %c0_40, %c0_41] : memref<9x128x128xbf16, #tpu.memory_space<vmem>>, vector<1x128x128xbf16>
    %69 = vector.shape_cast %68 : vector<1x128x128xbf16> to vector<128x128xbf16>
    %cst_42 = arith.constant dense<0.000000e+00> : vector<64x128xf32>
    %70 = tpu.matmul %67, %69, %cst_42 {dimension_numbers = #tpu.dot_dimension_numbers<[1], [0], [0], [1], [0, 0, 1, 1], [], []>} : vector<64x128xbf16>, vector<128x128xbf16>, vector<64x128xf32> -> vector<64x128xf32>
    %71 = arith.addf %62, %70 : vector<64x128xf32>
    %c0_43 = arith.constant 0 : index
    %c0_44 = arith.constant 0 : index
    %72 = vector.load %arg3[%c0_43, %c0_44] : memref<1x128xf32, #tpu.memory_space<vmem>>, vector<1x128xf32>
    %73 = vector.broadcast %72 : vector<1x128xf32> to vector<64x128xf32>
    %74 = arith.mulf %71, %73 : vector<64x128xf32>
    %c0_45 = arith.constant 0 : index
    %c0_46 = arith.constant 0 : index
    %75 = vector.load %arg4[%c0_45, %c0_46] : memref<1x128xf32, #tpu.memory_space<vmem>>, vector<1x128xf32>
    %76 = vector.broadcast %75 : vector<1x128xf32> to vector<64x128xf32>
    %77 = arith.addf %74, %76 : vector<64x128xf32>
    %cst_47 = arith.constant 0.000000e+00 : f32
    %78 = vector.broadcast %cst_47 : f32 to vector<64x128xf32>
    %79 = arith.maximumf %77, %78 : vector<64x128xf32>
    %c0_48 = arith.constant 0 : index
    %c0_49 = arith.constant 0 : index
    %80 = vector.load %arg5[%c0_48, %c0_49] : memref<64x128xf32, #tpu.memory_space<vmem>>, vector<64x128xf32>
    tpu.vector_store %arg5[%c0_48, %c0_49], %79 {strides = array<i32>} : memref<64x128xf32, #tpu.memory_space<vmem>>, vector<64x128xf32>,
    return
  }
  func.func @transform_0(%arg0: i32) -> (i32, i32, i32, i32) {
    %c0_i32 = arith.constant 0 : i32
    %c0_i32_0 = arith.constant 0 : i32
    %c0_i32_1 = arith.constant 0 : i32
    %c0_i32_2 = arith.constant 0 : i32
    return %arg0, %c0_i32, %c0_i32_0, %c0_i32_1 : i32, i32, i32, i32
  }
  func.func @transform_1(%arg0: i32) -> (i32, i32, i32) {
    %c0_i32 = arith.constant 0 : i32
    %c0_i32_0 = arith.constant 0 : i32
    %c0_i32_1 = arith.constant 0 : i32
    %c0_i32_2 = arith.constant 0 : i32
    return %c0_i32, %c0_i32_0, %c0_i32_1 : i32, i32, i32
  }
  func.func @transform_2(%arg0: i32) -> (i32, i32) {
    %c0_i32 = arith.constant 0 : i32
    %c0_i32_0 = arith.constant 0 : i32
    %c0_i32_1 = arith.constant 0 : i32
    return %c0_i32, %c0_i32_0 : i32, i32
  }
  func.func @transform_3(%arg0: i32) -> (i32, i32) {
    %c0_i32 = arith.constant 0 : i32
    %c0_i32_0 = arith.constant 0 : i32
    %c0_i32_1 = arith.constant 0 : i32
    return %c0_i32, %c0_i32_0 : i32, i32
  }
  func.func @transform_4(%arg0: i32) -> (i32, i32) {
    %c0_i32 = arith.constant 0 : i32
    %c0_i32_0 = arith.constant 0 : i32
    return %arg0, %c0_i32 : i32, i32
  }
}

module attributes {stable_mosaic.version = 11 : i64} {
  func.func @_conv_bn_relu_kernel(%arg0: i32, %arg1: memref<4x5x5x128xf32, #tpu.memory_space<vmem>>, %arg2: memref<9x128x128xbf16, #tpu.memory_space<vmem>>, %arg3: memref<1x128xf32, #tpu.memory_space<vmem>>, %arg4: memref<1x128xf32, #tpu.memory_space<vmem>>, %arg5: memref<16x128xf32, #tpu.memory_space<vmem>>) attributes {dimension_semantics = [#tpu.dimension_semantics<parallel>], iteration_bounds = array<i64: 2>, scalar_prefetch = 0 : i64, scratch_operands = 0 : i64, tpu.core_type = #tpu.core_type<tc>, window_params = [{transform_indices = @transform_0, window_bounds = array<i64: 4, 5, 5, 128>}, {pipeline_mode = #tpu.pipeline_mode<synchronous>, transform_indices = @transform_1, window_bounds = array<i64: 9, 128, 128>}, {pipeline_mode = #tpu.pipeline_mode<synchronous>, transform_indices = @transform_2, window_bounds = array<i64: 1, 128>}, {pipeline_mode = #tpu.pipeline_mode<synchronous>, transform_indices = @transform_3, window_bounds = array<i64: 1, 128>}, {transform_indices = @transform_4, window_bounds = array<i64: 16, 128>}]} {
    %cst = arith.constant 0.000000e+00 : f32
    %0 = vector.broadcast %cst : f32 to vector<16x128xf32>
    %c0 = arith.constant 0 : index
    %c0_0 = arith.constant 0 : index
    %c0_1 = arith.constant 0 : index
    %c0_2 = arith.constant 0 : index
    %1 = vector.load %arg1[%c0, %c0_0, %c0_1, %c0_2] : memref<4x5x5x128xf32, #tpu.memory_space<vmem>>, vector<1x5x5x128xf32>
    %2 = vector.shape_cast %1 : vector<1x5x5x128xf32> to vector<5x5x128xf32>
    %3 = vector.extract_strided_slice %2 {offsets = [0, 0, 0], sizes = [4, 4, 128], strides = [1, 1, 1]} : vector<5x5x128xf32> to vector<4x4x128xf32>
    %4 = vector.shape_cast %3 : vector<4x4x128xf32> to vector<16x128xf32>
    %5 = arith.truncf %4 : vector<16x128xf32> to vector<16x128xbf16>
    %c0_3 = arith.constant 0 : index
    %c0_4 = arith.constant 0 : index
    %c0_5 = arith.constant 0 : index
    %6 = vector.load %arg2[%c0_3, %c0_4, %c0_5] : memref<9x128x128xbf16, #tpu.memory_space<vmem>>, vector<1x128x128xbf16>
    %7 = vector.shape_cast %6 : vector<1x128x128xbf16> to vector<128x128xbf16>
    %cst_6 = arith.constant dense<0.000000e+00> : vector<16x128xf32>
    %8 = tpu.matmul %5, %7, %cst_6 {dimension_numbers = #tpu.dot_dimension_numbers<[1], [0], [0], [1], [0, 0, 1, 1], [], []>} : vector<16x128xbf16>, vector<128x128xbf16>, vector<16x128xf32> -> vector<16x128xf32>
    %9 = arith.addf %0, %8 : vector<16x128xf32>
    %10 = vector.extract_strided_slice %2 {offsets = [0, 1, 0], sizes = [4, 4, 128], strides = [1, 1, 1]} : vector<5x5x128xf32> to vector<4x4x128xf32>
    %11 = vector.shape_cast %10 : vector<4x4x128xf32> to vector<16x128xf32>
    %12 = arith.truncf %11 : vector<16x128xf32> to vector<16x128xbf16>
    %c2 = arith.constant 2 : index
    %c0_7 = arith.constant 0 : index
    %c0_8 = arith.constant 0 : index
    %13 = vector.load %arg2[%c2, %c0_7, %c0_8] : memref<9x128x128xbf16, #tpu.memory_space<vmem>>, vector<1x128x128xbf16>
    %14 = vector.shape_cast %13 : vector<1x128x128xbf16> to vector<128x128xbf16>
    %cst_9 = arith.constant dense<0.000000e+00> : vector<16x128xf32>
    %15 = tpu.matmul %12, %14, %cst_9 {dimension_numbers = #tpu.dot_dimension_numbers<[1], [0], [0], [1], [0, 0, 1, 1], [], []>} : vector<16x128xbf16>, vector<128x128xbf16>, vector<16x128xf32> -> vector<16x128xf32>
    %16 = arith.addf %9, %15 : vector<16x128xf32>
    %17 = vector.extract_strided_slice %2 {offsets = [1, 0, 0], sizes = [4, 4, 128], strides = [1, 1, 1]} : vector<5x5x128xf32> to vector<4x4x128xf32>
    %18 = vector.shape_cast %17 : vector<4x4x128xf32> to vector<16x128xf32>
    %19 = arith.truncf %18 : vector<16x128xf32> to vector<16x128xbf16>
    %c6 = arith.constant 6 : index
    %c0_10 = arith.constant 0 : index
    %c0_11 = arith.constant 0 : index
    %20 = vector.load %arg2[%c6, %c0_10, %c0_11] : memref<9x128x128xbf16, #tpu.memory_space<vmem>>, vector<1x128x128xbf16>
    %21 = vector.shape_cast %20 : vector<1x128x128xbf16> to vector<128x128xbf16>
    %cst_12 = arith.constant dense<0.000000e+00> : vector<16x128xf32>
    %22 = tpu.matmul %19, %21, %cst_12 {dimension_numbers = #tpu.dot_dimension_numbers<[1], [0], [0], [1], [0, 0, 1, 1], [], []>} : vector<16x128xbf16>, vector<128x128xbf16>, vector<16x128xf32> -> vector<16x128xf32>
    %23 = arith.addf %16, %22 : vector<16x128xf32>
    %24 = vector.extract_strided_slice %2 {offsets = [1, 1, 0], sizes = [4, 4, 128], strides = [1, 1, 1]} : vector<5x5x128xf32> to vector<4x4x128xf32>
    %25 = vector.shape_cast %24 : vector<4x4x128xf32> to vector<16x128xf32>
    %26 = arith.truncf %25 : vector<16x128xf32> to vector<16x128xbf16>
    %c8 = arith.constant 8 : index
    %c0_13 = arith.constant 0 : index
    %c0_14 = arith.constant 0 : index
    %27 = vector.load %arg2[%c8, %c0_13, %c0_14] : memref<9x128x128xbf16, #tpu.memory_space<vmem>>, vector<1x128x128xbf16>
    %28 = vector.shape_cast %27 : vector<1x128x128xbf16> to vector<128x128xbf16>
    %cst_15 = arith.constant dense<0.000000e+00> : vector<16x128xf32>
    %29 = tpu.matmul %26, %28, %cst_15 {dimension_numbers = #tpu.dot_dimension_numbers<[1], [0], [0], [1], [0, 0, 1, 1], [], []>} : vector<16x128xbf16>, vector<128x128xbf16>, vector<16x128xf32> -> vector<16x128xf32>
    %30 = arith.addf %23, %29 : vector<16x128xf32>
    %c1 = arith.constant 1 : index
    %c0_16 = arith.constant 0 : index
    %c0_17 = arith.constant 0 : index
    %c0_18 = arith.constant 0 : index
    %31 = vector.load %arg1[%c1, %c0_16, %c0_17, %c0_18] : memref<4x5x5x128xf32, #tpu.memory_space<vmem>>, vector<1x5x5x128xf32>
    %32 = vector.shape_cast %31 : vector<1x5x5x128xf32> to vector<5x5x128xf32>
    %33 = vector.extract_strided_slice %32 {offsets = [0, 0, 0], sizes = [4, 4, 128], strides = [1, 1, 1]} : vector<5x5x128xf32> to vector<4x4x128xf32>
    %34 = vector.shape_cast %33 : vector<4x4x128xf32> to vector<16x128xf32>
    %35 = arith.truncf %34 : vector<16x128xf32> to vector<16x128xbf16>
    %c1_19 = arith.constant 1 : index
    %c0_20 = arith.constant 0 : index
    %c0_21 = arith.constant 0 : index
    %36 = vector.load %arg2[%c1_19, %c0_20, %c0_21] : memref<9x128x128xbf16, #tpu.memory_space<vmem>>, vector<1x128x128xbf16>
    %37 = vector.shape_cast %36 : vector<1x128x128xbf16> to vector<128x128xbf16>
    %cst_22 = arith.constant dense<0.000000e+00> : vector<16x128xf32>
    %38 = tpu.matmul %35, %37, %cst_22 {dimension_numbers = #tpu.dot_dimension_numbers<[1], [0], [0], [1], [0, 0, 1, 1], [], []>} : vector<16x128xbf16>, vector<128x128xbf16>, vector<16x128xf32> -> vector<16x128xf32>
    %39 = arith.addf %30, %38 : vector<16x128xf32>
    %40 = vector.extract_strided_slice %32 {offsets = [1, 0, 0], sizes = [4, 4, 128], strides = [1, 1, 1]} : vector<5x5x128xf32> to vector<4x4x128xf32>
    %41 = vector.shape_cast %40 : vector<4x4x128xf32> to vector<16x128xf32>
    %42 = arith.truncf %41 : vector<16x128xf32> to vector<16x128xbf16>
    %c7 = arith.constant 7 : index
    %c0_23 = arith.constant 0 : index
    %c0_24 = arith.constant 0 : index
    %43 = vector.load %arg2[%c7, %c0_23, %c0_24] : memref<9x128x128xbf16, #tpu.memory_space<vmem>>, vector<1x128x128xbf16>
    %44 = vector.shape_cast %43 : vector<1x128x128xbf16> to vector<128x128xbf16>
    %cst_25 = arith.constant dense<0.000000e+00> : vector<16x128xf32>
    %45 = tpu.matmul %42, %44, %cst_25 {dimension_numbers = #tpu.dot_dimension_numbers<[1], [0], [0], [1], [0, 0, 1, 1], [], []>} : vector<16x128xbf16>, vector<128x128xbf16>, vector<16x128xf32> -> vector<16x128xf32>
    %46 = arith.addf %39, %45 : vector<16x128xf32>
    %c2_26 = arith.constant 2 : index
    %c0_27 = arith.constant 0 : index
    %c0_28 = arith.constant 0 : index
    %c0_29 = arith.constant 0 : index
    %47 = vector.load %arg1[%c2_26, %c0_27, %c0_28, %c0_29] : memref<4x5x5x128xf32, #tpu.memory_space<vmem>>, vector<1x5x5x128xf32>
    %48 = vector.shape_cast %47 : vector<1x5x5x128xf32> to vector<5x5x128xf32>
    %49 = vector.extract_strided_slice %48 {offsets = [0, 0, 0], sizes = [4, 4, 128], strides = [1, 1, 1]} : vector<5x5x128xf32> to vector<4x4x128xf32>
    %50 = vector.shape_cast %49 : vector<4x4x128xf32> to vector<16x128xf32>
    %51 = arith.truncf %50 : vector<16x128xf32> to vector<16x128xbf16>
    %c3 = arith.constant 3 : index
    %c0_30 = arith.constant 0 : index
    %c0_31 = arith.constant 0 : index
    %52 = vector.load %arg2[%c3, %c0_30, %c0_31] : memref<9x128x128xbf16, #tpu.memory_space<vmem>>, vector<1x128x128xbf16>
    %53 = vector.shape_cast %52 : vector<1x128x128xbf16> to vector<128x128xbf16>
    %cst_32 = arith.constant dense<0.000000e+00> : vector<16x128xf32>
    %54 = tpu.matmul %51, %53, %cst_32 {dimension_numbers = #tpu.dot_dimension_numbers<[1], [0], [0], [1], [0, 0, 1, 1], [], []>} : vector<16x128xbf16>, vector<128x128xbf16>, vector<16x128xf32> -> vector<16x128xf32>
    %55 = arith.addf %46, %54 : vector<16x128xf32>
    %56 = vector.extract_strided_slice %48 {offsets = [0, 1, 0], sizes = [4, 4, 128], strides = [1, 1, 1]} : vector<5x5x128xf32> to vector<4x4x128xf32>
    %57 = vector.shape_cast %56 : vector<4x4x128xf32> to vector<16x128xf32>
    %58 = arith.truncf %57 : vector<16x128xf32> to vector<16x128xbf16>
    %c5 = arith.constant 5 : index
    %c0_33 = arith.constant 0 : index
    %c0_34 = arith.constant 0 : index
    %59 = vector.load %arg2[%c5, %c0_33, %c0_34] : memref<9x128x128xbf16, #tpu.memory_space<vmem>>, vector<1x128x128xbf16>
    %60 = vector.shape_cast %59 : vector<1x128x128xbf16> to vector<128x128xbf16>
    %cst_35 = arith.constant dense<0.000000e+00> : vector<16x128xf32>
    %61 = tpu.matmul %58, %60, %cst_35 {dimension_numbers = #tpu.dot_dimension_numbers<[1], [0], [0], [1], [0, 0, 1, 1], [], []>} : vector<16x128xbf16>, vector<128x128xbf16>, vector<16x128xf32> -> vector<16x128xf32>
    %62 = arith.addf %55, %61 : vector<16x128xf32>
    %c3_36 = arith.constant 3 : index
    %c0_37 = arith.constant 0 : index
    %c0_38 = arith.constant 0 : index
    %c0_39 = arith.constant 0 : index
    %63 = vector.load %arg1[%c3_36, %c0_37, %c0_38, %c0_39] : memref<4x5x5x128xf32, #tpu.memory_space<vmem>>, vector<1x5x5x128xf32>
    %64 = vector.shape_cast %63 : vector<1x5x5x128xf32> to vector<5x5x128xf32>
    %65 = vector.extract_strided_slice %64 {offsets = [0, 0, 0], sizes = [4, 4, 128], strides = [1, 1, 1]} : vector<5x5x128xf32> to vector<4x4x128xf32>
    %66 = vector.shape_cast %65 : vector<4x4x128xf32> to vector<16x128xf32>
    %67 = arith.truncf %66 : vector<16x128xf32> to vector<16x128xbf16>
    %c4 = arith.constant 4 : index
    %c0_40 = arith.constant 0 : index
    %c0_41 = arith.constant 0 : index
    %68 = vector.load %arg2[%c4, %c0_40, %c0_41] : memref<9x128x128xbf16, #tpu.memory_space<vmem>>, vector<1x128x128xbf16>
    %69 = vector.shape_cast %68 : vector<1x128x128xbf16> to vector<128x128xbf16>
    %cst_42 = arith.constant dense<0.000000e+00> : vector<16x128xf32>
    %70 = tpu.matmul %67, %69, %cst_42 {dimension_numbers = #tpu.dot_dimension_numbers<[1], [0], [0], [1], [0, 0, 1, 1], [], []>} : vector<16x128xbf16>, vector<128x128xbf16>, vector<16x128xf32> -> vector<16x128xf32>
    %71 = arith.addf %62, %70 : vector<16x128xf32>
    %c0_43 = arith.constant 0 : index
    %c0_44 = arith.constant 0 : index
    %72 = vector.load %arg3[%c0_43, %c0_44] : memref<1x128xf32, #tpu.memory_space<vmem>>, vector<1x128xf32>
    %73 = vector.broadcast %72 : vector<1x128xf32> to vector<16x128xf32>
    %74 = arith.mulf %71, %73 : vector<16x128xf32>
    %c0_45 = arith.constant 0 : index
    %c0_46 = arith.constant 0 : index
    %75 = vector.load %arg4[%c0_45, %c0_46] : memref<1x128xf32, #tpu.memory_space<vmem>>, vector<1x128xf32>
    %76 = vector.broadcast %75 : vector<1x128xf32> to vector<16x128xf32>
    %77 = arith.addf %74, %76 : vector<16x128xf32>
    %cst_47 = arith.constant 0.000000e+00 : f32
    %78 = vector.broadcast %cst_47 : f32 to vector<16x128xf32>
    %79 = arith.maximumf %77, %78 : vector<16x128xf32>
    %c0_48 = arith.constant 0 : index
    %c0_49 = arith.constant 0 : index
    %80 = vector.load %arg5[%c0_48, %c0_49] : memref<16x128xf32, #tpu.memory_space<vmem>>, vector<16x128xf32>
    tpu.vector_store %arg5[%c0_48, %c0_49], %79 {strides = array<i32>} : memref<16x128xf32, #tpu.memory_space<vmem>>, vector<16x128xf32>,
    return
  }
  func.func @transform_0(%arg0: i32) -> (i32, i32, i32, i32) {
    %c0_i32 = arith.constant 0 : i32
    %c0_i32_0 = arith.constant 0 : i32
    %c0_i32_1 = arith.constant 0 : i32
    %c0_i32_2 = arith.constant 0 : i32
    return %arg0, %c0_i32, %c0_i32_0, %c0_i32_1 : i32, i32, i32, i32
  }
  func.func @transform_1(%arg0: i32) -> (i32, i32, i32) {
    %c0_i32 = arith.constant 0 : i32
    %c0_i32_0 = arith.constant 0 : i32
    %c0_i32_1 = arith.constant 0 : i32
    %c0_i32_2 = arith.constant 0 : i32
    return %c0_i32, %c0_i32_0, %c0_i32_1 : i32, i32, i32
  }
  func.func @transform_2(%arg0: i32) -> (i32, i32) {
    %c0_i32 = arith.constant 0 : i32
    %c0_i32_0 = arith.constant 0 : i32
    %c0_i32_1 = arith.constant 0 : i32
    return %c0_i32, %c0_i32_0 : i32, i32
  }
  func.func @transform_3(%arg0: i32) -> (i32, i32) {
    %c0_i32 = arith.constant 0 : i32
    %c0_i32_0 = arith.constant 0 : i32
    %c0_i32_1 = arith.constant 0 : i32
    return %c0_i32, %c0_i32_0 : i32, i32
  }
  func.func @transform_4(%arg0: i32) -> (i32, i32) {
    %c0_i32 = arith.constant 0 : i32
    %c0_i32_0 = arith.constant 0 : i32
    return %arg0, %c0_i32 : i32, i32
  }
}

module attributes {stable_mosaic.version = 11 : i64} {
  func.func @_linear_kernel(%arg0: i32, %arg1: memref<2x2048xf32, #tpu.memory_space<vmem>>, %arg2: memref<2048x128xbf16, #tpu.memory_space<vmem>>, %arg3: memref<1x128xf32, #tpu.memory_space<vmem>>, %arg4: memref<2x128xf32, #tpu.memory_space<vmem>>) attributes {dimension_semantics = [#tpu.dimension_semantics<arbitrary>], iteration_bounds = array<i64: 1>, scalar_prefetch = 0 : i64, scratch_operands = 0 : i64, tpu.core_type = #tpu.core_type<tc>, window_params = [{pipeline_mode = #tpu.pipeline_mode<synchronous>, transform_indices = @transform_0, window_bounds = array<i64: 2, 2048>}, {pipeline_mode = #tpu.pipeline_mode<synchronous>, transform_indices = @transform_1, window_bounds = array<i64: 2048, 128>}, {pipeline_mode = #tpu.pipeline_mode<synchronous>, transform_indices = @transform_2, window_bounds = array<i64: 1, 128>}, {pipeline_mode = #tpu.pipeline_mode<synchronous>, transform_indices = @transform_3, window_bounds = array<i64: 2, 128>}]} {
    %c0 = arith.constant 0 : index
    %c0_0 = arith.constant 0 : index
    %0 = vector.load %arg1[%c0, %c0_0] : memref<2x2048xf32, #tpu.memory_space<vmem>>, vector<2x2048xf32>
    %1 = arith.truncf %0 : vector<2x2048xf32> to vector<2x2048xbf16>
    %c0_1 = arith.constant 0 : index
    %c0_2 = arith.constant 0 : index
    %2 = vector.load %arg2[%c0_1, %c0_2] : memref<2048x128xbf16, #tpu.memory_space<vmem>>, vector<2048x128xbf16>
    %cst = arith.constant dense<0.000000e+00> : vector<2x128xf32>
    %3 = tpu.matmul %1, %2, %cst {dimension_numbers = #tpu.dot_dimension_numbers<[1], [0], [0], [1], [0, 0, 1, 1], [], []>} : vector<2x2048xbf16>, vector<2048x128xbf16>, vector<2x128xf32> -> vector<2x128xf32>
    %c0_3 = arith.constant 0 : index
    %c0_4 = arith.constant 0 : index
    %4 = vector.load %arg3[%c0_3, %c0_4] : memref<1x128xf32, #tpu.memory_space<vmem>>, vector<1x128xf32>
    %5 = vector.broadcast %4 : vector<1x128xf32> to vector<2x128xf32>
    %6 = arith.addf %3, %5 : vector<2x128xf32>
    %c0_5 = arith.constant 0 : index
    %c0_6 = arith.constant 0 : index
    %7 = vector.load %arg4[%c0_5, %c0_6] : memref<2x128xf32, #tpu.memory_space<vmem>>, vector<2x128xf32>
    tpu.vector_store %arg4[%c0_5, %c0_6], %6 {strides = array<i32>} : memref<2x128xf32, #tpu.memory_space<vmem>>, vector<2x128xf32>,
    return
  }
  func.func @transform_0(%arg0: i32) -> (i32, i32) {
    %c0_i32 = arith.constant 0 : i32
    %c0_i32_0 = arith.constant 0 : i32
    %c0_i32_1 = arith.constant 0 : i32
    return %c0_i32, %c0_i32_0 : i32, i32
  }
  func.func @transform_1(%arg0: i32) -> (i32, i32) {
    %c0_i32 = arith.constant 0 : i32
    %c0_i32_0 = arith.constant 0 : i32
    %c0_i32_1 = arith.constant 0 : i32
    return %c0_i32, %c0_i32_0 : i32, i32
  }
  func.func @transform_2(%arg0: i32) -> (i32, i32) {
    %c0_i32 = arith.constant 0 : i32
    %c0_i32_0 = arith.constant 0 : i32
    %c0_i32_1 = arith.constant 0 : i32
    return %c0_i32, %c0_i32_0 : i32, i32
  }
  func.func @transform_3(%arg0: i32) -> (i32, i32) {
    %c0_i32 = arith.constant 0 : i32
    %c0_i32_0 = arith.constant 0 : i32
    %c0_i32_1 = arith.constant 0 : i32
    return %c0_i32, %c0_i32_0 : i32, i32
  }
}

</mosaic_0001>

<bundles_post_ra>
// kernel: encoder_forward_pallas.4
= control target key start
LH: loop header
LB: loop body
LE: loop exit
PB: predicated region body
PF: predicated region fallthrough
CT: control target
= control target key end

     0   :  { %s3804_s15 = smov 0   ;;  %s5229_s0 = inlined_call_operand.vmem [shape: f32[8,17,17,3], index: 0, kind: input, shape index: {}]   ;;  %s5230_s1 = inlined_call_operand.vmem [shape: bf16[9,3,128], index: 1, kind: input, shape index: {}]   ;;  %s5231_s2 = inlined_call_operand.vmem [shape: f32[1,128], index: 2, kind: input, shape index: {}]   ;;  %s5232_s3 = inlined_call_operand.vmem [shape: f32[1,128], index: 3, kind: input, shape index: {}]   ;;  %s5233_s4 = inlined_call_operand.vmem [shape: f32[512,128], index: 4, kind: output, shape index: {}]  }
   0x1 LB: > { %s3020_s16 = sadd.s32 4294967295, %s3776_s15   ;;  %p3024_p0 = scmp.ge.s32.totalorder %s3776_s15, 1  ;;  %s3776_s15 = sphi %s3804_s15, %s14_s15  }
   0x2   : > { %p164_p1 = scmp.lt.s32.totalorder %s3776_s15, 3 }
   0x4   : > { %p165_p2 = pnand %p3024_p0, %p164_p1 }
   0x6   : > { %168 = sbr.rel (%p165_p2) target bundleno = 518 (0x206), region = 36 }
   0xb   : > { %v3029_v0 = vld [vmem:[%s5230_s1 + $0x4] sm:$0x3]  ;;  %vm501_vm0 = vcmask 1040384   ;;  %vm502_vm1 = vcmask 1041408   ;;  %s3025_s19 = sshll.u32 %s3020_s16, 2  ;;  %v3778_v1 = vmov 65535  }
   0xc   : > { %v503_v2 = vsel %vm501_vm0, 4294967295, %v3778_v1  ;;  %p192_p3 = scmp.lt.s32.totalorder %s3025_s19, 7  ;;  %v272_v3 = vld [vmem:[%s5230_s1] sm:$0x3]  ;;  %v3062_v5 = vld [vmem:[%s5230_s1 + $0xc] sm:$0x3] }
   0xd   : > { %v3820_v4 = vsel %vm502_vm1, %v503_v2, 0  ;;  %v3079_v9 = vld [vmem:[%s5230_s1 + $0x10] sm:$0x3]  ;;  %vm321_vm2 = vcmask 1046528   ;;  %vm452_vm3 = vcmask 23552   ;;  %s3027_s14 = sshll.u32 %s3020_s16, 5 }
   0xe   : > { %v506_v6 = vand.u32 %v3029_v0, %v3820_v4  ;;  %s5361_s19 = smov (!%p192_p3, %s3025_s19), 7  ;;  %v3827_v7 = vand.u32 %v3820_v4, %v272_v3  ;;  %v3830_v8 = vand.u32 %v3062_v5, %v3820_v4  ;;  %v3130_v19 = vld [vmem:[%s5230_s1 + $0x2] sm:$0x3]  ;;  %v3871_v25 = vand.u32 %v3079_v9, %v3820_v4  ;;  %p199_p4 = scmp.lt.s32.totalorder %s3027_s14, 63 }
   0xf   : > { %s3760_s24 = smul.u32 408, %s5361_s19  ;;  %v3915_v53 = vand.u32 %v3130_v19, %v3820_v4 }
  0x10   : > { %3758 = vmatprep.subr.bf16.mxu1 %v506_v6  ;;  %3452 = vmatprep.subr.bf16.mxu0 %v506_v6  ;;  %s5363_s14 = smov (!%p199_p4, %s3027_s14), 63 }
  0x11   : > { %3759 = vmatpush3.bf16.msra.mxu1 %v506_v6  ;;  %3453 = vmatpush3.bf16.msra.mxu0 %v506_v6  ;;  %s3835_s27 = scalar_lea.vmem %s5229_s0, %s3760_s24  ;;  %s3028_s20 = sshll.u32 %s5363_s14, 3 }
  0x12   : > { %3486 = vmatprep.subr.bf16.mxu1 %v3827_v7  ;;  %3520 = vmatprep.subr.bf16.mxu0 %v3830_v8  ;;  %v3843_v10 = vld [vmem:[%s3835_s27] sm:$0xff]  ;;  %v3846_v11 = vld [vmem:[%s3835_s27 + $0x8] sm:$0xff]  ;;  %v207_v12 = vld [vmem:[%s3835_s27 + $0x10] sm:$0x1]  ;;  %s5057_s23 = scalar_lea.vmem %s5233_s4, %s3028_s20 }
  0x13   : > { %v322_v13 = vrot.slane %v3843_v10, 1  ;;  %v323_v14 = vrot.slane %v3846_v11, 1  ;;  %v325_v15 = vrot.slane %v207_v12, 1  ;;  %v3852_v16 = vld [vmem:[%s3835_s27 + $0xc0] sm:$0xff]  ;;  %v3855_v17 = vld [vmem:[%s3835_s27 + $0xc8] sm:$0xff]  ;;  %v3858_v18 = vld [vmem:[%s3835_s27 + $0x18] sm:$0xff] }
  0x14   : > { %v231_v20 = vld [vmem:[%s3835_s27 + $0xd0] sm:$0x1]  ;;  %v362_v21 = vrot.slane %v3852_v16, 1  ;;  %v363_v22 = vrot.slane %v3855_v17, 1  ;;  %v3867_v23 = vld [vmem:[%s3835_s27 + $0x20] sm:$0xff]  ;;  %v327_v24 = vrot.slane %v3858_v18, 1 }
  0x15   : > { %v324_v26 = vsel %vm321_vm2, %v322_v13, %v323_v14  ;;  %v326_v27 = vsel %vm321_vm2, %v323_v14, %v325_v15  ;;  %v365_v28 = vrot.slane %v231_v20, 1  ;;  %v210_v29 = vld [vmem:[%s3835_s27 + $0x28] sm:$0x1]  ;;  %v328_v30 = vrot.slane %v3867_v23, 1  ;;  %v3878_v31 = vld [vmem:[%s3835_s27 + $0xd8] sm:$0xff]  ;;  %v3881_v32 = vld [vmem:[%s3835_s27 + $0xe0] sm:$0xff] }
  0x16   : > { %v434_v33 = vpack.c.bf16 %v326_v27, %v324_v26  ;;  %v364_v34 = vsel %vm321_vm2, %v362_v21, %v363_v22  ;;  %v330_v35 = vrot.slane %v210_v29, 1  ;;  %v234_v36 = vld [vmem:[%s3835_s27 + $0xe8] sm:$0x1]  ;;  %v367_v37 = vrot.slane %v3878_v31, 1  ;;  %v3887_v38 = vld [vmem:[%s3835_s27 + $0x30] sm:$0xff]  ;;  %v3890_v39 = vld [vmem:[%s3835_s27 + $0x38] sm:$0xff] }
  0x17   : > { %v366_v40 = vsel %vm321_vm2, %v363_v22, %v365_v28  ;;  %v329_v41 = vsel %vm321_vm2, %v327_v24, %v328_v30  ;;  %v368_v42 = vrot.slane %v3881_v32, 1  ;;  %v370_v43 = vrot.slane %v234_v36, 1  ;;  %v213_v44 = vld [vmem:[%s3835_s27 + $0x40] sm:$0x1]  ;;  %v3897_v45 = vld [vmem:[%s3835_s27 + $0xf0] sm:$0xff]  ;;  %v3900_v46 = vld [vmem:[%s3835_s27 + $0xf8] sm:$0xff] }
  0x18   : > { %3454 = vmatprep.mubr.msk.bf16.mxu0 %vm452_vm3, %v434_v33  ;;  %v3903_v47 = vpack.c.bf16 %v366_v40, %v364_v34  ;;  %v331_v48 = vsel %vm321_vm2, %v328_v30, %v330_v35  ;;  %v332_v49 = vrot.slane %v3887_v38, 1  ;;  %v237_v50 = vld [vmem:[%s3835_s27 + $0x100] sm:$0x1]  ;;  %v3909_v51 = vld [vmem:[%s3835_s27 + $0x48] sm:$0xff]  ;;  %v3912_v52 = vld [vmem:[%s3835_s27 + $0x50] sm:$0xff]  ;;  %v333_v57 = vrot.slane %v3890_v39, 1 }
  0x19   : > { %v3917_v54 = vpack.c.bf16 %v331_v48, %v329_v41  ;;  %v369_v55 = vsel %vm321_vm2, %v367_v37, %v368_v42  ;;  %v371_v56 = vsel %vm321_vm2, %v368_v42, %v370_v43  ;;  %v216_v58 = vld [vmem:[%s3835_s27 + $0x58] sm:$0x1]  ;;  %v3924_v59 = vld [vmem:[%s3835_s27 + $0x108] sm:$0xff]  ;;  %v335_v61 = vrot.slane %v213_v44, 1  ;;  %v3933_v0 = vld [vmem:[%s3835_s27 + $0x110] sm:$0xff] }
  0x1a   : > { %3470 = vmatprep.mubr.msk.bf16.mxu1 %vm452_vm3, %v3903_v47  ;;  %v3928_v60 = vpack.c.bf16 %v371_v56, %v369_v55  ;;  %v372_v62 = vrot.slane %v3897_v45, 1  ;;  %v373_v63 = vrot.slane %v3900_v46, 1  ;;  %v334_v1 = vsel %vm321_vm2, %v332_v49, %v333_v57  ;;  %v240_v6 = vld [vmem:[%s3835_s27 + $0x118] sm:$0x1]  ;;  %v3942_v9 = vld [vmem:[%s3835_s27 + $0x60] sm:$0xff]  ;;  %v3951_v19 = vld [vmem:[%s3835_s27 + $0x68] sm:$0xff] }
  0x1b   : > { %3455 = vmatmul.mubr.msk.bf16.vlgmr.msra.gmra.mxu0 %vm452_vm3, %v3917_v54  ;;  %v375_v2 = vrot.slane %v237_v50, 1  ;;  %v337_v3 = vrot.slane %v3909_v51, 1  ;;  %v338_v5 = vrot.slane %v3912_v52, 1  ;;  %v336_v12 = vsel %vm321_vm2, %v333_v57, %v335_v61  ;;  %v219_v20 = vld [vmem:[%s3835_s27 + $0x70] sm:$0x1]  ;;  %v3961_v26 = vld [vmem:[%s3835_s27 + $0x120] sm:$0xff] }
  0x1c   : > { %3471 = vmatmul.mubr.msk.bf16.vlgmr.msra.gmra.mxu1 %vm452_vm3, %v3928_v60  ;;  %3521 = vmatpush3.bf16.msra.mxu0 %v3830_v8  ;;  %v374_v13 = vsel %vm321_vm2, %v372_v62, %v373_v63  ;;  %v340_v14 = vrot.slane %v216_v58, 1  ;;  %v377_v15 = vrot.slane %v3924_v59, 1  ;;  %v3955_v21 = vpack.c.bf16 %v336_v12, %v334_v1  ;;  %v3964_v27 = vld [vmem:[%s3835_s27 + $0x128] sm:$0xff]  ;;  %v243_v28 = vld [vmem:[%s3835_s27 + $0x130] sm:$0x1]  ;;  %v3973_v34 = vld [vmem:[%s3835_s27 + $0x78] sm:$0xff] }
  0x1d   : > { %3487 = vmatpush3.bf16.msra.mxu1 %v3827_v7  ;;  %v376_v22 = vsel %vm321_vm2, %v373_v63, %v375_v2  ;;  %v339_v24 = vsel %vm321_vm2, %v337_v3, %v338_v5  ;;  %v378_v8 = vrot.slane %v3933_v0, 1  ;;  %3588 = vmatprep.subr.bf16.mxu0 %v3915_v53  ;;  %v380_v30 = vrot.slane %v240_v6, 1  ;;  %v3983_v41 = vld [vmem:[%s3835_s27 + $0x80] sm:$0xff]  ;;  %v222_v42 = vld [vmem:[%s3835_s27 + $0x88] sm:$0x1]  ;;  %v3992_v50 = vld [vmem:[%s3835_s27 + $0x138] sm:$0xff] }
  0x1e   : > { %v3968_v29 = vpack.c.bf16 %v376_v22, %v374_v13  ;;  %v341_v7 = vsel %vm321_vm2, %v338_v5, %v340_v14  ;;  %v342_v33 = vrot.slane %v3942_v9, 1  ;;  %3554 = vmatprep.subr.bf16.mxu1 %v3871_v25  ;;  %3458 = vmatprep.mubr.msk.bf16.mxu0 %vm452_vm3, %v3955_v21  ;;  %v343_v37 = vrot.slane %v3951_v19, 1  ;;  %v3995_v55 = vld [vmem:[%s3835_s27 + $0x140] sm:$0xff]  ;;  %v246_v62 = vld [vmem:[%s3835_s27 + $0x148] sm:$0x1]  ;;  %v4004_v63 = vld [vmem:[%s3835_s27 + $0x90] sm:$0xff] }
  0x1f   : > { %v3978_v35 = vpack.c.bf16 %v341_v7, %v339_v24  ;;  %v379_v36 = vsel %vm321_vm2, %v377_v15, %v378_v8  ;;  %v345_v40 = vrot.slane %v219_v20, 1  ;;  %v381_v43 = vsel %vm321_vm2, %v378_v8, %v380_v30  ;;  %v4007_v1 = vld [vmem:[%s3835_s27 + $0x98] sm:$0xff]  ;;  %v225_v12 = vld [vmem:[%s3835_s27 + $0xa0] sm:$0x1]  ;;  %v247_v13 = vld [vmem:[%s3835_s27 + $0x150] sm:$0xff] }
  0x20   : > { %5240 = vst [vmem:[#allocation2_spill] sm:$0xff] %v3968_v29  ;;  %3474 = vmatprep.mubr.msk.bf16.mxu1 %vm452_vm3, %v3968_v29  ;;  %v382_v44 = vrot.slane %v3961_v26, 1  ;;  %v383_v48 = vrot.slane %v3964_v27, 1  ;;  %v385_v49 = vrot.slane %v243_v28, 1  ;;  %v3997_v56 = vpack.c.bf16 %v381_v43, %v379_v36  ;;  %v248_v24 = vld [vmem:[%s3835_s27 + $0x158] sm:$0xff]  ;;  %v4032_v36 = vld [vmem:[%s3835_s27 + $0xa8] sm:$0xff] }
  0x21   : > { %v344_v57 = vsel %vm321_vm2, %v342_v33, %v343_v37  ;;  %v346_v58 = vsel %vm321_vm2, %v343_v37, %v345_v40  ;;  %v347_v61 = vrot.slane %v3973_v34, 1  ;;  %v348_v6 = vrot.slane %v3983_v41, 1  ;;  %v249_v33 = vld [vmem:[%s3835_s27 + $0x160] sm:$0x1] }
  0x22   : > { %5241 = vst [vmem:[#allocation3_spill] sm:$0xff] %v3997_v56  ;;  %v4009_v2 = vpack.c.bf16 %v346_v58, %v344_v57  ;;  %v384_v3 = vsel %vm321_vm2, %v382_v44, %v383_v48  ;;  %v386_v5 = vsel %vm321_vm2, %v383_v48, %v385_v49  ;;  %v350_v15 = vrot.slane %v222_v42, 1  ;;  %v227_v44 = vld [vmem:[%s3835_s27 + $0xb0] sm:$0xff]  ;;  %v228_v48 = vld [vmem:[%s3835_s27 + $0xb8] sm:$0x1] }
  0x23   : > { %3459 = vmatmul.mubr.msk.bf16.gmra.mxu0 %vm452_vm3, %v3978_v35  ;;  %v4018_v14 = vpack.c.bf16 %v386_v5, %v384_v3  ;;  %v387_v20 = vrot.slane %v3992_v50, 1  ;;  %v388_v22 = vrot.slane %v3995_v55, 1  ;;  %v349_v8 = vsel %vm321_vm2, %v347_v61, %v348_v6  ;;  %v4048_v3 = vld [vmem:[%s3835_s27 + $0x170] sm:$0xff]  ;;  %v252_v5 = vld [vmem:[%s3835_s27 + $0x178] sm:$0x1] }
  0x24   : > { %3475 = vmatmul.mubr.msk.bf16.gmra.mxu1 %vm452_vm3, %v3997_v56  ;;  %3462 = vmatprep.mubr.msk.bf16.mxu0 %vm452_vm3, %v4009_v2  ;;  %v390_v28 = vrot.slane %v246_v62, 1  ;;  %v352_v7 = vrot.slane %v4004_v63, 1  ;;  %v353_v30 = vrot.slane %v4007_v1, 1  ;;  %v351_v37 = vsel %vm321_vm2, %v348_v6, %v350_v15  ;;  %v4045_v62 = vld [vmem:[%s3835_s27 + $0x168] sm:$0xff] }
  0x25   : > { %5242 = vst [vmem:[#allocation4_spill] sm:$0xff] %v4018_v14  ;;  %3478 = vmatprep.mubr.msk.bf16.mxu1 %vm452_vm3, %v4018_v14  ;;  %v389_v40 = vsel %vm321_vm2, %v387_v20, %v388_v22  ;;  %v355_v42 = vrot.slane %v225_v12, 1  ;;  %v392_v43 = vrot.slane %v247_v13, 1  ;;  %v4040_v49 = vpack.c.bf16 %v351_v37, %v349_v8 }
  0x26   : > { %v391_v57 = vsel %vm321_vm2, %v388_v22, %v390_v28  ;;  %v354_v58 = vsel %vm321_vm2, %v352_v7, %v353_v30  ;;  %v393_v61 = vrot.slane %v248_v24, 1  ;;  %v395_v12 = vrot.slane %v249_v33, 1 }
  0x27   : > { %v4051_v14 = vpack.c.bf16 %v391_v57, %v389_v40  ;;  %v356_v6 = vsel %vm321_vm2, %v353_v30, %v355_v42  ;;  %v357_v15 = vrot.slane %v4032_v36, 1  ;;  %v358_v22 = vrot.slane %v227_v44, 1 }
  0x28   : > { %v4055_v20 = vpack.c.bf16 %v356_v6, %v354_v58  ;;  %v394_v8 = vsel %vm321_vm2, %v392_v43, %v393_v61  ;;  %v360_v28 = vrot.slane %v228_v48, 1  ;;  %v396_v7 = vsel %vm321_vm2, %v393_v61, %v395_v12  ;;  %v3108_v12 = vld [vmem:[%s3835_s27 + $0x228] sm:$0xff] }
  0x29   : > { %v397_v37 = vrot.slane %v4045_v62, 1  ;;  %v398_v56 = vrot.slane %v4048_v3, 1  ;;  %v400_v29 = vrot.slane %v252_v5, 1  ;;  %v4061_v40 = vpack.c.bf16 %v396_v7, %v394_v8  ;;  %v3113_v7 = vld [vmem:[%s3835_s27 + $0x260] sm:$0xff] }
  0x2a   : > { %v359_v30 = vsel %vm321_vm2, %v357_v15, %v358_v22  ;;  %v361_v33 = vsel %vm321_vm2, %v358_v22, %v360_v28  ;;  %v268_v48 = vpack.c.bf16 %v3964_v27, %v3961_v26  ;;  %v270_v57 = vpack.c.bf16 %v248_v24, %v247_v13  ;;  %v3102_v24 = vld [vmem:[%s3835_s27 + $0x1e0] sm:$0xff]  ;;  %v3109_v15 = vld [vmem:[%s3835_s27 + $0x230] sm:$0xff]  ;;  %v3112_v28 = vld [vmem:[%s3835_s27 + $0x258] sm:$0xff] }
  0x2b   : > { %3463 = vmatmul.mubr.msk.bf16.gmra.mxu0 %vm452_vm3, %v4040_v49  ;;  %v399_v42 = vsel %vm321_vm2, %v397_v37, %v398_v56  ;;  %v401_v43 = vsel %vm321_vm2, %v398_v56, %v400_v29  ;;  %v4077_v58 = vpack.c.bf16 %v361_v33, %v359_v30  ;;  %v257_v5 = vpack.c.bf16 %v3867_v23, %v3858_v18  ;;  %v3147_v18 = vld [vmem:[%s5230_s1 + $0xe] sm:$0x3]  ;;  %v3098_v29 = vld [vmem:[%s3835_s27 + $0x1b0] sm:$0xff]  ;;  %v3229_v56 = vld [vmem:[%s5230_s1 + $0xa] sm:$0x3] }
  0x2c   : > { %3479 = vmatmul.mubr.msk.bf16.gmra.mxu1 %vm452_vm3, %v4051_v14  ;;  %3466 = vmatprep.mubr.msk.bf16.mxu0 %vm452_vm3, %v4055_v20  ;;  %v4079_v61 = vpack.c.bf16 %v401_v43, %v399_v42  ;;  %v256_v6 = vpack.c.bf16 %v3846_v11, %v3843_v10  ;;  %v258_v26 = vpack.c.bf16 %v3890_v39, %v3887_v38  ;;  %v3212_v10 = vld [vmem:[%s5230_s1 + $0x6] sm:$0x3]  ;;  %v3115_v33 = vld [vmem:[%s3835_s27 + $0x278] sm:$0xff]  ;;  %v3116_v42 = vld [vmem:[%s3835_s27 + $0x288] sm:$0xff] }
  0x2d   : > { %3482 = vmatprep.mubr.msk.bf16.mxu1 %vm452_vm3, %v4061_v40  ;;  %v259_v11 = vpack.c.bf16 %v3912_v52, %v3909_v51  ;;  %v4102_v23 = vand.u32 %v3147_v18, %v3820_v4  ;;  %v4106_v27 = vand.u32 %v3212_v10, %v3820_v4  ;;  %v260_v38 = vpack.c.bf16 %v3951_v19, %v3942_v9  ;;  %v3117_v43 = vld [vmem:[%s3835_s27 + $0x290] sm:$0xff] }
  0x2e   : > { %v261_v39 = vpack.c.bf16 %v3983_v41, %v3973_v34  ;;  %v263_v51 = vpack.c.bf16 %v227_v44, %v4032_v36  ;;  %v264_v52 = vpack.c.bf16 %v3855_v17, %v3852_v16  ;;  %v266_v9 = vpack.c.bf16 %v3900_v46, %v3897_v45  ;;  %v3096_v45 = vld [vmem:[%s3835_s27 + $0x198] sm:$0xff]  ;;  %v3097_v46 = vld [vmem:[%s3835_s27 + $0x1a0] sm:$0xff]  ;;  %v3103_v36 = vld [vmem:[%s3835_s27 + $0x1e8] sm:$0xff] }
  0x2f   : > { %v267_v19 = vpack.c.bf16 %v3933_v0, %v3924_v59  ;;  %v269_v16 = vpack.c.bf16 %v3995_v55, %v3992_v50  ;;  %v271_v17 = vpack.c.bf16 %v4048_v3, %v4045_v62  ;;  %v1330_v0 = vpack.c.bf16 %v3097_v46, %v3096_v45  ;;  %v3099_v34 = vld [vmem:[%s3835_s27 + $0x1b8] sm:$0xff]  ;;  %v3100_v50 = vld [vmem:[%s3835_s27 + $0x1c8] sm:$0xff]  ;;  %v3101_v55 = vld [vmem:[%s3835_s27 + $0x1d0] sm:$0xff] }
  0x30   : > { %v4175_v41 = vpack.c.bf16 %v3099_v34, %v3098_v29  ;;  %v4188_v13 = vand.u32 %v3229_v56, %v3820_v4  ;;  %v3104_v44 = vld [vmem:[%s3835_s27 + $0x1f8] sm:$0xff]  ;;  %v3105_v62 = vld [vmem:[%s3835_s27 + $0x200] sm:$0xff]  ;;  %v4227_v22 = vpack.c.bf16 %v3109_v15, %v3108_v12  ;;  %v4243_v30 = vpack.c.bf16 %v3113_v7, %v3112_v28  ;;  %v4399_v12 = vld [vmem:[%s3835_s27 + $0x3f0] sm:$0xff] }
  0x31   : > { %v3107_v3 = vld [vmem:[%s3835_s27 + $0x218] sm:$0xff]  ;;  %v4333_v34 = vld [vmem:[%s3835_s27 + $0x360] sm:$0xff]  ;;  %v4424_v7 = vld [vmem:[%s3835_s27 + $0x428] sm:$0xff] }
  0x32   : > { %v4312_v45 = vld [vmem:[%s3835_s27 + $0x338] sm:$0xff]  ;;  %v4348_v56 = vld [vmem:[%s3835_s27 + $0x380] sm:$0xff] }
  0x33   : > { %3467 = vmatmul.mubr.msk.bf16.gmra.mxu0 %vm452_vm3, %v4077_v58  ;;  %v4402_v15 = vld [vmem:[%s3835_s27 + $0x3f8] sm:$0xff]  ;;  %v4421_v28 = vld [vmem:[%s3835_s27 + $0x420] sm:$0xff] }
  0x34   : > { %3483 = vmatmul.mubr.msk.bf16.gmra.mxu1 %vm452_vm3, %v4079_v61  ;;  %3522 = vmatprep.mubr.msk.bf16.mxu0 %vm452_vm3, %v257_v5 }
  0x35   : > { %3488 = vmatprep.mubr.msk.bf16.mxu1 %vm452_vm3, %v256_v6  ;;  %v3120_v6 = vld [vmem:[%s3835_s27 + $0x2b8] sm:$0xff] }
  0x3b   : > { %3523 = vmatmul.mubr.msk.bf16.vlgmr.msra.gmra.mxu0 %vm452_vm3, %v258_v26 }
  0x3c   : > { %3489 = vmatmul.mubr.msk.bf16.vlgmr.msra.gmra.mxu1 %vm452_vm3, %v257_v5  ;;  %3589 = vmatpush3.bf16.msra.mxu0 %v3915_v53  ;;  %v265_v53 = vpack.c.bf16 %v3881_v32, %v3878_v31  ;;  %v4158_v31 = vld [vmem:[%s3835_s27 + $0x180] sm:$0xff]  ;;  %v4161_v32 = vld [vmem:[%s3835_s27 + $0x188] sm:$0xff] }
  0x3d   : > { %3555 = vmatpush3.bf16.msra.mxu1 %v3871_v25  ;;  %3492 = vmatprep.mubr.msk.bf16.mxu1 %vm452_vm3, %v258_v26  ;;  %v262_v25 = vpack.c.bf16 %v4007_v1, %v4004_v63  ;;  %v881_v59 = vpack.c.bf16 %v4161_v32, %v4158_v31  ;;  %v3278_v63 = vld [vmem:[%s5230_s1 + $0x8] sm:$0x3]  ;;  %v4185_v1 = vpack.c.bf16 %v3101_v55, %v3100_v50  ;;  %v3121_v26 = vld [vmem:[%s3835_s27 + $0x2c0] sm:$0xff] }
  0x3e   : > { %3526 = vmatprep.mubr.msk.bf16.mxu0 %vm452_vm3, %v259_v11  ;;  %3622 = vmatprep.subr.bf16.mxu1 %v4102_v23  ;;  %v5244_v5 = vld [vmem:[#allocation3_spill] sm:$0xff]  ;;  %v4275_v10 = vpack.c.bf16 %v3121_v26, %v3120_v6 }
  0x3f   : > { %3656 = vmatprep.subr.bf16.mxu0 %v4106_v27  ;;  %v4336_v50 = vld [vmem:[%s3835_s27 + $0x368] sm:$0xff] }
  0x40   : > { %v1845_v55 = vpack.c.bf16 %v4336_v50, %v4333_v34 }
  0x43   : > { %3527 = vmatmul.mubr.msk.bf16.gmra.mxu0 %vm452_vm3, %v260_v38 }
  0x44   : > { %3493 = vmatmul.mubr.msk.bf16.gmra.mxu1 %vm452_vm3, %v259_v11  ;;  %3530 = vmatprep.mubr.msk.bf16.mxu0 %vm452_vm3, %v261_v39  ;;  %v5245_v11 = vld [vmem:[#allocation4_spill] sm:$0xff] }
  0x45   : > { %3496 = vmatprep.mubr.msk.bf16.mxu1 %vm452_vm3, %v260_v38  ;;  %v3124_v38 = vld [vmem:[%s3835_s27 + $0x2e8] sm:$0xff] }
  0x4b   : > { %3531 = vmatmul.mubr.msk.bf16.gmra.mxu0 %vm452_vm3, %v262_v25 }
  0x4c   : > { %3497 = vmatmul.mubr.msk.bf16.gmra.mxu1 %vm452_vm3, %v261_v39  ;;  %3534 = vmatprep.mubr.msk.bf16.mxu0 %vm452_vm3, %v263_v51  ;;  %v3125_v39 = vld [vmem:[%s3835_s27 + $0x2f0] sm:$0xff] }
  0x4d   : > { %3500 = vmatprep.mubr.msk.bf16.mxu1 %vm452_vm3, %v262_v25  ;;  %v255_v25 = vld [vmem:[%s3835_s27 + $0x190] sm:$0x1] }
  0x53   : > { %3535 = vmatmul.mubr.msk.bf16.gmra.mxu0 %vm452_vm3, %v264_v52 }
  0x54   : > { %3501 = vmatmul.mubr.msk.bf16.gmra.mxu1 %vm452_vm3, %v263_v51  ;;  %3538 = vmatprep.mubr.msk.bf16.mxu0 %vm452_vm3, %v265_v53 }
  0x55   : > { %3504 = vmatprep.mubr.msk.bf16.mxu1 %vm452_vm3, %v264_v52  ;;  %v4292_v52 = vpack.c.bf16 %v3125_v39, %v3124_v38  ;;  %v4477_v38 = vld [vmem:[%s3835_s27 + $0x468] sm:$0xff]  ;;  %v4480_v39 = vld [vmem:[%s3835_s27 + $0x470] sm:$0xff] }
  0x5b   : > { %3539 = vmatmul.mubr.msk.bf16.gmra.mxu0 %vm452_vm3, %v266_v9 }
  0x5c   : > { %3505 = vmatmul.mubr.msk.bf16.gmra.mxu1 %vm452_vm3, %v265_v53  ;;  %3542 = vmatprep.mubr.msk.bf16.mxu0 %vm452_vm3, %v267_v19  ;;  %v1086_v53 = vrot.slane %v4158_v31, 1 }
  0x5d   : > { %3508 = vmatprep.mubr.msk.bf16.mxu1 %vm452_vm3, %v266_v9  ;;  %v1087_v9 = vrot.slane %v4161_v32, 1  ;;  %v4309_v32 = vld [vmem:[%s3835_s27 + $0x330] sm:$0xff] }
  0x63   : > { %3543 = vmatmul.mubr.msk.bf16.gmra.mxu0 %vm452_vm3, %v268_v48 }
  0x64   : > { %3509 = vmatmul.mubr.msk.bf16.gmra.mxu1 %vm452_vm3, %v267_v19  ;;  %3546 = vmatprep.mubr.msk.bf16.mxu0 %vm452_vm3, %v269_v16  ;;  %v1089_v19 = vrot.slane %v255_v25, 1 }
  0x65   : > { %3512 = vmatprep.mubr.msk.bf16.mxu1 %vm452_vm3, %v268_v48 }
  0x66   : > { %v1090_v31 = vsel %vm321_vm2, %v1087_v9, %v1089_v19 }
  0x6b   : > { %3547 = vmatmul.mubr.msk.bf16.gmra.mxu0 %vm452_vm3, %v270_v57 }
  0x6c   : > { %3513 = vmatmul.mubr.msk.bf16.gmra.mxu1 %vm452_vm3, %v269_v16  ;;  %3550 = vmatprep.mubr.msk.bf16.mxu0 %vm452_vm3, %v271_v17  ;;  %v3127_v16 = vld [vmem:[%s3835_s27 + $0x308] sm:$0xff] }
  0x6d   : > { %3516 = vmatprep.mubr.msk.bf16.mxu1 %vm452_vm3, %v270_v57  ;;  %v4259_v57 = vpack.c.bf16 %v3117_v43, %v3116_v42  ;;  %v4439_v42 = vld [vmem:[%s3835_s27 + $0x438] sm:$0xff]  ;;  %v4442_v43 = vld [vmem:[%s3835_s27 + $0x440] sm:$0xff] }
  0x73   : > { %3551 = vmatmul.mubr.msk.bf16.gmra.mxu0 %vm452_vm3, %v881_v59  ;;  %v1843_v59 = vpack.c.bf16 %v4312_v45, %v4309_v32 }
  0x74   : > { %3517 = vmatmul.mubr.msk.bf16.gmra.mxu1 %vm452_vm3, %v271_v17  ;;  %3590 = vmatprep.mubr.msk.bf16.mxu0 %vm452_vm3, %v1330_v0  ;;  %v1088_v17 = vsel %vm321_vm2, %v1086_v53, %v1087_v9  ;;  %v4326_v0 = vld [vmem:[%s3835_s27 + $0x350] sm:$0xff]  ;;  %v4487_v53 = vld [vmem:[%s3835_s27 + $0x480] sm:$0xff]  ;;  %v4490_v9 = vld [vmem:[%s3835_s27 + $0x488] sm:$0xff] }
  0x75   : > { %3556 = vmatprep.mubr.msk.bf16.mxu1 %vm452_vm3, %v3917_v54  ;;  %v4193_v54 = vand.u32 %v3278_v63, %v3820_v4  ;;  %v4208_v4 = vpack.c.bf16 %v3103_v36, %v3102_v24  ;;  %v1093_v46 = vpack.c.bf16 %v1090_v31, %v1088_v17  ;;  %v4354_v63 = vld [vmem:[%s3835_s27 + $0x390] sm:$0xff]  ;;  %v4357_v24 = vld [vmem:[%s3835_s27 + $0x398] sm:$0xff]  ;;  %5248 = vst [vmem:[#allocation4_spill] sm:$0xff] %v4490_v9 }
  0x76   : > { %v4372_v36 = vld [vmem:[%s3835_s27 + $0x3b0] sm:$0xff] }
  0x7b   : > { %3591 = vmatmul.mubr.msk.bf16.vlgmr.msra.gmra.mxu0 %vm452_vm3, %v4175_v41 }
  0x7c   : > { %3557 = vmatmul.mubr.msk.bf16.vlgmr.msra.gmra.mxu1 %vm452_vm3, %v3955_v21  ;;  %3657 = vmatpush3.bf16.msra.mxu0 %v4106_v27  ;;  %v4211_v21 = vpack.c.bf16 %v3105_v62, %v3104_v44  ;;  %v3123_v27 = vld [vmem:[%s3835_s27 + $0x2d8] sm:$0xff]  ;;  %v4377_v44 = vld [vmem:[%s3835_s27 + $0x3c0] sm:$0xff]  ;;  %v4380_v62 = vld [vmem:[%s3835_s27 + $0x3c8] sm:$0xff] }
  0x7d   : > { %3623 = vmatpush3.bf16.msra.mxu1 %v4102_v23  ;;  %3560 = vmatprep.mubr.msk.bf16.mxu1 %vm452_vm3, %v3978_v35  ;;  %v3106_v35 = vld [vmem:[%s3835_s27 + $0x210] sm:$0xff] }
  0x7e   : > { %3594 = vmatprep.mubr.msk.bf16.mxu0 %vm452_vm3, %v4185_v1  ;;  %3690 = vmatprep.subr.bf16.mxu1 %v4188_v13  ;;  %v4225_v8 = vpack.c.bf16 %v3107_v3, %v3106_v35  ;;  %v3122_v23 = vld [vmem:[%s3835_s27 + $0x2d0] sm:$0xff]  ;;  %v4391_v35 = vld [vmem:[%s3835_s27 + $0x3d8] sm:$0xff]  ;;  %v4394_v3 = vld [vmem:[%s3835_s27 + $0x3e0] sm:$0xff] }
  0x7f   : > { %3724 = vmatprep.subr.bf16.mxu0 %v4193_v54  ;;  %v4290_v51 = vpack.c.bf16 %v3123_v27, %v3122_v23 }
  0x83   : > { %3595 = vmatmul.mubr.msk.bf16.gmra.mxu0 %vm452_vm3, %v4208_v4 }
  0x84   : > { %3561 = vmatmul.mubr.msk.bf16.gmra.mxu1 %vm452_vm3, %v4009_v2  ;;  %3598 = vmatprep.mubr.msk.bf16.mxu0 %vm452_vm3, %v4211_v21  ;;  %v3110_v2 = vld [vmem:[%s3835_s27 + $0x240] sm:$0xff] }
  0x85   : > { %3564 = vmatprep.mubr.msk.bf16.mxu1 %vm452_vm3, %v4040_v49  ;;  %v3111_v49 = vld [vmem:[%s3835_s27 + $0x248] sm:$0xff] }
  0x86   : > { %v4241_v37 = vpack.c.bf16 %v3111_v49, %v3110_v2  ;;  %v4413_v2 = vld [vmem:[%s3835_s27 + $0x408] sm:$0xff]  ;;  %v4416_v49 = vld [vmem:[%s3835_s27 + $0x410] sm:$0xff] }
  0x8b   : > { %3599 = vmatmul.mubr.msk.bf16.gmra.mxu0 %vm452_vm3, %v4225_v8 }
  0x8c   : > { %3565 = vmatmul.mubr.msk.bf16.gmra.mxu1 %vm452_vm3, %v4055_v20  ;;  %3602 = vmatprep.mubr.msk.bf16.mxu0 %vm452_vm3, %v4227_v22  ;;  %v3114_v20 = vld [vmem:[%s3835_s27 + $0x270] sm:$0xff] }
  0x8d   : > { %3568 = vmatprep.mubr.msk.bf16.mxu1 %vm452_vm3, %v4077_v58  ;;  %v4257_v48 = vpack.c.bf16 %v3115_v33, %v3114_v20  ;;  %v3119_v58 = vld [vmem:[%s3835_s27 + $0x2a8] sm:$0xff] }
  0x93   : > { %3603 = vmatmul.mubr.msk.bf16.gmra.mxu0 %vm452_vm3, %v4241_v37 }
  0x94   : > { %3569 = vmatmul.mubr.msk.bf16.gmra.mxu1 %vm452_vm3, %v3903_v47  ;;  %3606 = vmatprep.mubr.msk.bf16.mxu0 %vm452_vm3, %v4243_v30  ;;  %v5243_v47 = vld [vmem:[#allocation2_spill] sm:$0xff] }
  0x95   : > { %3572 = vmatprep.mubr.msk.bf16.mxu1 %vm452_vm3, %v3928_v60  ;;  %v3118_v60 = vld [vmem:[%s3835_s27 + $0x2a0] sm:$0xff] }
  0x96   : > { %v4273_v18 = vpack.c.bf16 %v3119_v58, %v3118_v60  ;;  %v4452_v60 = vld [vmem:[%s3835_s27 + $0x458] sm:$0xff] }
  0x9b   : > { %3607 = vmatmul.mubr.msk.bf16.gmra.mxu0 %vm452_vm3, %v4257_v48 }
  0x9c   : > { %3573 = vmatmul.mubr.msk.bf16.gmra.mxu1 %vm452_vm3, %v5243_v47  ;;  %3610 = vmatprep.mubr.msk.bf16.mxu0 %vm452_vm3, %v4259_v57  ;;  %v4449_v47 = vld [vmem:[%s3835_s27 + $0x450] sm:$0xff] }
  0x9d   : > { %3576 = vmatprep.mubr.msk.bf16.mxu1 %vm452_vm3, %v5244_v5  ;;  %v1854_v5 = vpack.c.bf16 %v4442_v43, %v4439_v42  ;;  %v1855_v26 = vpack.c.bf16 %v4452_v60, %v4449_v47 }
  0xa3   : > { %3611 = vmatmul.mubr.msk.bf16.gmra.mxu0 %vm452_vm3, %v4273_v18 }
  0xa4   : > { %3577 = vmatmul.mubr.msk.bf16.gmra.mxu1 %vm452_vm3, %v5245_v11  ;;  %3614 = vmatprep.mubr.msk.bf16.mxu0 %vm452_vm3, %v4275_v10 }
  0xa5   : > { %3580 = vmatprep.mubr.msk.bf16.mxu1 %vm452_vm3, %v4051_v14  ;;  %v3126_v14 = vld [vmem:[%s3835_s27 + $0x300] sm:$0xff] }
  0xab   : > { %3615 = vmatmul.mubr.msk.bf16.gmra.mxu0 %vm452_vm3, %v4290_v51 }
  0xac   : > { %3581 = vmatmul.mubr.msk.bf16.gmra.mxu1 %vm452_vm3, %v4061_v40  ;;  %3618 = vmatprep.mubr.msk.bf16.mxu0 %vm452_vm3, %v4292_v52  ;;  %v4314_v40 = vpack.c.bf16 %v3127_v16, %v3126_v14  ;;  %v3166_v16 = vld [vmem:[%s3835_s27 + $0x340] sm:$0x1] }
  0xad   : > { %3584 = vmatprep.mubr.msk.bf16.mxu1 %vm452_vm3, %v4079_v61  ;;  %v4323_v61 = vld [vmem:[%s3835_s27 + $0x348] sm:$0xff] }
  0xae   : > { %v1844_v29 = vpack.c.bf16 %v4326_v0, %v4323_v61 }
  0xb3   : > { %3619 = vmatmul.mubr.msk.bf16.gmra.mxu0 %vm452_vm3, %v4314_v40 }
  0xb4   : > { %3585 = vmatmul.mubr.msk.bf16.gmra.mxu1 %vm452_vm3, %v1093_v46  ;;  %3658 = vmatprep.mubr.msk.bf16.mxu0 %vm452_vm3, %v1843_v59  ;;  %v2153_v46 = vrot.slane %v4309_v32, 1  ;;  %v2154_v59 = vrot.slane %v4312_v45, 1  ;;  %v3128_v32 = vld [vmem:[%s3835_s27 + $0x318] sm:$0xff]  ;;  %v4522_v45 = vld [vmem:[%s3835_s27 + $0x4a0] sm:$0xff] }
  0xb5   : > { %3624 = vmatprep.mubr.msk.bf16.mxu1 %vm452_vm3, %v4175_v41  ;;  %v4345_v41 = vld [vmem:[%s3835_s27 + $0x378] sm:$0xff]  ;;  %5254 = vst [vmem:[#allocation10_spill] sm:$0xff] %v4522_v45 }
  0xbb   : > { %3659 = vmatmul.mubr.msk.bf16.vlgmr.msra.gmra.mxu0 %vm452_vm3, %v1844_v29 }
  0xbc   : > { %3625 = vmatmul.mubr.msk.bf16.vlgmr.msra.gmra.mxu1 %vm452_vm3, %v4185_v1  ;;  %3725 = vmatpush3.bf16.msra.mxu0 %v4193_v54  ;;  %v1846_v1 = vpack.c.bf16 %v4348_v56, %v4345_v41  ;;  %v1847_v54 = vpack.c.bf16 %v4357_v24, %v4354_v63 }
  0xbd   : > { %3691 = vmatpush3.bf16.msra.mxu1 %v4188_v13  ;;  %3628 = vmatprep.mubr.msk.bf16.mxu1 %vm452_vm3, %v4208_v4  ;;  %v4369_v13 = vld [vmem:[%s3835_s27 + $0x3a8] sm:$0xff] }
  0xbe   : > { %3662 = vmatprep.mubr.msk.bf16.mxu0 %vm452_vm3, %v1845_v55  ;;  %v1848_v4 = vpack.c.bf16 %v4372_v36, %v4369_v13  ;;  %v2156_v55 = vrot.slane %v3166_v16, 1 }
  0xc3   : > { %3663 = vmatmul.mubr.msk.bf16.gmra.mxu0 %vm452_vm3, %v1846_v1 }
  0xc4   : > { %3629 = vmatmul.mubr.msk.bf16.gmra.mxu1 %vm452_vm3, %v4211_v21  ;;  %3666 = vmatprep.mubr.msk.bf16.mxu0 %vm452_vm3, %v1847_v54  ;;  %v1849_v21 = vpack.c.bf16 %v4380_v62, %v4377_v44 }
  0xc5   : > { %3632 = vmatprep.mubr.msk.bf16.mxu1 %vm452_vm3, %v4225_v8  ;;  %v1850_v8 = vpack.c.bf16 %v4394_v3, %v4391_v35 }
  0xcb   : > { %3667 = vmatmul.mubr.msk.bf16.gmra.mxu0 %vm452_vm3, %v1848_v4  ;;  %v4519_v4 = vld [vmem:[%s3835_s27 + $0x498] sm:$0xff] }
  0xcc   : > { %3633 = vmatmul.mubr.msk.bf16.gmra.mxu1 %vm452_vm3, %v4227_v22  ;;  %3670 = vmatprep.mubr.msk.bf16.mxu0 %vm452_vm3, %v1849_v21  ;;  %v1851_v22 = vpack.c.bf16 %v4402_v15, %v4399_v12  ;;  %5253 = vst [vmem:[#allocation9_spill] sm:$0xff] %v4519_v4  ;;  %v1858_v16 = vpack.c.bf16 %v4522_v45, %v4519_v4  ;;  %v2164_v45 = vrot.slane %v4336_v50, 1 }
  0xcd   : > { %3636 = vmatprep.mubr.msk.bf16.mxu1 %vm452_vm3, %v4241_v37  ;;  %v1852_v37 = vpack.c.bf16 %v4416_v49, %v4413_v2 }
  0xd3   : > { %3671 = vmatmul.mubr.msk.bf16.gmra.mxu0 %vm452_vm3, %v1850_v8  ;;  %v3129_v8 = vld [vmem:[%s3835_s27 + $0x320] sm:$0xff] }
  0xd4   : > { %3637 = vmatmul.mubr.msk.bf16.gmra.mxu1 %vm452_vm3, %v4243_v30  ;;  %3674 = vmatprep.mubr.msk.bf16.mxu0 %vm452_vm3, %v1851_v22  ;;  %v1853_v30 = vpack.c.bf16 %v4424_v7, %v4421_v28  ;;  %v3246_v22 = vld [vmem:[%s3835_s27 + $0x4c8] sm:$0xff] }
  0xd5   : > { %3640 = vmatprep.mubr.msk.bf16.mxu1 %vm452_vm3, %v4257_v48 }
  0xdb   : > { %v4430_v20 = vpop.f32.mrf.mxu0  ;;  %3675 = vmatmul.mubr.msk.bf16.gmra.mxu0 %vm452_vm3, %v1852_v37  ;;  %v3247_v37 = vld [vmem:[%s3835_s27 + $0x4d0] sm:$0xff] }
  0xdc   : > { %v4433_v33 = vpop.f32.mrf.mxu1  ;;  %3641 = vmatmul.mubr.msk.bf16.gmra.mxu1 %vm452_vm3, %v4259_v57  ;;  %3678 = vmatprep.mubr.msk.bf16.mxu0 %vm452_vm3, %v1853_v30  ;;  %v3169_v30 = vld [vmem:[%s3835_s27 + $0x358] sm:$0x1] }
  0xdd   : > { %v4444_v48 = vpop.f32.mrf.mxu0  ;;  %3644 = vmatprep.mubr.msk.bf16.mxu1 %vm452_vm3, %v4273_v18 }
  0xde   : > { %v4454_v58 = vpop.f32.mrf.mxu1 }
  0xdf   : > { %v4456_v57 = vpop.f32.mrf.mxu0 }
  0xe0   : > { %v4460_v6 = vpop.f32.mrf.mxu1 }
  0xe1   : > { %v4464_v18 = vpop.f32.mrf.mxu0 }
  0xe2   : > { %v4466_v11 = vpop.f32.mrf.mxu1 }
  0xe3   : > { %5246 = vst [vmem:[#allocation2_spill] sm:$0xff] %v4466_v11  ;;  %v4468_v23 = vpop.f32.mrf.mxu0  ;;  %3679 = vmatmul.mubr.msk.bf16.gmra.mxu0 %vm452_vm3, %v1854_v5 }
  0xe4   : > { %v4471_v27 = vpop.f32.mrf.mxu1  ;;  %3645 = vmatmul.mubr.msk.bf16.gmra.mxu1 %vm452_vm3, %v4275_v10  ;;  %3682 = vmatprep.mubr.msk.bf16.mxu0 %vm452_vm3, %v1855_v26  ;;  %v1856_v10 = vpack.c.bf16 %v4480_v39, %v4477_v38  ;;  %v2157_v26 = vsel %vm321_vm2, %v2154_v59, %v2156_v55  ;;  %v2163_v55 = vrot.slane %v4333_v34, 1  ;;  %v3249_v34 = vld [vmem:[%s3835_s27 + $0x4e8] sm:$0xff] }
  0xe5   : > { %5247 = vst [vmem:[#allocation3_spill] sm:$0xff] %v4471_v27  ;;  %v4482_v25 = vpop.f32.mrf.mxu0  ;;  %3648 = vmatprep.mubr.msk.bf16.mxu1 %vm452_vm3, %v4290_v51  ;;  %v1857_v51 = vpack.c.bf16 %v4490_v9, %v4487_v53 }
  0xe6   : > { %v4492_v19 = vpop.f32.mrf.mxu1 }
  0xe7   : > { %5249 = vst [vmem:[#allocation5_spill] sm:$0xff] %v4492_v19  ;;  %v4494_v14 = vpop.f32.mrf.mxu0  ;;  %v2161_v19 = vrot.slane %v3169_v30, 1  ;;  %v3250_v30 = vld [vmem:[%s3835_s27 + $0x4f8] sm:$0xff] }
  0xe8   : > { %v4499_v17 = vpop.f32.mrf.mxu1 }
  0xe9   : > { %5250 = vst [vmem:[#allocation6_spill] sm:$0xff] %v4499_v17  ;;  %v4503_v31 = vpop.f32.mrf.mxu0  ;;  %v2158_v17 = vrot.slane %v4323_v61, 1 }
  0xea   : > { %v4507_v29 = vpop.f32.mrf.mxu1 }
  0xeb   : > { %5251 = vst [vmem:[#allocation7_spill] sm:$0xff] %v4507_v29  ;;  %v4509_v1 = vpop.f32.mrf.mxu0  ;;  %3683 = vmatmul.mubr.msk.bf16.gmra.mxu0 %vm452_vm3, %v1856_v10  ;;  %v1592_v29 = vpack.c.bf16 %v3129_v8, %v3128_v32 }
  0xec   : > { %v4512_v54 = vpop.f32.mrf.mxu1  ;;  %3649 = vmatmul.mubr.msk.bf16.gmra.mxu1 %vm452_vm3, %v4292_v52  ;;  %3686 = vmatprep.mubr.msk.bf16.mxu0 %vm452_vm3, %v1857_v51  ;;  %v2155_v52 = vsel %vm321_vm2, %v2153_v46, %v2154_v59  ;;  %v3172_v51 = vld [vmem:[%s3835_s27 + $0x370] sm:$0x1] }
  0xed   : > { %5252 = vst [vmem:[#allocation8_spill] sm:$0xff] %v4512_v54  ;;  %v4524_v21 = vpop.f32.mrf.mxu0  ;;  %3652 = vmatprep.mubr.msk.bf16.mxu1 %vm452_vm3, %v4314_v40  ;;  %v2560_v40 = vpack.c.bf16 %v3247_v37, %v3246_v22  ;;  %v2265_v59 = vpack.c.bf16 %v2157_v26, %v2155_v52  ;;  %v2166_v32 = vrot.slane %v3172_v51, 1  ;;  %v3251_v52 = vld [vmem:[%s3835_s27 + $0x500] sm:$0xff]  ;;  %v3175_v51 = vld [vmem:[%s3835_s27 + $0x388] sm:$0x1] }
  0xee   : > { %v4532_v5 = vpop.f32.mrf.mxu1  ;;  %v2171_v27 = vrot.slane %v3175_v51, 1 }
  0xef   : > { %5255 = vst [vmem:[#allocation11_spill] sm:$0xff] %v4532_v5  ;;  %v4536_v10 = vpop.f32.mrf.mxu0  ;;  %v2159_v5 = vrot.slane %v4326_v0, 1  ;;  %v3248_v0 = vld [vmem:[%s3835_s27 + $0x4e0] sm:$0xff] }
  0xf0   : > { %v4541_v54 = vpop.f32.mrf.mxu1 }
  0xf1   : > { %5256 = vst [vmem:[#allocation12_spill] sm:$0xff] %v4541_v54  ;;  %v4545_v46 = vpop.f32.mrf.mxu0  ;;  %v2160_v22 = vsel %vm321_vm2, %v2158_v17, %v2159_v5  ;;  %v2162_v50 = vsel %vm321_vm2, %v2159_v5, %v2161_v19  ;;  %v2562_v5 = vpack.c.bf16 %v3251_v52, %v3250_v30  ;;  %v2169_v54 = vrot.slane %v4348_v56, 1  ;;  %v3252_v56 = vld [vmem:[%s3835_s27 + $0x510] sm:$0xff]  ;;  %v3254_v52 = vld [vmem:[%s3835_s27 + $0x528] sm:$0xff] }
  0xf2   : > { %v4549_v4 = vpop.f32.mrf.mxu1  ;;  %v2266_v19 = vpack.c.bf16 %v2162_v50, %v2160_v22  ;;  %v3253_v50 = vld [vmem:[%s3835_s27 + $0x518] sm:$0xff] }
  0xf3   : > { %5257 = vst [vmem:[#allocation13_spill] sm:$0xff] %v4549_v4  ;;  %v4551_v8 = vpop.f32.mrf.mxu0  ;;  %3687 = vmatmul.mubr.msk.bf16.gmra.mxu0 %vm452_vm3, %v1858_v16  ;;  %v2165_v16 = vsel %vm321_vm2, %v2163_v55, %v2164_v45  ;;  %v3178_v4 = vld [vmem:[%s3835_s27 + $0x3a0] sm:$0x1] }
  0xf4   : > { %v4554_v61 = vpop.f32.mrf.mxu1  ;;  %3653 = vmatmul.mubr.msk.bf16.gmra.mxu1 %vm452_vm3, %v1592_v29  ;;  %3726 = vmatprep.mubr.msk.bf16.mxu0 %vm452_vm3, %v2560_v40  ;;  %v2167_v29 = vsel %vm321_vm2, %v2164_v45, %v2166_v32  ;;  %v2173_v45 = vrot.slane %v4354_v63, 1  ;;  %v2174_v32 = vrot.slane %v4357_v24, 1 }
  0xf5   : > { %5258 = vst [vmem:[#allocation14_spill] sm:$0xff] %v4554_v61  ;;  %v4562_v37 = vpop.f32.mrf.mxu0  ;;  %3692 = vmatprep.mubr.msk.bf16.mxu1 %vm452_vm3, %v2265_v59  ;;  %v2561_v61 = vpack.c.bf16 %v3249_v34, %v3248_v0  ;;  %v2168_v59 = vrot.slane %v4345_v41, 1  ;;  %v2267_v55 = vpack.c.bf16 %v2167_v29, %v2165_v16  ;;  %v2176_v34 = vrot.slane %v3178_v4, 1 }
  0xf6   : > { %v4567_v26 = vpop.f32.mrf.mxu1  ;;  %v2172_v4 = vsel %vm321_vm2, %v2169_v54, %v2171_v27  ;;  %v2175_v29 = vsel %vm321_vm2, %v2173_v45, %v2174_v32 }
  0xf7   : > { %5259 = vst [vmem:[#allocation15_spill] sm:$0xff] %v4567_v26  ;;  %v4572_v40 = vpop.f32.mrf.mxu0  ;;  %v2170_v24 = vsel %vm321_vm2, %v2168_v59, %v2169_v54  ;;  %v2177_v51 = vsel %vm321_vm2, %v2174_v32, %v2176_v34  ;;  %v2179_v59 = vrot.slane %v4372_v36, 1 }
  0xf8   : > { %v4575_v17 = vpop.f32.mrf.mxu1  ;;  %v2268_v54 = vpack.c.bf16 %v2172_v4, %v2170_v24  ;;  %v2269_v34 = vpack.c.bf16 %v2177_v51, %v2175_v29  ;;  %v3187_v51 = vld [vmem:[%s3835_s27 + $0x3e8] sm:$0x1] }
  0xf9   : > { %5260 = vst [vmem:[#allocation16_spill] sm:$0xff] %v4575_v17  ;;  %v4579_v26 = vpop.f32.mrf.mxu0  ;;  %v3184_v17 = vld [vmem:[%s3835_s27 + $0x3d0] sm:$0x1] }
  0xfa   : > { %v4583_v0 = vpop.f32.mrf.mxu1 }
  0xfb   : > { %5261 = vst [vmem:[#allocation17_spill] sm:$0xff] %v4583_v0  ;;  %v3524_v22 = vpop.f32.mrf.mxu0  ;;  %3727 = vmatmul.mubr.msk.bf16.vlgmr.msra.gmra.mxu0 %vm452_vm3, %v2561_v61  ;;  %v3255_v61 = vld [vmem:[%s3835_s27 + $0x530] sm:$0xff] }
  0xfc   : > { %v3490_v41 = vpop.f32.mrf.mxu1  ;;  %3693 = vmatmul.mubr.msk.bf16.vlgmr.msra.gmra.mxu1 %vm452_vm3, %v2266_v19  ;;  %3730 = vmatprep.mubr.msk.bf16.mxu0 %vm452_vm3, %v2562_v5  ;;  %v3181_v19 = vld [vmem:[%s3835_s27 + $0x3b8] sm:$0x1]  ;;  %v2564_v11 = vpack.c.bf16 %v3255_v61, %v3254_v52  ;;  %v3259_v61 = vld [vmem:[%s3835_s27 + $0x560] sm:$0xff] }
  0xfd   : > { %v763_v63 = vadd.f32 %v3490_v41, %v4430_v20  ;;  %v924_v30 = vpop.f32.mrf.mxu0  ;;  %3696 = vmatprep.mubr.msk.bf16.mxu1 %vm452_vm3, %v2267_v55  ;;  %v2563_v41 = vpack.c.bf16 %v3253_v50, %v3252_v56  ;;  %v2178_v55 = vrot.slane %v4369_v13, 1  ;;  %v2184_v56 = vrot.slane %v4380_v62, 1  ;;  %v3258_v52 = vld [vmem:[%s3835_s27 + $0x558] sm:$0xff] }
  0xfe   : > { %v754_v16 = vpop.f32.mrf.mxu1  ;;  %v2186_v13 = vrot.slane %v3184_v17, 1 }
  0xff   : > { %v4599_v5 = vadd.f32 %v3524_v22, %v763_v63  ;;  %v755_v0 = vadd.f32 %v754_v16, %v4444_v48  ;;  %v3525_v20 = vpop.f32.mrf.mxu0  ;;  %v2181_v22 = vrot.slane %v3181_v19, 1  ;;  %v2183_v48 = vrot.slane %v4377_v44, 1  ;;  %v3256_v44 = vld [vmem:[%s3835_s27 + $0x540] sm:$0xff] }
 0x100   : > { %v3491_v27 = vpop.f32.mrf.mxu1 }
 0x101   : > { %v4605_v9 = vadd.f32 %v924_v30, %v755_v0  ;;  %v766_v45 = vadd.f32 %v3491_v27, %v4456_v57  ;;  %v927_v32 = vpop.f32.mrf.mxu0  ;;  %v3257_v30 = vld [vmem:[%s3835_s27 + $0x548] sm:$0xff]  ;;  %v2182_v4 = vsel %vm321_vm2, %v2179_v59, %v2181_v22  ;;  %v2185_v29 = vsel %vm321_vm2, %v2183_v48, %v2184_v56  ;;  %v3190_v27 = vld [vmem:[%s3835_s27 + $0x400] sm:$0x1] }
 0x102   : > { %v757_v50 = vpop.f32.mrf.mxu1 }
 0x103   : > { %v4610_v36 = vadd.f32 %v3525_v20, %v766_v45  ;;  %v758_v0 = vadd.f32 %v757_v50, %v4464_v18  ;;  %v3528_v63 = vpop.f32.mrf.mxu0  ;;  %3731 = vmatmul.mubr.msk.bf16.gmra.mxu0 %vm452_vm3, %v2563_v41  ;;  %v2180_v18 = vsel %vm321_vm2, %v2178_v55, %v2179_v59  ;;  %v2565_v41 = vpack.c.bf16 %v3257_v30, %v3256_v44  ;;  %v3261_v44 = vld [vmem:[%s3835_s27 + $0x578] sm:$0xff] }
 0x104   : > { %v3494_v57 = vpop.f32.mrf.mxu1  ;;  %3697 = vmatmul.mubr.msk.bf16.gmra.mxu1 %vm452_vm3, %v2268_v54  ;;  %3734 = vmatprep.mubr.msk.bf16.mxu0 %vm452_vm3, %v2564_v11  ;;  %v2187_v11 = vsel %vm321_vm2, %v2184_v56, %v2186_v13  ;;  %v2188_v54 = vrot.slane %v4391_v35, 1  ;;  %v2189_v55 = vrot.slane %v4394_v3, 1  ;;  %v2270_v45 = vpack.c.bf16 %v2182_v4, %v2180_v18  ;;  %v3262_v18 = vld [vmem:[%s3835_s27 + $0x588] sm:$0xff]  ;;  %v3263_v4 = vld [vmem:[%s3835_s27 + $0x590] sm:$0xff] }
 0x105   : > { %v4618_v62 = vadd.f32 %v927_v32, %v758_v0  ;;  %v779_v17 = vadd.f32 %v3494_v57, %v4468_v23  ;;  %v940_v24 = vpop.f32.mrf.mxu0  ;;  %3700 = vmatprep.mubr.msk.bf16.mxu1 %vm452_vm3, %v2269_v34  ;;  %v2566_v32 = vpack.c.bf16 %v3259_v61, %v3258_v52  ;;  %v2271_v56 = vpack.c.bf16 %v2187_v11, %v2185_v29  ;;  %v3193_v29 = vld [vmem:[%s3835_s27 + $0x418] sm:$0x1] }
 0x106   : > { %v770_v16 = vpop.f32.mrf.mxu1  ;;  %v2191_v50 = vrot.slane %v3187_v51, 1  ;;  %v2194_v13 = vrot.slane %v4402_v15, 1  ;;  %v2196_v35 = vrot.slane %v3190_v27, 1  ;;  %v2199_v27 = vrot.slane %v4416_v49, 1 }
 0x107   : > { %v4629_v19 = vadd.f32 %v3528_v63, %v779_v17  ;;  %v771_v20 = vadd.f32 %v770_v16, %v4482_v25  ;;  %v3529_v23 = vpop.f32.mrf.mxu0  ;;  %v2193_v25 = vrot.slane %v4399_v12, 1  ;;  %v3260_v12 = vld [vmem:[%s3835_s27 + $0x570] sm:$0xff] }
 0x108   : > { %v3495_v59 = vpop.f32.mrf.mxu1  ;;  %v2197_v16 = vsel %vm321_vm2, %v2194_v13, %v2196_v35  ;;  %v3265_v35 = vld [vmem:[%s3835_s27 + $0x5a8] sm:$0xff] }
 0x109   : > { %v4635_v34 = vadd.f32 %v940_v24, %v771_v20  ;;  %v782_v22 = vadd.f32 %v3495_v59, %v4494_v14  ;;  %v943_v48 = vpop.f32.mrf.mxu0  ;;  %v2192_v24 = vsel %vm321_vm2, %v2189_v55, %v2191_v50  ;;  %v2195_v61 = vsel %vm321_vm2, %v2193_v25, %v2194_v13 }
 0x10a   : > { %v773_v0 = vpop.f32.mrf.mxu1  ;;  %v2567_v20 = vpack.c.bf16 %v3261_v44, %v3260_v12  ;;  %v2568_v59 = vpack.c.bf16 %v3263_v4, %v3262_v18  ;;  %v2204_v50 = vrot.slane %v4424_v7, 1  ;;  %v3266_v12 = vld [vmem:[%s3835_s27 + $0x5b8] sm:$0xff]  ;;  %v3267_v44 = vld [vmem:[%s3835_s27 + $0x5c0] sm:$0xff] }
 0x10b   : > { %v4640_v3 = vadd.f32 %v3529_v23, %v782_v22  ;;  %v774_v63 = vadd.f32 %v773_v0, %v4503_v31  ;;  %v3532_v57 = vpop.f32.mrf.mxu0  ;;  %3735 = vmatmul.mubr.msk.bf16.gmra.mxu0 %vm452_vm3, %v2565_v41  ;;  %v2190_v31 = vsel %vm321_vm2, %v2188_v54, %v2189_v55  ;;  %v3196_v23 = vld [vmem:[%s3835_s27 + $0x430] sm:$0x1]  ;;  %v2198_v41 = vrot.slane %v4413_v2, 1 }
 0x10c   : > { %v3498_v14 = vpop.f32.mrf.mxu1  ;;  %3701 = vmatmul.mubr.msk.bf16.gmra.mxu1 %vm452_vm3, %v2270_v45  ;;  %3738 = vmatprep.mubr.msk.bf16.mxu0 %vm452_vm3, %v2566_v32  ;;  %v2272_v55 = vpack.c.bf16 %v2192_v24, %v2190_v31  ;;  %v2206_v2 = vrot.slane %v3196_v23, 1  ;;  %v3199_v24 = vld [vmem:[%s3835_s27 + $0x448] sm:$0x1] }
 0x10d   : > { %v4648_v15 = vadd.f32 %v943_v48, %v774_v63  ;;  %v795_v30 = vadd.f32 %v3498_v14, %v4509_v1  ;;  %v956_v17 = vpop.f32.mrf.mxu0  ;;  %3704 = vmatprep.mubr.msk.bf16.mxu1 %vm452_vm3, %v2271_v56  ;;  %v2273_v48 = vpack.c.bf16 %v2197_v16, %v2195_v61  ;;  %v2201_v56 = vrot.slane %v3193_v29, 1  ;;  %v3202_v61 = vld [vmem:[%s3835_s27 + $0x460] sm:$0x1] }
 0x10e   : > { %v786_v52 = vpop.f32.mrf.mxu1  ;;  %v2207_v31 = vsel %vm321_vm2, %v2204_v50, %v2206_v2  ;;  %v2208_v16 = vrot.slane %v4439_v42, 1  ;;  %v2209_v29 = vrot.slane %v4442_v43, 1  ;;  %v2216_v42 = vrot.slane %v3202_v61, 1  ;;  %v3270_v2 = vld [vmem:[%s3835_s27 + $0x5e8] sm:$0xff] }
 0x10f   : > { %v4659_v11 = vadd.f32 %v3532_v57, %v795_v30  ;;  %v787_v51 = vadd.f32 %v786_v52, %v4524_v21  ;;  %v3533_v1 = vpop.f32.mrf.mxu0  ;;  %v2203_v21 = vrot.slane %v4421_v28, 1  ;;  %v3264_v28 = vld [vmem:[%s3835_s27 + $0x5a0] sm:$0xff]  ;;  %v2202_v14 = vsel %vm321_vm2, %v2199_v27, %v2201_v56  ;;  %v3269_v56 = vld [vmem:[%s3835_s27 + $0x5d8] sm:$0xff] }
 0x110   : > { %v3499_v54 = vpop.f32.mrf.mxu1  ;;  %v2569_v52 = vpack.c.bf16 %v3265_v35, %v3264_v28  ;;  %v3205_v35 = vld [vmem:[%s3835_s27 + $0x478] sm:$0x1] }
 0x111   : > { %v4665_v45 = vadd.f32 %v956_v17, %v787_v51  ;;  %v798_v32 = vadd.f32 %v3499_v54, %v4536_v10  ;;  %v959_v22 = vpop.f32.mrf.mxu0  ;;  %v2205_v17 = vsel %vm321_vm2, %v2203_v21, %v2204_v50  ;;  %v2221_v61 = vrot.slane %v3205_v35, 1 }
 0x112   : > { %v789_v25 = vpop.f32.mrf.mxu1  ;;  %v2275_v54 = vpack.c.bf16 %v2207_v31, %v2205_v17 }
 0x113   : > { %v4670_v49 = vadd.f32 %v3533_v1, %v798_v32  ;;  %v790_v13 = vadd.f32 %v789_v25, %v4545_v46  ;;  %v3536_v0 = vpop.f32.mrf.mxu0  ;;  %3739 = vmatmul.mubr.msk.bf16.gmra.mxu0 %vm452_vm3, %v2567_v20  ;;  %v2200_v46 = vsel %vm321_vm2, %v2198_v41, %v2199_v27  ;;  %v2570_v20 = vpack.c.bf16 %v3267_v44, %v3266_v12 }
 0x114   : > { %v3502_v10 = vpop.f32.mrf.mxu1  ;;  %3705 = vmatmul.mubr.msk.bf16.gmra.mxu1 %vm452_vm3, %v2272_v55  ;;  %3742 = vmatprep.mubr.msk.bf16.mxu0 %vm452_vm3, %v2568_v59  ;;  %v2274_v1 = vpack.c.bf16 %v2202_v14, %v2200_v46  ;;  %v2211_v55 = vrot.slane %v3199_v24, 1  ;;  %v2214_v59 = vrot.slane %v4452_v60, 1  ;;  %v3208_v14 = vld [vmem:[%s3835_s27 + $0x490] sm:$0x1]  ;;  %v2218_v12 = vrot.slane %v4477_v38, 1 }
 0x115   : > { %v4678_v7 = vadd.f32 %v959_v22, %v790_v13  ;;  %v811_v63 = vadd.f32 %v3502_v10, %v4551_v8  ;;  %v972_v57 = vpop.f32.mrf.mxu0  ;;  %3708 = vmatprep.mubr.msk.bf16.mxu1 %vm452_vm3, %v2273_v48  ;;  %v3271_v13 = vld [vmem:[%s3835_s27 + $0x5f0] sm:$0xff]  ;;  %v2219_v44 = vrot.slane %v4480_v39, 1  ;;  %v2226_v38 = vrot.slane %v3208_v14, 1 }
 0x116   : > { %v802_v30 = vpop.f32.mrf.mxu1  ;;  %v2212_v25 = vsel %vm321_vm2, %v2209_v29, %v2211_v55  ;;  %v2217_v28 = vsel %vm321_vm2, %v2214_v59, %v2216_v42  ;;  %v2572_v31 = vpack.c.bf16 %v3271_v13, %v3270_v2  ;;  %v5264_v55 = vld [vmem:[#allocation3_spill] sm:$0xff] }
 0x117   : > { %v4689_v18 = vadd.f32 %v3536_v0, %v811_v63  ;;  %v803_v4 = vadd.f32 %v802_v30, %v4562_v37  ;;  %v3537_v8 = vpop.f32.mrf.mxu0  ;;  %v2213_v37 = vrot.slane %v4449_v47, 1  ;;  %v3268_v47 = vld [vmem:[%s3835_s27 + $0x5d0] sm:$0xff]  ;;  %v2222_v42 = vsel %vm321_vm2, %v2219_v44, %v2221_v61 }
 0x118   : > { %v3503_v51 = vpop.f32.mrf.mxu1  ;;  %v2571_v46 = vpack.c.bf16 %v3269_v56, %v3268_v47 }
 0x119   : > { %v4695_v23 = vadd.f32 %v972_v57, %v803_v4  ;;  %v814_v41 = vadd.f32 %v3503_v51, %v4572_v40  ;;  %v975_v27 = vpop.f32.mrf.mxu0  ;;  %v2215_v10 = vsel %vm321_vm2, %v2213_v37, %v2214_v59 }
 0x11a   : > { %v805_v32 = vpop.f32.mrf.mxu1 }
 0x11b   : > { %v4700_v43 = vadd.f32 %v3537_v8, %v814_v41  ;;  %v806_v22 = vadd.f32 %v805_v32, %v4579_v26  ;;  %v3540_v48 = vpop.f32.mrf.mxu0  ;;  %3743 = vmatmul.mubr.msk.bf16.gmra.mxu0 %vm452_vm3, %v2569_v52  ;;  %v2210_v26 = vsel %vm321_vm2, %v2208_v16, %v2209_v29  ;;  %v2277_v52 = vpack.c.bf16 %v2217_v28, %v2215_v10  ;;  %v5262_v16 = vld [vmem:[#allocation4_spill] sm:$0xff]  ;;  %v5267_v28 = vld [vmem:[#allocation10_spill] sm:$0xff] }
 0x11c   : > { %v3506_v40 = vpop.f32.mrf.mxu1  ;;  %3709 = vmatmul.mubr.msk.bf16.gmra.mxu1 %vm452_vm3, %v2274_v1  ;;  %3746 = vmatprep.mubr.msk.bf16.mxu0 %vm452_vm3, %v2570_v20  ;;  %v2276_v17 = vpack.c.bf16 %v2212_v25, %v2210_v26  ;;  %v2224_v29 = vrot.slane %v5262_v16, 1  ;;  %v5263_v1 = vld [vmem:[#allocation2_spill] sm:$0xff]  ;;  %v2220_v32 = vsel %vm321_vm2, %v2218_v12, %v2219_v44  ;;  %v5265_v26 = vld [vmem:[#allocation5_spill] sm:$0xff]  ;;  %v2229_v35 = vrot.slane %v5267_v28, 1 }
 0x11d   : > { %v4708_v60 = vadd.f32 %v975_v27, %v806_v22  ;;  %v827_v21 = vadd.f32 %v3506_v40, %v4433_v33  ;;  %v988_v50 = vpop.f32.mrf.mxu0  ;;  %3712 = vmatprep.mubr.msk.bf16.mxu1 %vm452_vm3, %v2275_v54  ;;  %v3273_v27 = vld [vmem:[%s3835_s27 + $0x608] sm:$0xff]  ;;  %v3274_v22 = vld [vmem:[%s3835_s27 + $0x618] sm:$0xff]  ;;  %v5268_v12 = vld [vmem:[#allocation6_spill] sm:$0xff] }
 0x11e   : > { %v818_v0 = vpop.f32.mrf.mxu1  ;;  %v2227_v56 = vsel %vm321_vm2, %v2224_v29, %v2226_v38 }
 0x11f   : > { %v4719_v63 = vadd.f32 %v3540_v48, %v827_v21  ;;  %v819_v57 = vadd.f32 %v818_v0, %v4454_v58  ;;  %v3541_v33 = vpop.f32.mrf.mxu0  ;;  %v2223_v58 = vrot.slane %v4487_v53, 1  ;;  %v3272_v53 = vld [vmem:[%s3835_s27 + $0x600] sm:$0xff]  ;;  %v3211_v21 = vld [vmem:[%s3835_s27 + $0x4a8] sm:$0x1]  ;;  %v5266_v0 = vld [vmem:[#allocation9_spill] sm:$0xff] }
 0x120   : > { %v3507_v30 = vpop.f32.mrf.mxu1  ;;  %v3275_v48 = vld [vmem:[%s3835_s27 + $0x620] sm:$0xff]  ;;  %v2573_v13 = vpack.c.bf16 %v3273_v27, %v3272_v53  ;;  %v2228_v10 = vrot.slane %v5266_v0, 1 }
 0x121   : > { %v4725_v24 = vadd.f32 %v988_v50, %v819_v57  ;;  %v830_v4 = vadd.f32 %v3507_v30, %v4460_v6  ;;  %v991_v8 = vpop.f32.mrf.mxu0  ;;  %v2225_v47 = vsel %vm321_vm2, %v2223_v58, %v2224_v29  ;;  %v3276_v29 = vld [vmem:[%s3835_s27 + $0x630] sm:$0xff] }
 0x122   : > { %v821_v51 = vpop.f32.mrf.mxu1 }
 0x123   : > { %v4730_v39 = vadd.f32 %v3541_v33, %v830_v4  ;;  %v822_v20 = vadd.f32 %v821_v51, %v5263_v1  ;;  %v3544_v41 = vpop.f32.mrf.mxu0  ;;  %3747 = vmatmul.mubr.msk.bf16.gmra.mxu0 %vm452_vm3, %v2571_v46  ;;  %v2278_v33 = vpack.c.bf16 %v2222_v42, %v2220_v32  ;;  %v2574_v46 = vpack.c.bf16 %v3275_v48, %v3274_v22  ;;  %v3277_v51 = vld [vmem:[%s3835_s27 + $0x638] sm:$0xff]  ;;  %v5270_v1 = vld [vmem:[#allocation8_spill] sm:$0xff] }
 0x124   : > { %v3510_v6 = vpop.f32.mrf.mxu1  ;;  %3713 = vmatmul.mubr.msk.bf16.gmra.mxu1 %vm452_vm3, %v2276_v17  ;;  %3750 = vmatprep.mubr.msk.bf16.mxu0 %vm452_vm3, %v2572_v31  ;;  %v2279_v17 = vpack.c.bf16 %v2227_v56, %v2225_v47  ;;  %v2231_v31 = vrot.slane %v3211_v21, 1  ;;  %v2575_v42 = vpack.c.bf16 %v3277_v51, %v3276_v29  ;;  %v5272_v47 = vld [vmem:[#allocation12_spill] sm:$0xff]  ;;  %v5277_v51 = vld [vmem:[#allocation17_spill] sm:$0xff] }
 0x125   : > { %v4738_v54 = vadd.f32 %v991_v8, %v822_v20  ;;  %v843_v37 = vadd.f32 %v3510_v6, %v5264_v55  ;;  %v1004_v59 = vpop.f32.mrf.mxu0  ;;  %3716 = vmatprep.mubr.msk.bf16.mxu1 %vm452_vm3, %v2277_v52  ;;  %v5269_v52 = vld [vmem:[#allocation7_spill] sm:$0xff]  ;;  %v2230_v6 = vsel %vm321_vm2, %v2228_v10, %v2229_v35 }
 0x126   : > { %v834_v40 = vpop.f32.mrf.mxu1  ;;  %v2232_v53 = vsel %vm321_vm2, %v2229_v35, %v2231_v31  ;;  %v5274_v35 = vld [vmem:[#allocation14_spill] sm:$0xff] }
 0x127   : > { %v4749_v50 = vadd.f32 %v3544_v41, %v843_v37  ;;  %v835_v25 = vadd.f32 %v834_v40, %v5265_v26  ;;  %v3545_v2 = vpop.f32.mrf.mxu0  ;;  %v5271_v37 = vld [vmem:[#allocation11_spill] sm:$0xff]  ;;  %v2280_v48 = vpack.c.bf16 %v2232_v53, %v2230_v6 }
 0x128   : > { %v3511_v57 = vpop.f32.mrf.mxu1 }
 0x129   : > { %v4754_v14 = vadd.f32 %v1004_v59, %v835_v25  ;;  %v846_v44 = vadd.f32 %v3511_v57, %v5268_v12  ;;  %v1007_v30 = vpop.f32.mrf.mxu0 }
 0x12a   : > { %v837_v4 = vpop.f32.mrf.mxu1 }
 0x12b   : > { %v4757_v8 = vadd.f32 %v3545_v2, %v846_v44  ;;  %v838_v61 = vadd.f32 %v837_v4, %v5269_v52  ;;  %v3548_v58 = vpop.f32.mrf.mxu0  ;;  %3751 = vmatmul.mubr.msk.bf16.gmra.mxu0 %vm452_vm3, %v2573_v13  ;;  %v5273_v2 = vld [vmem:[#allocation13_spill] sm:$0xff]  ;;  %v5275_v44 = vld [vmem:[#allocation15_spill] sm:$0xff]  ;;  %v5276_v52 = vld [vmem:[#allocation16_spill] sm:$0xff] }
 0x12c   : > { %v3514_v16 = vpop.f32.mrf.mxu1  ;;  %3717 = vmatmul.mubr.msk.bf16.gmra.mxu1 %vm452_vm3, %v2278_v33  ;;  %3754 = vmatprep.mubr.msk.bf16.mxu0 %vm452_vm3, %v2574_v46 }
 0x12d   : > { %v4765_v38 = vadd.f32 %v1007_v30, %v838_v61  ;;  %v859_v20 = vadd.f32 %v3514_v16, %v5270_v1  ;;  %v1020_v41 = vpop.f32.mrf.mxu0  ;;  %3720 = vmatprep.mubr.msk.bf16.mxu1 %vm452_vm3, %v2279_v17 }
 0x12e   : > { %v850_v27 = vpop.f32.mrf.mxu1 }
 0x12f   : > { %v4771_v55 = vadd.f32 %v3548_v58, %v859_v20  ;;  %v851_v59 = vadd.f32 %v850_v27, %v5271_v37  ;;  %v3549_v32 = vpop.f32.mrf.mxu0 }
 0x130   : > { %v3515_v22 = vpop.f32.mrf.mxu1 }
 0x131   : > { %v4774_v40 = vadd.f32 %v1020_v41, %v851_v59  ;;  %v862_v56 = vadd.f32 %v3515_v22, %v5272_v47  ;;  %v1023_v21 = vpop.f32.mrf.mxu0 }
 0x132   : > { %v853_v26 = vpop.f32.mrf.mxu1 }
 0x133   : > { %v4777_v25 = vadd.f32 %v3549_v32, %v862_v56  ;;  %v854_v13 = vadd.f32 %v853_v26, %v5273_v2  ;;  %v3552_v0 = vpop.f32.mrf.mxu0  ;;  %3755 = vmatmul.mubr.msk.bf16.gmra.mxu0 %vm452_vm3, %v2575_v42 }
 0x134   : > { %v3518_v10 = vpop.f32.mrf.mxu1  ;;  %3721 = vmatmul.mubr.msk.bf16.gmra.mxu1 %vm452_vm3, %v2280_v48 }
 0x135   : > { %v4782_v28 = vadd.f32 %v1023_v21, %v854_v13  ;;  %v875_v57 = vadd.f32 %v3518_v10, %v5274_v35  ;;  %v1036_v33 = vpop.f32.mrf.mxu0 }
 0x136   : > { %v866_v46 = vpop.f32.mrf.mxu1 }
 0x137   : > { %v4785_v12 = vadd.f32 %v3552_v0, %v875_v57  ;;  %v867_v30 = vadd.f32 %v866_v46, %v5275_v44  ;;  %v3553_v17 = vpop.f32.mrf.mxu0 }
 0x138   : > { %v3519_v31 = vpop.f32.mrf.mxu1 }
 0x139   : > { %v4788_v4 = vadd.f32 %v1036_v33, %v867_v30  ;;  %v878_v61 = vadd.f32 %v3519_v31, %v5276_v52  ;;  %v1039_v58 = vpop.f32.mrf.mxu0 }
 0x13a   : > { %v869_v16 = vpop.f32.mrf.mxu1 }
 0x13b   : > { %v4791_v29 = vadd.f32 %v3553_v17, %v878_v61  ;;  %v870_v1 = vadd.f32 %v869_v16, %v5277_v51  ;;  %v3592_v20 = vpop.f32.mrf.mxu0 }
 0x13c   : > { %v3558_v41 = vpop.f32.mrf.mxu1 }
 0x13d   : > { %v4794_v6 = vadd.f32 %v1039_v58, %v870_v1  ;;  %v1265_v53 = vadd.f32 %v3558_v41, %v4599_v5  ;;  %v1433_v27 = vpop.f32.mrf.mxu0 }
 0x13e   : > { %v1136_v37 = vpop.f32.mrf.mxu1 }
 0x13f   : > { %v4797_v59 = vadd.f32 %v3592_v20, %v1265_v53  ;;  %v1263_v32 = vadd.f32 %v1136_v37, %v4605_v9  ;;  %v3593_v42 = vpop.f32.mrf.mxu0 }
 0x140   : > { %v3559_v22 = vpop.f32.mrf.mxu1 }
 0x141   : > { %v4800_v48 = vadd.f32 %v1433_v27, %v1263_v32  ;;  %v1266_v47 = vadd.f32 %v3559_v22, %v4610_v36  ;;  %v1436_v56 = vpop.f32.mrf.mxu0 }
 0x142   : > { %v1139_v21 = vpop.f32.mrf.mxu1 }
 0x143   : > { %v4803_v26 = vadd.f32 %v3593_v42, %v1266_v47  ;;  %v1264_v2 = vadd.f32 %v1139_v21, %v4618_v62  ;;  %v3596_v13 = vpop.f32.mrf.mxu0 }
 0x144   : > { %v3562_v5 = vpop.f32.mrf.mxu1 }
 0x145   : > { %v4806_v0 = vadd.f32 %v1436_v56, %v1264_v2  ;;  %v1269_v10 = vadd.f32 %v3562_v5, %v4629_v19  ;;  %v1449_v35 = vpop.f32.mrf.mxu0 }
 0x146   : > { %v1152_v9 = vpop.f32.mrf.mxu1 }
 0x147   : > { %v4809_v57 = vadd.f32 %v3596_v13, %v1269_v10  ;;  %v1267_v33 = vadd.f32 %v1152_v9, %v4635_v34  ;;  %v3597_v46 = vpop.f32.mrf.mxu0 }
 0x148   : > { %v3563_v36 = vpop.f32.mrf.mxu1 }
 0x149   : > { %v4812_v44 = vadd.f32 %v1449_v35, %v1267_v33  ;;  %v1270_v30 = vadd.f32 %v3563_v36, %v4640_v3  ;;  %v1452_v17 = vpop.f32.mrf.mxu0 }
 0x14a   : > { %v1155_v62 = vpop.f32.mrf.mxu1 }
 0x14b   : > { %v4815_v31 = vadd.f32 %v3597_v46, %v1270_v30  ;;  %v1268_v52 = vadd.f32 %v1155_v62, %v4648_v15  ;;  %v3600_v61 = vpop.f32.mrf.mxu0 }
 0x14c   : > { %v3566_v19 = vpop.f32.mrf.mxu1 }
 0x14d   : > { %v4818_v58 = vadd.f32 %v1452_v17, %v1268_v52  ;;  %v1273_v16 = vadd.f32 %v3566_v19, %v4659_v11  ;;  %v1465_v51 = vpop.f32.mrf.mxu0 }
 0x14e   : > { %v1168_v34 = vpop.f32.mrf.mxu1 }
 0x14f   : > { %v4821_v1 = vadd.f32 %v3600_v61, %v1273_v16  ;;  %v1271_v20 = vadd.f32 %v1168_v34, %v4665_v45  ;;  %v3601_v41 = vpop.f32.mrf.mxu0 }
 0x150   : > { %v3567_v3 = vpop.f32.mrf.mxu1 }
 0x151   : > { %v4824_v53 = vadd.f32 %v1465_v51, %v1271_v20  ;;  %v1274_v27 = vadd.f32 %v3567_v3, %v4670_v49  ;;  %v1468_v37 = vpop.f32.mrf.mxu0 }
 0x152   : > { %v1171_v15 = vpop.f32.mrf.mxu1 }
 0x153   : > { %v4827_v32 = vadd.f32 %v3601_v41, %v1274_v27  ;;  %v1272_v42 = vadd.f32 %v1171_v15, %v4678_v7  ;;  %v3604_v22 = vpop.f32.mrf.mxu0 }
 0x154   : > { %v3570_v11 = vpop.f32.mrf.mxu1 }
 0x155   : > { %v4830_v47 = vadd.f32 %v1468_v37, %v1272_v42  ;;  %v1277_v56 = vadd.f32 %v3570_v11, %v4689_v18  ;;  %v1481_v21 = vpop.f32.mrf.mxu0 }
 0x156   : > { %v1184_v45 = vpop.f32.mrf.mxu1 }
 0x157   : > { %v4833_v2 = vadd.f32 %v3604_v22, %v1277_v56  ;;  %v1275_v13 = vadd.f32 %v1184_v45, %v4695_v23  ;;  %v3605_v5 = vpop.f32.mrf.mxu0 }
 0x158   : > { %v3571_v49 = vpop.f32.mrf.mxu1 }
 0x159   : > { %v4836_v10 = vadd.f32 %v1481_v21, %v1275_v13  ;;  %v1278_v35 = vadd.f32 %v3571_v49, %v4700_v43  ;;  %v1484_v9 = vpop.f32.mrf.mxu0 }
 0x15a   : > { %v1187_v7 = vpop.f32.mrf.mxu1 }
 0x15b   : > { %v4839_v33 = vadd.f32 %v3605_v5, %v1278_v35  ;;  %v1276_v46 = vadd.f32 %v1187_v7, %v4708_v60  ;;  %v3608_v36 = vpop.f32.mrf.mxu0 }
 0x15c   : > { %v3574_v18 = vpop.f32.mrf.mxu1 }
 0x15d   : > { %v4842_v30 = vadd.f32 %v1484_v9, %v1276_v46  ;;  %v1281_v17 = vadd.f32 %v3574_v18, %v4719_v63  ;;  %v1497_v62 = vpop.f32.mrf.mxu0 }
 0x15e   : > { %v1200_v23 = vpop.f32.mrf.mxu1 }
 0x15f   : > { %v4845_v52 = vadd.f32 %v3608_v36, %v1281_v17  ;;  %v1279_v61 = vadd.f32 %v1200_v23, %v4725_v24  ;;  %v3609_v19 = vpop.f32.mrf.mxu0 }
 0x160   : > { %v3575_v43 = vpop.f32.mrf.mxu1 }
 0x161   : > { %v4848_v16 = vadd.f32 %v1497_v62, %v1279_v61  ;;  %v1282_v51 = vadd.f32 %v3575_v43, %v4730_v39  ;;  %v1500_v34 = vpop.f32.mrf.mxu0 }
 0x162   : > { %v1203_v60 = vpop.f32.mrf.mxu1 }
 0x163   : > { %v4851_v20 = vadd.f32 %v3609_v19, %v1282_v51  ;;  %v1280_v41 = vadd.f32 %v1203_v60, %v4738_v54  ;;  %v3612_v3 = vpop.f32.mrf.mxu0 }
 0x164   : > { %v3578_v63 = vpop.f32.mrf.mxu1 }
 0x165   : > { %5278 = vst [vmem:[#allocation4_spill] sm:$0xff] %v4851_v20  ;;  %v4854_v27 = vadd.f32 %v1500_v34, %v1280_v41  ;;  %v1285_v37 = vadd.f32 %v3578_v63, %v4749_v50  ;;  %v1513_v15 = vpop.f32.mrf.mxu0 }
 0x166   : > { %v1216_v24 = vpop.f32.mrf.mxu1 }
 0x167   : > { %5279 = vst [vmem:[#allocation2_spill] sm:$0xff] %v4854_v27  ;;  %v4857_v42 = vadd.f32 %v3612_v3, %v1285_v37  ;;  %v1283_v22 = vadd.f32 %v1216_v24, %v4754_v14  ;;  %v3613_v11 = vpop.f32.mrf.mxu0 }
 0x168   : > { %v3579_v39 = vpop.f32.mrf.mxu1 }
 0x169   : > { %5280 = vst [vmem:[#allocation3_spill] sm:$0xff] %v4857_v42  ;;  %v4860_v56 = vadd.f32 %v1513_v15, %v1283_v22  ;;  %v1286_v21 = vadd.f32 %v3579_v39, %v4757_v8  ;;  %v1516_v45 = vpop.f32.mrf.mxu0 }
 0x16a   : > { %v1219_v54 = vpop.f32.mrf.mxu1 }
 0x16b   : > { %5281 = vst [vmem:[#allocation5_spill] sm:$0xff] %v4860_v56  ;;  %v4863_v13 = vadd.f32 %v3613_v11, %v1286_v21  ;;  %v1284_v5 = vadd.f32 %v1219_v54, %v4765_v38  ;;  %v3616_v49 = vpop.f32.mrf.mxu0 }
 0x16c   : > { %v3582_v50 = vpop.f32.mrf.mxu1 }
 0x16d   : > { %5282 = vst [vmem:[#allocation9_spill] sm:$0xff] %v4863_v13  ;;  %v4866_v35 = vadd.f32 %v1516_v45, %v1284_v5  ;;  %v1289_v9 = vadd.f32 %v3582_v50, %v4771_v55  ;;  %v1529_v7 = vpop.f32.mrf.mxu0 }
 0x16e   : > { %v1232_v14 = vpop.f32.mrf.mxu1 }
 0x16f   : > { %5283 = vst [vmem:[#allocation10_spill] sm:$0xff] %v4866_v35  ;;  %v4869_v46 = vadd.f32 %v3616_v49, %v1289_v9  ;;  %v1287_v36 = vadd.f32 %v1232_v14, %v4774_v40  ;;  %v3617_v18 = vpop.f32.mrf.mxu0 }
 0x170   : > { %v3583_v8 = vpop.f32.mrf.mxu1 }
 0x171   : > { %5284 = vst [vmem:[#allocation6_spill] sm:$0xff] %v4869_v46  ;;  %v4872_v17 = vadd.f32 %v1529_v7, %v1287_v36  ;;  %v1290_v62 = vadd.f32 %v3583_v8, %v4777_v25  ;;  %v1532_v23 = vpop.f32.mrf.mxu0 }
 0x172   : > { %v1235_v38 = vpop.f32.mrf.mxu1 }
 0x173   : > { %5285 = vst [vmem:[#allocation7_spill] sm:$0xff] %v4872_v17  ;;  %v4875_v61 = vadd.f32 %v3617_v18, %v1290_v62  ;;  %v1288_v19 = vadd.f32 %v1235_v38, %v4782_v28  ;;  %v3620_v43 = vpop.f32.mrf.mxu0 }
 0x174   : > { %v3586_v55 = vpop.f32.mrf.mxu1 }
 0x175   : > { %5286 = vst [vmem:[#allocation8_spill] sm:$0xff] %v4875_v61  ;;  %v4878_v51 = vadd.f32 %v1532_v23, %v1288_v19  ;;  %v1293_v34 = vadd.f32 %v3586_v55, %v4785_v12  ;;  %v1545_v60 = vpop.f32.mrf.mxu0 }
 0x176   : > { %v1248_v40 = vpop.f32.mrf.mxu1 }
 0x177   : > { %5287 = vst [vmem:[#allocation11_spill] sm:$0xff] %v4878_v51  ;;  %v4881_v41 = vadd.f32 %v3620_v43, %v1293_v34  ;;  %v1291_v3 = vadd.f32 %v1248_v40, %v4788_v4  ;;  %v3621_v63 = vpop.f32.mrf.mxu0 }
 0x178   : > { %v3587_v25 = vpop.f32.mrf.mxu1 }
 0x179   : > { %5288 = vst [vmem:[#allocation12_spill] sm:$0xff] %v4881_v41  ;;  %v4884_v37 = vadd.f32 %v1545_v60, %v1291_v3  ;;  %v1294_v15 = vadd.f32 %v3587_v25, %v4791_v29  ;;  %v1548_v24 = vpop.f32.mrf.mxu0 }
 0x17a   : > { %v1251_v28 = vpop.f32.mrf.mxu1 }
 0x17b   : > { %5289 = vst [vmem:[#allocation13_spill] sm:$0xff] %v4884_v37  ;;  %v4887_v22 = vadd.f32 %v3621_v63, %v1294_v15  ;;  %v1292_v11 = vadd.f32 %v1251_v28, %v4794_v6  ;;  %v4890_v39 = vpop.f32.mrf.mxu0 }
 0x17c   : > { %v3626_v12 = vpop.f32.mrf.mxu1 }
 0x17d   : > { %5290 = vst [vmem:[#allocation14_spill] sm:$0xff] %v4887_v22  ;;  %v4892_v21 = vadd.f32 %v1548_v24, %v1292_v11  ;;  %v4894_v45 = vpop.f32.mrf.mxu0 }
 0x17e   : > { %v1635_v4 = vpop.f32.mrf.mxu1 }
 0x17f   : > { %5291 = vst [vmem:[#allocation15_spill] sm:$0xff] %v4892_v21  ;;  %v4896_v54 = vpop.f32.mrf.mxu0 }
 0x180   : > { %v4898_v5 = vpop.f32.mrf.mxu1 }
 0x181   : > { %v4900_v49 = vpop.f32.mrf.mxu0 }
 0x182   : > { %v4902_v29 = vpop.f32.mrf.mxu1 }
 0x183   : > { %v4904_v50 = vpop.f32.mrf.mxu0 }
 0x184   : > { %v4906_v9 = vpop.f32.mrf.mxu1 }
 0x185   : > { %v4908_v6 = vpop.f32.mrf.mxu0 }
 0x186   : > { %v4910_v7 = vpop.f32.mrf.mxu1 }
 0x187   : > { %v4912_v14 = vpop.f32.mrf.mxu0 }
 0x188   : > { %v4914_v36 = vpop.f32.mrf.mxu1 }
 0x189   : > { %v4916_v18 = vpop.f32.mrf.mxu0 }
 0x18a   : > { %v4918_v8 = vpop.f32.mrf.mxu1 }
 0x18b   : > { %v4920_v62 = vpop.f32.mrf.mxu0 }
 0x18c   : > { %v4922_v23 = vpop.f32.mrf.mxu1 }
 0x18d   : > { %v4924_v38 = vpop.f32.mrf.mxu0 }
 0x18e   : > { %v4926_v19 = vpop.f32.mrf.mxu1 }
 0x18f   : > { %v4928_v43 = vpop.f32.mrf.mxu0 }
 0x190   : > { %v4930_v55 = vpop.f32.mrf.mxu1 }
 0x191   : > { %v4932_v34 = vpop.f32.mrf.mxu0 }
 0x192   : > { %v4934_v60 = vpop.f32.mrf.mxu1 }
 0x193   : > { %v4936_v40 = vpop.f32.mrf.mxu0 }
 0x194   : > { %v4938_v3 = vpop.f32.mrf.mxu1 }
 0x195   : > { %v4940_v63 = vpop.f32.mrf.mxu0 }
 0x196   : > { %v4942_v25 = vpop.f32.mrf.mxu1 }
 0x197   : > { %v4944_v15 = vpop.f32.mrf.mxu0 }
 0x198   : > { %v4946_v24 = vpop.f32.mrf.mxu1 }
 0x199   : > { %v4948_v28 = vpop.f32.mrf.mxu0 }
 0x19a   : > { %v4950_v11 = vpop.f32.mrf.mxu1 }
 0x19b   : > { %v4952_v21 = vpop.f32.mrf.mxu0 }
 0x19c   : > { %v4954_v22 = vpop.f32.mrf.mxu1 }
 0x19d   : > { %v4956_v37 = vpop.f32.mrf.mxu0 }
 0x19e   : > { %5292 = vst [vmem:[#allocation16_spill] sm:$0xff] %v4956_v37  ;;  %v4958_v41 = vpop.f32.mrf.mxu1 }
 0x19f   : > { %v4960_v51 = vpop.f32.mrf.mxu0 }
 0x1a0   : > { %5293 = vst [vmem:[#allocation17_spill] sm:$0xff] %v4960_v51  ;;  %v4962_v61 = vpop.f32.mrf.mxu1 }
 0x1a1   : > { %5294 = vst [vmem:[#allocation18_spill] sm:$0xff] %v4962_v61  ;;  %v4964_v17 = vpop.f32.mrf.mxu0 }
 0x1a2   : > { %5295 = vst [vmem:[#allocation19_spill] sm:$0xff] %v4964_v17  ;;  %v4966_v46 = vpop.f32.mrf.mxu1 }
 0x1a3   : > { %5296 = vst [vmem:[#allocation20_spill] sm:$0xff] %v4966_v46  ;;  %v4968_v35 = vpop.f32.mrf.mxu0 }
 0x1a4   : > { %5297 = vst [vmem:[#allocation21_spill] sm:$0xff] %v4968_v35  ;;  %v4970_v13 = vpop.f32.mrf.mxu1 }
 0x1a5   : > { %5298 = vst [vmem:[#allocation22_spill] sm:$0xff] %v4970_v13  ;;  %v4972_v56 = vpop.f32.mrf.mxu0 }
 0x1a6   : > { %5299 = vst [vmem:[#allocation23_spill] sm:$0xff] %v4972_v56  ;;  %v4974_v42 = vpop.f32.mrf.mxu1 }
 0x1a7   : > { %5300 = vst [vmem:[#allocation24_spill] sm:$0xff] %v4974_v42  ;;  %v4976_v27 = vpop.f32.mrf.mxu0 }
 0x1a8   : > { %5301 = vst [vmem:[#allocation25_spill] sm:$0xff] %v4976_v27  ;;  %v4978_v37 = vpop.f32.mrf.mxu1 }
 0x1a9   : > { %5302 = vst [vmem:[#allocation26_spill] sm:$0xff] %v4978_v37  ;;  %v4980_v51 = vpop.f32.mrf.mxu0 }
 0x1aa   : > { %5303 = vst [vmem:[#allocation27_spill] sm:$0xff] %v4980_v51  ;;  %v4982_v61 = vpop.f32.mrf.mxu1 }
 0x1ab   : > { %5304 = vst [vmem:[#allocation28_spill] sm:$0xff] %v4982_v61  ;;  %v4984_v17 = vpop.f32.mrf.mxu0 }
 0x1ac   : > { %5305 = vst [vmem:[#allocation29_spill] sm:$0xff] %v4984_v17  ;;  %v4986_v46 = vpop.f32.mrf.mxu1 }
 0x1ad   : > { %v4988_v35 = vpop.f32.mrf.mxu0 }
 0x1ae   : > { %5306 = vst [vmem:[#allocation30_spill] sm:$0xff] %v4988_v35  ;;  %v4990_v13 = vpop.f32.mrf.mxu1  ;;  %v1764_v35 = vadd.f32 %v3626_v12, %v4797_v59  ;;  %v1763_v12 = vadd.f32 %v4902_v29, %v4806_v0  ;;  %v1766_v0 = vadd.f32 %v4910_v7, %v4812_v44 }
 0x1af   : > { %5307 = vst [vmem:[#allocation31_spill] sm:$0xff] %v4990_v13  ;;  %v4992_v56 = vpop.f32.mrf.mxu0 }
 0x1b0   : > { %5308 = vst [vmem:[#allocation32_spill] sm:$0xff] %v4992_v56  ;;  %v4994_v42 = vpop.f32.mrf.mxu1 }
 0x1b1   : > { %5309 = vst [vmem:[#allocation33_spill] sm:$0xff] %v4994_v42  ;;  %v4996_v27 = vpop.f32.mrf.mxu0 }
 0x1b2   : > { %5310 = vst [vmem:[#allocation34_spill] sm:$0xff] %v4996_v27  ;;  %v4998_v20 = vpop.f32.mrf.mxu1  ;;  %v1762_v27 = vadd.f32 %v1635_v4, %v4800_v48  ;;  %v5031_v4 = vld [vmem:[%s5231_s2] ss:$0 sm:$0xff] }
 0x1b3   : > { %5311 = vst [vmem:[#allocation35_spill] sm:$0xff] %v4998_v20  ;;  %v5000_v37 = vpop.f32.mrf.mxu0 }
 0x1b4   : > { %5312 = vst [vmem:[#allocation36_spill] sm:$0xff] %v5000_v37  ;;  %v5002_v51 = vpop.f32.mrf.mxu1  ;;  %v2073_v59 = vadd.f32 %v4894_v45, %v1762_v27  ;;  %v1768_v27 = vadd.f32 %v4906_v9, %v4809_v57  ;;  %v2074_v45 = vadd.f32 %v4900_v49, %v1763_v12  ;;  %v1769_v57 = vadd.f32 %v4914_v36, %v4815_v31 }
 0x1b5   : > { %5313 = vst [vmem:[#allocation37_spill] sm:$0xff] %v5002_v51  ;;  %v5004_v61 = vpop.f32.mrf.mxu0  ;;  %v2075_v51 = vadd.f32 %v4890_v39, %v1764_v35  ;;  %v2077_v49 = vadd.f32 %v4908_v6, %v1766_v0  ;;  %v1767_v12 = vadd.f32 %v4918_v8, %v4818_v58  ;;  %v1772_v58 = vadd.f32 %v4922_v23, %v4821_v1 }
 0x1b6   : > { %5314 = vst [vmem:[#allocation38_spill] sm:$0xff] %v5004_v61  ;;  %v5006_v17 = vpop.f32.mrf.mxu1  ;;  %v1765_v61 = vadd.f32 %v4898_v5, %v4803_v26  ;;  %v2080_v6 = vadd.f32 %v4912_v14, %v1769_v57 }
 0x1b7   : > { %5315 = vst [vmem:[#allocation39_spill] sm:$0xff] %v5006_v17  ;;  %v5011_v13 = vpop.f32.mrf.mxu0  ;;  %v2083_v57 = vadd.f32 %v4920_v62, %v1772_v58 }
 0x1b8   : > { %5316 = vst [vmem:[#allocation40_spill] sm:$0xff] %v5011_v13  ;;  %v5013_v56 = vpop.f32.mrf.mxu1  ;;  %v2076_v26 = vadd.f32 %v4896_v54, %v1765_v61 }
 0x1b9   : > { %v5016_v42 = vpop.f32.mrf.mxu0 }
 0x1ba   : > { %5317 = vst [vmem:[#allocation41_spill] sm:$0xff] %v5016_v42  ;;  %v5018_v37 = vpop.f32.mrf.mxu1 }
 0x1bb   : > { %5318 = vst [vmem:[#allocation42_spill] sm:$0xff] %v5018_v37  ;;  %v3728_v17 = vpop.f32.mrf.mxu0  ;;  %v2079_v37 = vadd.f32 %v4904_v50, %v1768_v27 }
 0x1bc   : > { %v3694_v20 = vpop.f32.mrf.mxu1 }
 0x1bd   : > { %v2497_v13 = vadd.f32 %v3694_v20, %v2075_v51  ;;  %v2663_v48 = vpop.f32.mrf.mxu0  ;;  %v5041_v20 = vld [vmem:[%s5232_s3] ss:$0 sm:$0xff] }
 0x1be   : > { %v2368_v35 = vpop.f32.mrf.mxu1 }
 0x1bf   : > { %v2792_v39 = vadd.f32 %v3728_v17, %v2497_v13  ;;  %v2495_v5 = vadd.f32 %v2368_v35, %v2073_v59  ;;  %v3729_v42 = vpop.f32.mrf.mxu0 }
 0x1c0   : > { %v3695_v51 = vpop.f32.mrf.mxu1 }
 0x1c1   : > { %v2831_v61 = vmul.f32 %v5031_v4, %v2792_v39  ;;  %v2790_v13 = vadd.f32 %v2663_v48, %v2495_v5  ;;  %v2498_v17 = vadd.f32 %v3695_v51, %v2076_v26  ;;  %v2666_v54 = vpop.f32.mrf.mxu0 }
 0x1c2   : > { %v2371_v29 = vpop.f32.mrf.mxu1 }
 0x1c3   : > { %v2870_v44 = vadd.f32 %v5041_v20, %v2831_v61  ;;  %v2829_v9 = vmul.f32 %v5031_v4, %v2790_v13  ;;  %v2793_v7 = vadd.f32 %v3729_v42, %v2498_v17  ;;  %v2496_v59 = vadd.f32 %v2371_v29, %v2074_v45  ;;  %v3732_v35 = vpop.f32.mrf.mxu0 }
 0x1c4   : > { %v3698_v31 = vpop.f32.mrf.mxu1  ;;  %v2078_v61 = vadd.f32 %v4916_v18, %v1767_v12  ;;  %v1770_v29 = vadd.f32 %v4926_v19, %v4824_v53 }
 0x1c5   : > { %v2902_v36 = vmax.f32 %v2870_v44, 0.0  ;;  %v2868_v48 = vadd.f32 %v5041_v20, %v2829_v9  ;;  %v2832_v42 = vmul.f32 %v5031_v4, %v2793_v7  ;;  %v2791_v26 = vadd.f32 %v2666_v54, %v2496_v59  ;;  %v2679_v50 = vpop.f32.mrf.mxu0 }
 0x1c6   : > { %v2501_v8 = vadd.f32 %v3698_v31, %v2079_v37  ;;  %v2384_v39 = vpop.f32.mrf.mxu1  ;;  %v1773_v44 = vadd.f32 %v4930_v55, %v4827_v32  ;;  %v1771_v31 = vadd.f32 %v4934_v60, %v4830_v47  ;;  %v1776_v47 = vadd.f32 %v4938_v3, %v4833_v2 }
 0x1c7   : > { %2934 = vst [vmem:[%s5057_s23 + $0x10] sm:$0xff] %v2902_v36  ;;  %v2900_v5 = vmax.f32 %v2868_v48, 0.0  ;;  %v2871_v27 = vadd.f32 %v5041_v20, %v2832_v42  ;;  %v2830_v0 = vmul.f32 %v5031_v4, %v2791_v26  ;;  %v2499_v51 = vadd.f32 %v2384_v39, %v2077_v49  ;;  %v3733_v45 = vpop.f32.mrf.mxu0 }
 0x1c8   : > { %v2796_v13 = vadd.f32 %v3732_v35, %v2501_v8  ;;  %v3699_v17 = vpop.f32.mrf.mxu1  ;;  %v2081_v42 = vadd.f32 %v4924_v38, %v1770_v29  ;;  %v2084_v26 = vadd.f32 %v4928_v43, %v1773_v44  ;;  %v1774_v38 = vadd.f32 %v4942_v25, %v4836_v10 }
 0x1c9   : > { %2932 = vst [vmem:[%s5057_s23] sm:$0xff] %v2900_v5  ;;  %v2903_v14 = vmax.f32 %v2871_v27, 0.0  ;;  %v2869_v54 = vadd.f32 %v5041_v20, %v2830_v0  ;;  %v2794_v1 = vadd.f32 %v2679_v50, %v2499_v51  ;;  %v2502_v37 = vadd.f32 %v3699_v17, %v2080_v6  ;;  %v2682_v23 = vpop.f32.mrf.mxu0 }
 0x1ca   : > { %v2835_v18 = vmul.f32 %v5031_v4, %v2796_v13  ;;  %v2387_v9 = vpop.f32.mrf.mxu1  ;;  %v2082_v27 = vadd.f32 %v4932_v34, %v1771_v31  ;;  %v2087_v13 = vadd.f32 %v4936_v40, %v1776_v47  ;;  %v5320_v47 = vld [vmem:[#allocation18_spill] sm:$0xff] }
 0x1cb   : > { %2935 = vst [vmem:[%s5057_s23 + $0x18] sm:$0xff] %v2903_v14  ;;  %v2901_v7 = vmax.f32 %v2869_v54, 0.0  ;;  %v2833_v59 = vmul.f32 %v5031_v4, %v2794_v1  ;;  %v2797_v35 = vadd.f32 %v3733_v45, %v2502_v37  ;;  %v2500_v49 = vadd.f32 %v2387_v9, %v2078_v61  ;;  %v3736_v12 = vpop.f32.mrf.mxu0 }
 0x1cc   : > { %v2874_v62 = vadd.f32 %v5041_v20, %v2835_v18  ;;  %v3702_v36 = vpop.f32.mrf.mxu1  ;;  %v2085_v37 = vadd.f32 %v4940_v63, %v1774_v38 }
 0x1cd   : > { %2933 = vst [vmem:[%s5057_s23 + $0x8] sm:$0xff] %v2901_v7  ;;  %v2872_v53 = vadd.f32 %v5041_v20, %v2833_v59  ;;  %v2836_v32 = vmul.f32 %v5031_v4, %v2797_v35  ;;  %v2795_v19 = vadd.f32 %v2682_v23, %v2500_v49  ;;  %v2505_v55 = vadd.f32 %v3702_v36, %v2083_v57  ;;  %v2695_v48 = vpop.f32.mrf.mxu0 }
 0x1ce   : > { %v2906_v60 = vmax.f32 %v2874_v62, 0.0  ;;  %v2400_v50 = vpop.f32.mrf.mxu1  ;;  %v1777_v23 = vadd.f32 %v4946_v24, %v4839_v33  ;;  %v1775_v57 = vadd.f32 %v4950_v11, %v4842_v30  ;;  %v1780_v35 = vadd.f32 %v4954_v22, %v4845_v52 }
 0x1cf   : > { %v2904_v6 = vmax.f32 %v2872_v53, 0.0  ;;  %v2875_v58 = vadd.f32 %v5041_v20, %v2836_v32  ;;  %v2834_v8 = vmul.f32 %v5031_v4, %v2795_v19  ;;  %v2800_v39 = vadd.f32 %v3736_v12, %v2505_v55  ;;  %v3737_v5 = vpop.f32.mrf.mxu0 }
 0x1d0   : > { %2938 = vst [vmem:[%s5057_s23 + $0x30] sm:$0xff] %v2906_v60  ;;  %v2503_v43 = vadd.f32 %v2400_v50, %v2081_v42  ;;  %v3703_v0 = vpop.f32.mrf.mxu1  ;;  %v2088_v31 = vadd.f32 %v4944_v15, %v1777_v23  ;;  %v2086_v62 = vadd.f32 %v4948_v28, %v1775_v57  ;;  %v1778_v52 = vadd.f32 %v4958_v41, %v4848_v16 }
 0x1d1   : > { %2936 = vst [vmem:[%s5057_s23 + $0x20] sm:$0xff] %v2904_v6  ;;  %v2907_v2 = vmax.f32 %v2875_v58, 0.0  ;;  %v2873_v3 = vadd.f32 %v5041_v20, %v2834_v8  ;;  %v2839_v51 = vmul.f32 %v5031_v4, %v2800_v39  ;;  %v2506_v45 = vadd.f32 %v3703_v0, %v2084_v26  ;;  %v2698_v61 = vpop.f32.mrf.mxu0  ;;  %v5319_v26 = vld [vmem:[#allocation4_spill] sm:$0xff] }
 0x1d2   : > { %v2798_v17 = vadd.f32 %v2695_v48, %v2503_v43  ;;  %v2403_v14 = vpop.f32.mrf.mxu1  ;;  %v2091_v42 = vadd.f32 %v4952_v21, %v1780_v35  ;;  %v1781_v15 = vadd.f32 %v5320_v47, %v5319_v26  ;;  %v5321_v8 = vld [vmem:[#allocation16_spill] sm:$0xff]  ;;  %v5334_v26 = vld [vmem:[#allocation10_spill] sm:$0xff] }
 0x1d3   : > { %2939 = vst [vmem:[%s5057_s23 + $0x38] sm:$0xff] %v2907_v2  ;;  %v2905_v34 = vmax.f32 %v2873_v3, 0.0  ;;  %v2878_v10 = vadd.f32 %v5041_v20, %v2839_v51  ;;  %v2801_v25 = vadd.f32 %v3737_v5, %v2506_v45  ;;  %v2504_v54 = vadd.f32 %v2403_v14, %v2082_v27  ;;  %v3740_v1 = vpop.f32.mrf.mxu0  ;;  %v5322_v3 = vld [vmem:[#allocation17_spill] sm:$0xff]  ;;  %v5323_v45 = vld [vmem:[#allocation2_spill] sm:$0xff]  ;;  %v5335_v47 = vld [vmem:[#allocation28_spill] sm:$0xff] }
 0x1d4   : > { %v2837_v40 = vmul.f32 %v5031_v4, %v2798_v17  ;;  %v3706_v29 = vpop.f32.mrf.mxu1  ;;  %v2089_v39 = vadd.f32 %v5321_v8, %v1778_v52  ;;  %v2092_v51 = vadd.f32 %v5322_v3, %v1781_v15  ;;  %v5325_v17 = vld [vmem:[#allocation3_spill] sm:$0xff]  ;;  %v5326_v14 = vld [vmem:[#allocation22_spill] sm:$0xff]  ;;  %v1783_v15 = vadd.f32 %v5335_v47, %v5334_v26  ;;  %v5336_v8 = vld [vmem:[#allocation25_spill] sm:$0xff] }
 0x1d5   : > { %2937 = vst [vmem:[%s5057_s23 + $0x28] sm:$0xff] %v2905_v34  ;;  %v2910_v44 = vmax.f32 %v2878_v10, 0.0  ;;  %v2840_v18 = vmul.f32 %v5031_v4, %v2801_v25  ;;  %v2799_v9 = vadd.f32 %v2698_v61, %v2504_v54  ;;  %v2509_v7 = vadd.f32 %v3706_v29, %v2087_v13  ;;  %v2711_v59 = vpop.f32.mrf.mxu0  ;;  %v5324_v61 = vld [vmem:[#allocation20_spill] sm:$0xff]  ;;  %v5337_v3 = vld [vmem:[#allocation27_spill] sm:$0xff] }
 0x1d6   : > { %v2876_v63 = vadd.f32 %v5041_v20, %v2837_v40  ;;  %v2416_v49 = vpop.f32.mrf.mxu1  ;;  %v1779_v13 = vadd.f32 %v5324_v61, %v5323_v45  ;;  %v1784_v34 = vadd.f32 %v5326_v14, %v5325_v17  ;;  %v5327_v40 = vld [vmem:[#allocation5_spill] sm:$0xff]  ;;  %v5328_v29 = vld [vmem:[#allocation24_spill] sm:$0xff]  ;;  %v5338_v45 = vld [vmem:[#allocation6_spill] sm:$0xff] }
 0x1d7   : > { %2942 = vst [vmem:[%s5057_s23 + $0x50] sm:$0xff] %v2910_v44  ;;  %v2879_v33 = vadd.f32 %v5041_v20, %v2840_v18  ;;  %v2838_v30 = vmul.f32 %v5031_v4, %v2799_v9  ;;  %v2804_v24 = vadd.f32 %v3740_v1, %v2509_v7  ;;  %v2507_v11 = vadd.f32 %v2416_v49, %v2085_v37  ;;  %v3741_v12 = vpop.f32.mrf.mxu0  ;;  %v5340_v17 = vld [vmem:[#allocation31_spill] sm:$0xff] }
 0x1d8   : > { %v2908_v22 = vmax.f32 %v2876_v63, 0.0  ;;  %v3707_v36 = vpop.f32.mrf.mxu1  ;;  %v1782_v44 = vadd.f32 %v5328_v29, %v5327_v40  ;;  %v1788_v61 = vadd.f32 %v4986_v46, %v5338_v45  ;;  %v5342_v40 = vld [vmem:[#allocation33_spill] sm:$0xff] }
 0x1d9   : > { %v2911_v53 = vmax.f32 %v2879_v33, 0.0  ;;  %v2877_v32 = vadd.f32 %v5041_v20, %v2838_v30  ;;  %v2843_v19 = vmul.f32 %v5031_v4, %v2804_v24  ;;  %v2802_v55 = vadd.f32 %v2711_v59, %v2507_v11  ;;  %v2714_v48 = vpop.f32.mrf.mxu0  ;;  %v5329_v33 = vld [vmem:[#allocation19_spill] sm:$0xff]  ;;  %v5330_v24 = vld [vmem:[#allocation21_spill] sm:$0xff] }
 0x1da   : > { %2940 = vst [vmem:[%s5057_s23 + $0x40] sm:$0xff] %v2908_v22  ;;  %v2510_v28 = vadd.f32 %v3707_v36, %v2088_v31  ;;  %v2419_v60 = vpop.f32.mrf.mxu1  ;;  %v2090_v30 = vadd.f32 %v5329_v33, %v1779_v13  ;;  %v2095_v11 = vadd.f32 %v5330_v24, %v1784_v34  ;;  %v5332_v31 = vld [vmem:[#allocation26_spill] sm:$0xff]  ;;  %v5339_v13 = vld [vmem:[#allocation7_spill] sm:$0xff] }
 0x1db   : > { %2943 = vst [vmem:[%s5057_s23 + $0x58] sm:$0xff] %v2911_v53  ;;  %v2909_v16 = vmax.f32 %v2877_v32, 0.0  ;;  %v2882_v41 = vadd.f32 %v5041_v20, %v2843_v19  ;;  %v2841_v50 = vmul.f32 %v5031_v4, %v2802_v55  ;;  %v2508_v6 = vadd.f32 %v2419_v60, %v2086_v62  ;;  %v3744_v58 = vpop.f32.mrf.mxu0  ;;  %v5344_v33 = vld [vmem:[#allocation30_spill] sm:$0xff]  ;;  %v5345_v24 = vld [vmem:[#allocation11_spill] sm:$0xff] }
 0x1dc   : > { %v2805_v5 = vadd.f32 %v3741_v12, %v2510_v28  ;;  %v3710_v27 = vpop.f32.mrf.mxu1  ;;  %v5331_v12 = vld [vmem:[#allocation9_spill] sm:$0xff]  ;;  %v1786_v14 = vadd.f32 %v5340_v17, %v5339_v13 }
 0x1dd   : > { %2941 = vst [vmem:[%s5057_s23 + $0x48] sm:$0xff] %v2909_v16  ;;  %v2914_v21 = vmax.f32 %v2882_v41, 0.0  ;;  %v2880_v38 = vadd.f32 %v5041_v20, %v2841_v50  ;;  %v2803_v43 = vadd.f32 %v2714_v48, %v2508_v6  ;;  %v2513_v0 = vadd.f32 %v3710_v27, %v2091_v42  ;;  %v2727_v2 = vpop.f32.mrf.mxu0  ;;  %v5333_v48 = vld [vmem:[#allocation23_spill] sm:$0xff] }
 0x1de   : > { %v2844_v10 = vmul.f32 %v5031_v4, %v2805_v5  ;;  %v2432_v25 = vpop.f32.mrf.mxu1  ;;  %v1785_v62 = vadd.f32 %v5332_v31, %v5331_v12  ;;  %v2093_v42 = vadd.f32 %v5333_v48, %v1782_v44  ;;  %v5348_v48 = vld [vmem:[#allocation12_spill] sm:$0xff] }
 0x1df   : > { %2946 = vst [vmem:[%s5057_s23 + $0x70] sm:$0xff] %v2914_v21  ;;  %v2912_v54 = vmax.f32 %v2880_v38, 0.0  ;;  %v2842_v1 = vmul.f32 %v5031_v4, %v2803_v43  ;;  %v2808_v37 = vadd.f32 %v3744_v58, %v2513_v0  ;;  %v2511_v23 = vadd.f32 %v2432_v25, %v2089_v39  ;;  %v3745_v57 = vpop.f32.mrf.mxu0 }
 0x1e0   : > { %v2883_v18 = vadd.f32 %v5041_v20, %v2844_v10  ;;  %v3711_v9 = vpop.f32.mrf.mxu1  ;;  %v2096_v39 = vadd.f32 %v5336_v8, %v1785_v62 }
 0x1e1   : > { %2944 = vst [vmem:[%s5057_s23 + $0x60] sm:$0xff] %v2912_v54  ;;  %v2881_v7 = vadd.f32 %v5041_v20, %v2842_v1  ;;  %v2847_v59 = vmul.f32 %v5031_v4, %v2808_v37  ;;  %v2806_v35 = vadd.f32 %v2727_v2, %v2511_v23  ;;  %v2514_v63 = vadd.f32 %v3711_v9, %v2092_v51  ;;  %v2730_v49 = vpop.f32.mrf.mxu0 }
 0x1e2   : > { %v2915_v52 = vmax.f32 %v2883_v18, 0.0  ;;  %v2435_v22 = vpop.f32.mrf.mxu1  ;;  %v2094_v51 = vadd.f32 %v5337_v3, %v1783_v15  ;;  %v5352_v3 = vld [vmem:[#allocation13_spill] sm:$0xff] }
 0x1e3   : > { %v2913_v36 = vmax.f32 %v2881_v7, 0.0  ;;  %v2886_v53 = vadd.f32 %v5041_v20, %v2847_v59  ;;  %v2845_v32 = vmul.f32 %v5031_v4, %v2806_v35  ;;  %v2809_v19 = vadd.f32 %v3745_v57, %v2514_v63  ;;  %v3748_v55 = vpop.f32.mrf.mxu0  ;;  %v5341_v57 = vld [vmem:[#allocation8_spill] sm:$0xff]  ;;  %v5343_v63 = vld [vmem:[#allocation29_spill] sm:$0xff] }
 0x1e4   : > { %2947 = vst [vmem:[%s5057_s23 + $0x78] sm:$0xff] %v2915_v52  ;;  %v2512_v28 = vadd.f32 %v2435_v22, %v2090_v30  ;;  %v3714_v60 = vpop.f32.mrf.mxu1  ;;  %v1789_v29 = vadd.f32 %v5342_v40, %v5341_v57  ;;  %v2097_v30 = vadd.f32 %v5344_v33, %v1786_v14 }
 0x1e5   : > { %2945 = vst [vmem:[%s5057_s23 + $0x68] sm:$0xff] %v2913_v36  ;;  %v2918_v16 = vmax.f32 %v2886_v53, 0.0  ;;  %v2884_v41 = vadd.f32 %v5041_v20, %v2845_v32  ;;  %v2848_v50 = vmul.f32 %v5031_v4, %v2809_v19  ;;  %v2517_v6 = vadd.f32 %v3714_v60, %v2095_v11  ;;  %v2743_v58 = vpop.f32.mrf.mxu0  ;;  %v5346_v11 = vld [vmem:[#allocation35_spill] sm:$0xff]  ;;  %v5347_v19 = vld [vmem:[#allocation32_spill] sm:$0xff] }
 0x1e6   : > { %v2807_v5 = vadd.f32 %v2730_v49, %v2512_v28  ;;  %v2448_v27 = vpop.f32.mrf.mxu1  ;;  %v2099_v49 = vadd.f32 %v5343_v63, %v1788_v61  ;;  %v1787_v12 = vadd.f32 %v5346_v11, %v5345_v24  ;;  %v5354_v61 = vld [vmem:[#allocation14_spill] sm:$0xff] }
 0x1e7   : > { %2950 = vst [vmem:[%s5057_s23 + $0x90] sm:$0xff] %v2918_v16  ;;  %v2916_v21 = vmax.f32 %v2884_v41, 0.0  ;;  %v2887_v38 = vadd.f32 %v5041_v20, %v2848_v50  ;;  %v2812_v43 = vadd.f32 %v3748_v55, %v2517_v6  ;;  %v2515_v0 = vadd.f32 %v2448_v27, %v2093_v42  ;;  %v3749_v2 = vpop.f32.mrf.mxu0  ;;  %v5349_v42 = vld [vmem:[#allocation37_spill] sm:$0xff]  ;;  %v5350_v6 = vld [vmem:[#allocation34_spill] sm:$0xff] }
 0x1e8   : > { %v2846_v34 = vmul.f32 %v5031_v4, %v2807_v5  ;;  %v3715_v10 = vpop.f32.mrf.mxu1  ;;  %v2100_v55 = vadd.f32 %v5347_v19, %v1789_v29  ;;  %v1792_v26 = vadd.f32 %v5349_v42, %v5348_v48  ;;  %v1793_v13 = vadd.f32 %v5013_v56, %v5354_v61 }
 0x1e9   : > { %2948 = vst [vmem:[%s5057_s23 + $0x80] sm:$0xff] %v2916_v21  ;;  %v2919_v25 = vmax.f32 %v2887_v38, 0.0  ;;  %v2851_v54 = vmul.f32 %v5031_v4, %v2812_v43  ;;  %v2810_v1 = vadd.f32 %v2743_v58, %v2515_v0  ;;  %v2518_v37 = vadd.f32 %v3715_v10, %v2096_v39  ;;  %v2746_v23 = vpop.f32.mrf.mxu0  ;;  %v5351_v0 = vld [vmem:[#allocation36_spill] sm:$0xff] }
 0x1ea   : > { %v2885_v44 = vadd.f32 %v5041_v20, %v2846_v34  ;;  %v2451_v18 = vpop.f32.mrf.mxu1  ;;  %v2098_v58 = vadd.f32 %v5350_v6, %v1787_v12 }
 0x1eb   : > { %2951 = vst [vmem:[%s5057_s23 + $0x98] sm:$0xff] %v2919_v25  ;;  %v2890_v46 = vadd.f32 %v5041_v20, %v2851_v54  ;;  %v2849_v9 = vmul.f32 %v5031_v4, %v2810_v1  ;;  %v2813_v7 = vadd.f32 %v3749_v2, %v2518_v37  ;;  %v2516_v59 = vadd.f32 %v2451_v18, %v2094_v51  ;;  %v3752_v35 = vpop.f32.mrf.mxu0  ;;  %v5353_v51 = vld [vmem:[#allocation39_spill] sm:$0xff] }
 0x1ec   : > { %v2917_v31 = vmax.f32 %v2885_v44, 0.0  ;;  %v3718_v62 = vpop.f32.mrf.mxu1  ;;  %v2103_v2 = vadd.f32 %v5351_v0, %v1792_v26  ;;  %v1790_v45 = vadd.f32 %v5353_v51, %v5352_v3  ;;  %v5355_v37 = vld [vmem:[#allocation15_spill] sm:$0xff] }
 0x1ed   : > { %v2922_v52 = vmax.f32 %v2890_v46, 0.0  ;;  %v2888_v22 = vadd.f32 %v5041_v20, %v2849_v9  ;;  %v2852_v36 = vmul.f32 %v5031_v4, %v2813_v7  ;;  %v2811_v53 = vadd.f32 %v2746_v23, %v2516_v59  ;;  %v2759_v32 = vpop.f32.mrf.mxu0  ;;  %v5356_v23 = vld [vmem:[#allocation42_spill] sm:$0xff] }
 0x1ee   : > { %2949 = vst [vmem:[%s5057_s23 + $0x88] sm:$0xff] %v2917_v31  ;;  %v2521_v47 = vadd.f32 %v3718_v62, %v2099_v49  ;;  %v2464_v15 = vpop.f32.mrf.mxu1  ;;  %v1791_v57 = vadd.f32 %v5356_v23, %v5355_v37  ;;  %v5357_v7 = vld [vmem:[#allocation38_spill] sm:$0xff]  ;;  %v5359_v31 = vld [vmem:[#allocation41_spill] sm:$0xff] }
 0x1ef   : > { %2954 = vst [vmem:[%s5057_s23 + $0xb0] sm:$0xff] %v2922_v52  ;;  %v2920_v28 = vmax.f32 %v2888_v22, 0.0  ;;  %v2891_v60 = vadd.f32 %v5041_v20, %v2852_v36  ;;  %v2850_v16 = vmul.f32 %v5031_v4, %v2811_v53  ;;  %v2519_v41 = vadd.f32 %v2464_v15, %v2097_v30  ;;  %v3753_v50 = vpop.f32.mrf.mxu0 }
 0x1f0   : > { %v2816_v8 = vadd.f32 %v3752_v35, %v2521_v47  ;;  %v3719_v39 = vpop.f32.mrf.mxu1  ;;  %v2101_v59 = vadd.f32 %v5357_v7, %v1790_v45  ;;  %v5358_v35 = vld [vmem:[#allocation40_spill] sm:$0xff]  ;;  %v2102_v62 = vadd.f32 %v5359_v31, %v1791_v57 }
 0x1f1   : > { %2952 = vst [vmem:[%s5057_s23 + $0xa0] sm:$0xff] %v2920_v28  ;;  %v2923_v5 = vmax.f32 %v2891_v60, 0.0  ;;  %v2889_v27 = vadd.f32 %v5041_v20, %v2850_v16  ;;  %v2814_v21 = vadd.f32 %v2759_v32, %v2519_v41  ;;  %v2522_v38 = vadd.f32 %v3719_v39, %v2100_v55  ;;  %v2762_v43 = vpop.f32.mrf.mxu0 }
 0x1f2   : > { %v2855_v17 = vmul.f32 %v5031_v4, %v2816_v8  ;;  %v2467_v14 = vpop.f32.mrf.mxu1  ;;  %v2104_v63 = vadd.f32 %v5358_v35, %v1793_v13 }
 0x1f3   : > { %2955 = vst [vmem:[%s5057_s23 + $0xb8] sm:$0xff] %v2923_v5  ;;  %v2921_v34 = vmax.f32 %v2889_v27, 0.0  ;;  %v2853_v10 = vmul.f32 %v5031_v4, %v2814_v21  ;;  %v2817_v25 = vadd.f32 %v3753_v50, %v2522_v38  ;;  %v2520_v54 = vadd.f32 %v2467_v14, %v2098_v58  ;;  %v3756_v1 = vpop.f32.mrf.mxu0 }
 0x1f4   : > { %v2894_v40 = vadd.f32 %v5041_v20, %v2855_v17  ;;  %v3722_v29 = vpop.f32.mrf.mxu1 }
 0x1f5   : > { %2953 = vst [vmem:[%s5057_s23 + $0xa8] sm:$0xff] %v2921_v34  ;;  %v2892_v56 = vadd.f32 %v5041_v20, %v2853_v10  ;;  %v2856_v44 = vmul.f32 %v5031_v4, %v2817_v25  ;;  %v2815_v18 = vadd.f32 %v2762_v43, %v2520_v54  ;;  %v2525_v46 = vadd.f32 %v3722_v29, %v2103_v2  ;;  %v2775_v9 = vpop.f32.mrf.mxu0 }
 0x1f6   : > { %v2926_v49 = vmax.f32 %v2894_v40, 0.0  ;;  %v2480_v33 = vpop.f32.mrf.mxu1 }
 0x1f7   : > { %v2924_v30 = vmax.f32 %v2892_v56, 0.0  ;;  %v2895_v24 = vadd.f32 %v5041_v20, %v2856_v44  ;;  %v2854_v11 = vmul.f32 %v5031_v4, %v2815_v18  ;;  %v2820_v12 = vadd.f32 %v3756_v1, %v2525_v46  ;;  %v3757_v36 = vpop.f32.mrf.mxu0 }
 0x1f8   : > { %2958 = vst [vmem:[%s5057_s23 + $0xd0] sm:$0xff] %v2926_v49  ;;  %v2523_v52 = vadd.f32 %v2480_v33, %v2101_v59  ;;  %v3723_v22 = vpop.f32.mrf.mxu1 }
 0x1f9   : > { %2956 = vst [vmem:[%s5057_s23 + $0xc0] sm:$0xff] %v2924_v30  ;;  %v2927_v53 = vmax.f32 %v2895_v24, 0.0  ;;  %v2893_v32 = vadd.f32 %v5041_v20, %v2854_v11  ;;  %v2859_v19 = vmul.f32 %v5031_v4, %v2820_v12  ;;  %v2526_v55 = vadd.f32 %v3723_v22, %v2104_v63  ;;  %v2778_v16 = vpop.f32.mrf.mxu0 }
 0x1fa   : > { %v2818_v48 = vadd.f32 %v2775_v9, %v2523_v52  ;;  %v2483_v42 = vpop.f32.mrf.mxu1 }
 0x1fb   : > { %2959 = vst [vmem:[%s5057_s23 + $0xd8] sm:$0xff] %v2927_v53  ;;  %v2925_v26 = vmax.f32 %v2893_v32, 0.0  ;;  %v2898_v47 = vadd.f32 %v5041_v20, %v2859_v19  ;;  %v2821_v15 = vadd.f32 %v3757_v36, %v2526_v55  ;;  %v2524_v28 = vadd.f32 %v2483_v42, %v2102_v62 }
 0x1fc   : > { %v2857_v60 = vmul.f32 %v5031_v4, %v2818_v48 }
 0x1fd   : > { %2957 = vst [vmem:[%s5057_s23 + $0xc8] sm:$0xff] %v2925_v26  ;;  %v2930_v41 = vmax.f32 %v2898_v47, 0.0  ;;  %v2860_v50 = vmul.f32 %v5031_v4, %v2821_v15  ;;  %v2819_v6 = vadd.f32 %v2778_v16, %v2524_v28 }
 0x1fe   : > { %v2896_v58 = vadd.f32 %v5041_v20, %v2857_v60 }
 0x1ff   : > { %2962 = vst [vmem:[%s5057_s23 + $0xf0] sm:$0xff] %v2930_v41  ;;  %v2899_v8 = vadd.f32 %v5041_v20, %v2860_v50  ;;  %v2858_v39 = vmul.f32 %v5031_v4, %v2819_v6 }
 0x200   : > { %v2928_v5 = vmax.f32 %v2896_v58, 0.0 }
 0x201   : > { %v2931_v27 = vmax.f32 %v2899_v8, 0.0  ;;  %v2897_v21 = vadd.f32 %v5041_v20, %v2858_v39 }
 0x202   : > { %2960 = vst [vmem:[%s5057_s23 + $0xe0] sm:$0xff] %v2928_v5 }
 0x203   : > { %2963 = vst [vmem:[%s5057_s23 + $0xf8] sm:$0xff] %v2931_v27  ;;  %v2929_v38 = vmax.f32 %v2897_v21, 0.0 }
 0x205   : > { %2961 = vst [vmem:[%s5057_s23 + $0xe8] sm:$0xff] %v2929_v38 }
 0x206 PF: > { %s14_s15 = sadd.s32 1, %s3776_s15  }
 0x207   : > { %p11_p5 = scmp.ge.s32.totalorder %s14_s15, 4  }
 0x209   :  { %13 = sbr.rel (!%p11_p5) target bundleno = 1 (0x1), region = 77 }

// kernel: encoder_forward_pallas.5
= control target key start
LH: loop header
LB: loop body
LE: loop exit
PB: predicated region body
PF: predicated region fallthrough
CT: control target
= control target key end

     0   :  { %s2425_s15 = smov 0   ;;  %s2835_s0 = inlined_call_operand.vmem [shape: f32[8,9,9,128], index: 0, kind: input, shape index: {}]   ;;  %s2836_s1 = inlined_call_operand.vmem [shape: bf16[9,128,128], index: 1, kind: input, shape index: {}]   ;;  %s2837_s2 = inlined_call_operand.vmem [shape: f32[1,128], index: 2, kind: input, shape index: {}]   ;;  %s2838_s3 = inlined_call_operand.vmem [shape: f32[1,128], index: 3, kind: input, shape index: {}]   ;;  %s2839_s4 = inlined_call_operand.vmem [shape: f32[128,128], index: 4, kind: output, shape index: {}]  }
   0x1 LB: > { %s1725_s16 = sadd.s32 4294967295, %s2398_s15   ;;  %p1729_p0 = scmp.ge.s32.totalorder %s2398_s15, 1  ;;  %s2398_s15 = sphi %s2425_s15, %s14_s15  }
   0x2   : > { %p164_p1 = scmp.lt.s32.totalorder %s2398_s15, 3 }
   0x4   : > { %p165_p2 = pnand %p1729_p0, %p164_p1 }
   0x6   : > { %168 = sbr.rel (%p165_p2) target bundleno = 381 (0x17d), region = 36 }
   0xb   : > { %v2320_v0 = vld [vmem:[%s2836_s1 + $0xb8] sm:$0xff]   ;;  %s1730_s19 = sshll.u32 %s1725_s16, 2  ;;  %v2322_v2 = vld [vmem:[%s2836_s1 + $0xb0] sm:$0xff]   ;;  %v2324_v4 = vld [vmem:[%s2836_s1 + $0xa8] sm:$0xff]   ;;  %vm259_vm0 = vcmask 1046528  }
   0xc   : > { %v2321_v1 = vld [vmem:[%s2836_s1 + $0x38] sm:$0xff]   ;;  %p192_p3 = scmp.lt.s32.totalorder %s1730_s19, 7  ;;  %2079 = vmatprep.subr.bf16.mxu0 %v2320_v0  ;;  %v2323_v3 = vld [vmem:[%s2836_s1 + $0x30] sm:$0xff]   ;;  %v2325_v5 = vld [vmem:[%s2836_s1 + $0x28] sm:$0xff]  }
   0xd   : > { %2103 = vmatprep.subr.bf16.mxu1 %v2321_v1  ;;  %2080 = vmatpush3.bf16.msra.mxu0 %v2320_v0  ;;  %v2326_v6 = vld [vmem:[%s2836_s1 + $0xa0] sm:$0xff]   ;;  %v2328_v8 = vld [vmem:[%s2836_s1 + $0x98] sm:$0xff]   ;;  %v2330_v10 = vld [vmem:[%s2836_s1 + $0x90] sm:$0xff]  }
   0xe   : > { %2104 = vmatpush3.bf16.msra.mxu1 %v2321_v1  ;;  %2081 = vmatprep.subr.bf16.mxu0 %v2322_v2  ;;  %s2853_s19 = smov (!%p192_p3, %s1730_s19), 7  ;;  %v2327_v7 = vld [vmem:[%s2836_s1 + $0x20] sm:$0xff]   ;;  %v2329_v9 = vld [vmem:[%s2836_s1 + $0x18] sm:$0xff]   ;;  %v2331_v14 = vld [vmem:[%s2836_s1 + $0x10] sm:$0xff]  }
   0xf   : > { %2105 = vmatprep.subr.bf16.mxu1 %v2323_v3  ;;  %s2311_s8 = smul.u32 144, %s2853_s19  ;;  %v2332_v18 = vld [vmem:[%s2836_s1 + $0x88] sm:$0xff]   ;;  %v2334_v34 = vld [vmem:[%s2836_s1 + $0x80] sm:$0xff]   ;;  %v2336_v38 = vld [vmem:[%s2836_s1 + $0x1b8] sm:$0xff]  }
  0x10   : > { %v2333_v23 = vld [vmem:[%s2836_s1 + $0x8] sm:$0xff]   ;;  %v2335_v35 = vld [vmem:[%s2836_s1] sm:$0xff]   ;;  %v2337_v39 = vld [vmem:[%s2836_s1 + $0x238] sm:$0xff]  }
  0x11   : > { %2082 = vmatpush3.bf16.msra.mxu0 %v2322_v2  ;;  %s2468_s17 = scalar_lea.vmem %s2835_s0, %s2311_s8  ;;  %v2338_v43 = vld [vmem:[%s2836_s1 + $0x1b0] sm:$0xff]   ;;  %v2340_v2 = vld [vmem:[%s2836_s1 + $0x1a8] sm:$0xff]  }
  0x12   : > { %2106 = vmatpush3.bf16.msra.mxu1 %v2323_v3  ;;  %2083 = vmatprep.subr.bf16.mxu0 %v2324_v4  ;;  %v205_v11 = vld [vmem:[%s2468_s17] sm:$0xff]  ;;  %v206_v12 = vld [vmem:[%s2468_s17 + $0x8] sm:$0x1]  ;;  %v2476_v13 = vld [vmem:[%s2468_s17 + $0x10] sm:$0xff] }
  0x13   : > { %2107 = vmatprep.subr.bf16.mxu1 %v2325_v5  ;;  %v208_v15 = vld [vmem:[%s2468_s17 + $0x18] sm:$0x1]  ;;  %v260_v16 = vrot.slane %v205_v11, 1  ;;  %v223_v17 = vpack.c.bf16 %v2476_v13, %v205_v11  ;;  %v2487_v19 = vld [vmem:[%s2468_s17 + $0x20] sm:$0xff]  ;;  %v261_v20 = vrot.slane %v206_v12, 1  ;;  %v263_v21 = vrot.slane %v2476_v13, 1 }
  0x14   : > { %v264_v22 = vrot.slane %v208_v15, 1  ;;  %v210_v24 = vld [vmem:[%s2468_s17 + $0x28] sm:$0x1]  ;;  %v2495_v25 = vld [vmem:[%s2468_s17 + $0x30] sm:$0xff]  ;;  %v212_v28 = vld [vmem:[%s2468_s17 + $0x38] sm:$0x1] }
  0x15   : > { %2084 = vmatpush3.bf16.msra.mxu0 %v2324_v4  ;;  %2119 = vmatprep.mubr.bf16.mxu1 %v223_v17  ;;  %v262_v26 = vsel %vm259_vm0, %v260_v16, %v261_v20  ;;  %v266_v30 = vrot.slane %v2487_v19, 1  ;;  %v267_v31 = vrot.slane %v210_v24, 1  ;;  %v269_v32 = vrot.slane %v2495_v25, 1  ;;  %v2524_v40 = vld [vmem:[%s2468_s17 + $0x40] sm:$0xff]  ;;  %v214_v41 = vld [vmem:[%s2468_s17 + $0x48] sm:$0x1] }
  0x16   : > { %2108 = vmatpush3.bf16.msra.mxu1 %v2325_v5  ;;  %2085 = vmatprep.subr.bf16.mxu0 %v2326_v6  ;;  %v2499_v27 = vsel %vm259_vm0, %v263_v21, %v264_v22  ;;  %v270_v33 = vrot.slane %v212_v28, 1  ;;  %v2533_v44 = vld [vmem:[%s2468_s17 + $0x50] sm:$0xff]  ;;  %v216_v45 = vld [vmem:[%s2468_s17 + $0x58] sm:$0x1]  ;;  %v272_v46 = vrot.slane %v2524_v40, 1  ;;  %v273_v47 = vrot.slane %v214_v41, 1 }
  0x17   : > { %2109 = vmatprep.subr.bf16.mxu1 %v2327_v7  ;;  %v292_v29 = vpack.c.bf16 %v2499_v27, %v262_v26  ;;  %v2512_v36 = vsel %vm259_vm0, %v266_v30, %v267_v31  ;;  %v2538_v48 = vld [vmem:[%s2468_s17 + $0x60] sm:$0xff]  ;;  %v224_v49 = vpack.c.bf16 %v2495_v25, %v2487_v19  ;;  %v275_v50 = vrot.slane %v2533_v44, 1  ;;  %v218_v52 = vld [vmem:[%s2468_s17 + $0x68] sm:$0x1]  ;;  %v2545_v53 = vld [vmem:[%s2468_s17 + $0x70] sm:$0xff] }
  0x18   : > { %v2515_v37 = vsel %vm259_vm0, %v269_v32, %v270_v33  ;;  %v276_v51 = vrot.slane %v216_v45, 1  ;;  %v278_v54 = vrot.slane %v2538_v48, 1  ;;  %v2549_v55 = vsel %vm259_vm0, %v272_v46, %v273_v47  ;;  %v220_v56 = vld [vmem:[%s2468_s17 + $0x78] sm:$0x1]  ;;  %v2339_v59 = vld [vmem:[%s2836_s1 + $0x230] sm:$0xff]   ;;  %v2341_v3 = vld [vmem:[%s2836_s1 + $0x228] sm:$0xff]  }
  0x19   : > { %2086 = vmatpush3.bf16.msra.mxu0 %v2326_v6  ;;  %2095 = vmatprep.mubr.bf16.mxu0 %v292_v29  ;;  %v293_v42 = vpack.c.bf16 %v2515_v37, %v2512_v36  ;;  %v279_v57 = vrot.slane %v218_v52, 1  ;;  %v281_v58 = vrot.slane %v2545_v53, 1  ;;  %v282_v61 = vrot.slane %v220_v56, 1  ;;  %v2342_v6 = vld [vmem:[%s2836_s1 + $0x1a0] sm:$0xff]   ;;  %v2345_v11 = vld [vmem:[%s2836_s1 + $0x218] sm:$0xff]   ;;  %v2346_v12 = vld [vmem:[%s2836_s1 + $0x190] sm:$0xff]  }
  0x1a   : > { %2110 = vmatpush3.bf16.msra.mxu1 %v2327_v7  ;;  %2087 = vmatprep.subr.bf16.mxu0 %v2328_v8  ;;  %v2557_v60 = vsel %vm259_vm0, %v275_v50, %v276_v51  ;;  %v225_v63 = vpack.c.bf16 %v2533_v44, %v2524_v40  ;;  %v226_v5 = vpack.c.bf16 %v2545_v53, %v2538_v48  ;;  %v2343_v7 = vld [vmem:[%s2836_s1 + $0x220] sm:$0xff]   ;;  %v2349_v15 = vld [vmem:[%s2836_s1 + $0x208] sm:$0xff]   ;;  %v2354_v24 = vld [vmem:[%s2836_s1 + $0x70] sm:$0xff]  }
  0x1b   : > { %2111 = vmatprep.subr.bf16.mxu1 %v2329_v9  ;;  %v294_v62 = vpack.c.bf16 %v2557_v60, %v2549_v55  ;;  %v2564_v0 = vsel %vm259_vm0, %v278_v54, %v279_v57  ;;  %v2567_v1 = vsel %vm259_vm0, %v281_v58, %v282_v61  ;;  %v2350_v16 = vld [vmem:[%s2836_s1 + $0x180] sm:$0xff]   ;;  %v222_v21 = vld [vmem:[%s2468_s17 + $0x88] sm:$0x1]  ;;  %v540_v22 = vpack.c.bf16 %v2524_v40, %v2495_v25  ;;  %v2355_v28 = vld [vmem:[%s2836_s1 + $0x1f0] sm:$0xff]  }
  0x1c   : > { %v295_v4 = vpack.c.bf16 %v2567_v1, %v2564_v0  ;;  %v2351_v17 = vld [vmem:[%s2836_s1 + $0x200] sm:$0xff]   ;;  %v541_v25 = vpack.c.bf16 %v2538_v48, %v2533_v44  ;;  %v689_v29 = vpack.c.bf16 %v2564_v0, %v2557_v60  ;;  %v2356_v30 = vld [vmem:[%s2836_s1 + $0x68] sm:$0xff]   ;;  %v1814_v33 = vld [vmem:[%s2468_s17 + $0x90] sm:$0xff] }
  0x1d   : > { %2088 = vmatpush3.bf16.msra.mxu0 %v2328_v8  ;;  %v539_v8 = vpack.c.bf16 %v2487_v19, %v2476_v13  ;;  %v2347_v13 = vld [vmem:[%s2836_s1 + $0x210] sm:$0xff]   ;;  %v2353_v19 = vld [vmem:[%s2836_s1 + $0x1f8] sm:$0xff]   ;;  %v221_v20 = vld [vmem:[%s2468_s17 + $0x80] sm:$0xff] }
  0x1e   : > { %2112 = vmatpush3.bf16.msra.mxu1 %v2329_v9  ;;  %2089 = vmatprep.subr.bf16.mxu0 %v2330_v10  ;;  %v687_v9 = vpack.c.bf16 %v2512_v36, %v2499_v27  ;;  %v683_v26 = vrot.slane %v221_v20, 1  ;;  %v684_v27 = vrot.slane %v222_v21, 1  ;;  %v2357_v31 = vld [vmem:[%s2836_s1 + $0x1e8] sm:$0xff]   ;;  %v2362_v44 = vld [vmem:[%s2836_s1 + $0x50] sm:$0xff]   ;;  %v2366_v48 = vld [vmem:[%s2836_s1 + $0x40] sm:$0xff]  }
  0x1f   : > { %2113 = vmatprep.subr.bf16.mxu1 %v2331_v14  ;;  %v2363_v45 = vld [vmem:[%s2836_s1 + $0x1d0] sm:$0xff]   ;;  %v2364_v46 = vld [vmem:[%s2836_s1 + $0x48] sm:$0xff]   ;;  %v1817_v50 = vld [vmem:[%s2468_s17 + $0xc0] sm:$0xff] }
  0x20   : > { %v685_v32 = vsel %vm259_vm0, %v683_v26, %v684_v27  ;;  %v2365_v47 = vld [vmem:[%s2836_s1 + $0x1c8] sm:$0xff]   ;;  %v1818_v51 = vld [vmem:[%s2468_s17 + $0xd0] sm:$0xff]  ;;  %v2368_v52 = vld [vmem:[%s2836_s1 + $0xf8] sm:$0xff]  }
  0x21   : > { %2090 = vmatpush3.bf16.msra.mxu0 %v2330_v10  ;;  %v2344_v10 = vld [vmem:[%s2836_s1 + $0x198] sm:$0xff]   ;;  %v690_v36 = vpack.c.bf16 %v685_v32, %v2567_v1  ;;  %v982_v56 = vpack.c.bf16 %v1818_v51, %v1817_v50  ;;  %v2370_v57 = vld [vmem:[%s2836_s1 + $0xf0] sm:$0xff]   ;;  %v1872_v61 = vld [vmem:[%s2468_s17 + $0x128] sm:$0x1] }
  0x22   : > { %2114 = vmatpush3.bf16.msra.mxu1 %v2331_v14  ;;  %2091 = vmatprep.subr.bf16.mxu0 %v2332_v18  ;;  %v2348_v14 = vld [vmem:[%s2836_s1 + $0x188] sm:$0xff]   ;;  %v1820_v58 = vld [vmem:[%s2468_s17 + $0xf0] sm:$0xff]  ;;  %v1879_v32 = vld [vmem:[%s2468_s17 + $0x160] sm:$0xff] }
  0x23   : > { %2115 = vmatprep.subr.bf16.mxu1 %v2333_v23  ;;  %v1873_v60 = vld [vmem:[%s2468_s17 + $0x130] sm:$0xff]  ;;  %v1876_v26 = vld [vmem:[%s2468_s17 + $0x148] sm:$0x1] }
  0x24   : > { %v2379_v21 = vld [vmem:[%s2836_s1 + $0x150] sm:$0xff]   ;;  %v2381_v27 = vld [vmem:[%s2836_s1 + $0x148] sm:$0xff]  }
  0x25   : > { %2092 = vmatpush3.bf16.msra.mxu0 %v2332_v18  ;;  %v2352_v18 = vld [vmem:[%s2836_s1 + $0x78] sm:$0xff]  }
  0x26   : > { %2116 = vmatpush3.bf16.msra.mxu1 %v2333_v23  ;;  %2093 = vmatprep.subr.bf16.mxu0 %v2334_v34  ;;  %v688_v23 = vpack.c.bf16 %v2549_v55, %v2515_v37  ;;  %v1816_v37 = vld [vmem:[%s2468_s17 + $0xb0] sm:$0xff]  ;;  %v1819_v55 = vld [vmem:[%s2468_s17 + $0xe0] sm:$0xff] }
  0x27   : > { %2117 = vmatprep.subr.bf16.mxu1 %v2335_v35  ;;  %v840_v54 = vpack.c.bf16 %v1817_v50, %v1816_v37  ;;  %v841_v0 = vpack.c.bf16 %v1819_v55, %v1818_v51  ;;  %v983_v1 = vpack.c.bf16 %v1820_v58, %v1819_v55 }
  0x29   : > { %2094 = vmatpush3.bf16.msra.mxu0 %v2334_v34  ;;  %v542_v34 = vpack.c.bf16 %v221_v20, %v2545_v53  ;;  %v2369_v53 = vld [vmem:[%s2836_s1 + $0x178] sm:$0xff]   ;;  %v2378_v20 = vld [vmem:[%s2836_s1 + $0xd0] sm:$0xff]  }
  0x2a   : > { %2118 = vmatpush3.bf16.msra.mxu1 %v2335_v35  ;;  %2127 = vmatprep.subr.bf16.mxu0 %v2336_v38  ;;  %v1815_v35 = vld [vmem:[%s2468_s17 + $0xa0] sm:$0xff] }
  0x2b   : > { %2151 = vmatprep.subr.bf16.mxu1 %v2337_v39  ;;  %v839_v40 = vpack.c.bf16 %v1815_v35, %v1814_v33  ;;  %v981_v41 = vpack.c.bf16 %v1816_v37, %v1815_v35  ;;  %v1880_v35 = vld [vmem:[%s2468_s17 + $0x168] sm:$0x1]  ;;  %v2383_v37 = vld [vmem:[%s2836_s1 + $0x140] sm:$0xff]  }
  0x2c   : > { %2096 = vmatmul.mubr.bf16.vlgmr.msra.gmra.mxu0 %v293_v42  ;;  %v2360_v42 = vld [vmem:[%s2836_s1 + $0x58] sm:$0xff]  }
  0x2d   : > { %2120 = vmatmul.mubr.bf16.vlgmr.msra.gmra.mxu1 %v224_v49  ;;  %2128 = vmatpush3.bf16.msra.mxu0 %v2336_v38  ;;  %v2358_v38 = vld [vmem:[%s2836_s1 + $0x60] sm:$0xff]  }
  0x2e   : > { %2152 = vmatpush3.bf16.msra.mxu1 %v2337_v39  ;;  %2129 = vmatprep.subr.bf16.mxu0 %v2338_v43  ;;  %v2359_v39 = vld [vmem:[%s2836_s1 + $0x1e0] sm:$0xff]  }
  0x2f   : > { %2153 = vmatprep.subr.bf16.mxu1 %v2339_v59  ;;  %2099 = vmatprep.mubr.bf16.mxu0 %v294_v62  ;;  %v2367_v49 = vld [vmem:[%s2836_s1 + $0x1c0] sm:$0xff]   ;;  %v1874_v62 = vld [vmem:[%s2468_s17 + $0x138] sm:$0x1] }
  0x30   : > { %2123 = vmatprep.mubr.bf16.mxu1 %v225_v63  ;;  %v2371_v63 = vld [vmem:[%s2836_s1 + $0x170] sm:$0xff]  }
  0x31   : > { %2130 = vmatpush3.bf16.msra.mxu0 %v2338_v43  ;;  %v2361_v43 = vld [vmem:[%s2836_s1 + $0x1d8] sm:$0xff]  }
  0x32   : > { %2154 = vmatpush3.bf16.msra.mxu1 %v2339_v59  ;;  %2131 = vmatprep.subr.bf16.mxu0 %v2340_v2  ;;  %v1871_v59 = vld [vmem:[%s2468_s17 + $0x120] sm:$0xff] }
  0x33   : > { %2155 = vmatprep.subr.bf16.mxu1 %v2341_v3 }
  0x34   : > { %2100 = vmatmul.mubr.bf16.gmra.mxu0 %v295_v4  ;;  %v1301_v4 = vrot.slane %v1873_v60, 1 }
  0x35   : > { %2132 = vmatpush3.bf16.msra.mxu0 %v2340_v2  ;;  %2124 = vmatmul.mubr.bf16.gmra.mxu1 %v226_v5  ;;  %v1821_v2 = vld [vmem:[%s2468_s17 + $0x100] sm:$0xff]  ;;  %v1299_v5 = vrot.slane %v1872_v61, 1 }
  0x36   : > { %2156 = vmatpush3.bf16.msra.mxu1 %v2341_v3  ;;  %2133 = vmatprep.subr.bf16.mxu0 %v2342_v6  ;;  %v1298_v3 = vrot.slane %v1871_v59, 1 }
  0x37   : > { %2157 = vmatprep.subr.bf16.mxu1 %v2343_v7  ;;  %2143 = vmatprep.mubr.bf16.mxu0 %v539_v8  ;;  %v1822_v8 = vld [vmem:[%s2468_s17 + $0x110] sm:$0xff] }
  0x38   : > { %2167 = vmatprep.mubr.bf16.mxu1 %v687_v9  ;;  %v2373_v9 = vld [vmem:[%s2836_s1 + $0x168] sm:$0xff]  }
  0x39   : > { %2134 = vmatpush3.bf16.msra.mxu0 %v2342_v6  ;;  %v1302_v6 = vrot.slane %v1874_v62, 1 }
  0x3a   : > { %2158 = vmatpush3.bf16.msra.mxu1 %v2343_v7  ;;  %2135 = vmatprep.subr.bf16.mxu0 %v2344_v10  ;;  %v2372_v7 = vld [vmem:[%s2836_s1 + $0xe8] sm:$0xff]  }
  0x3b   : > { %2159 = vmatprep.subr.bf16.mxu1 %v2345_v11 }
  0x3d   : > { %2136 = vmatpush3.bf16.msra.mxu0 %v2344_v10  ;;  %v842_v10 = vpack.c.bf16 %v1821_v2, %v1820_v58 }
  0x3e   : > { %2160 = vmatpush3.bf16.msra.mxu1 %v2345_v11  ;;  %2137 = vmatprep.subr.bf16.mxu0 %v2346_v12  ;;  %v984_v11 = vpack.c.bf16 %v1822_v8, %v1821_v2  ;;  %v2388_v8 = vld [vmem:[%s2836_s1 + $0x118] sm:$0xff]  }
  0x3f   : > { %2161 = vmatprep.subr.bf16.mxu1 %v2347_v13 }
  0x41   : > { %2138 = vmatpush3.bf16.msra.mxu0 %v2346_v12  ;;  %v1300_v12 = vsel %vm259_vm0, %v1298_v3, %v1299_v5  ;;  %v1939_v3 = vld [vmem:[%s2468_s17 + $0x1f0] sm:$0xff]  ;;  %v2387_v5 = vld [vmem:[%s2836_s1 + $0x120] sm:$0xff]  }
  0x42   : > { %2162 = vmatpush3.bf16.msra.mxu1 %v2347_v13  ;;  %2139 = vmatprep.subr.bf16.mxu0 %v2348_v14  ;;  %v1303_v13 = vsel %vm259_vm0, %v1301_v4, %v1302_v6  ;;  %v1940_v4 = vld [vmem:[%s2468_s17 + $0x200] sm:$0xff] }
  0x43   : > { %2163 = vmatprep.subr.bf16.mxu1 %v2349_v15 }
  0x45   : > { %2140 = vmatpush3.bf16.msra.mxu0 %v2348_v14  ;;  %v2374_v14 = vld [vmem:[%s2836_s1 + $0xe0] sm:$0xff]  }
  0x46   : > { %2164 = vmatpush3.bf16.msra.mxu1 %v2349_v15  ;;  %2141 = vmatprep.subr.bf16.mxu0 %v2350_v16  ;;  %v2375_v15 = vld [vmem:[%s2836_s1 + $0x160] sm:$0xff]  }
  0x47   : > { %2165 = vmatprep.subr.bf16.mxu1 %v2351_v17 }
  0x49   : > { %2142 = vmatpush3.bf16.msra.mxu0 %v2350_v16  ;;  %v1140_v16 = vpack.c.bf16 %v1873_v60, %v1871_v59  ;;  %v2386_v60 = vld [vmem:[%s2836_s1 + $0x128] sm:$0xff]  }
  0x4a   : > { %2166 = vmatpush3.bf16.msra.mxu1 %v2351_v17  ;;  %2175 = vmatprep.subr.bf16.mxu0 %v2352_v18  ;;  %v1330_v17 = vpack.c.bf16 %v1303_v13, %v1300_v12  ;;  %v1937_v12 = vld [vmem:[%s2468_s17 + $0x1d0] sm:$0xff]  ;;  %v1938_v13 = vld [vmem:[%s2468_s17 + $0x1e0] sm:$0xff] }
  0x4b   : > { %2199 = vmatprep.subr.bf16.mxu1 %v2353_v19 }
  0x4c   : > { %2144 = vmatmul.mubr.bf16.vlgmr.msra.gmra.mxu0 %v540_v22  ;;  %v2380_v22 = vld [vmem:[%s2836_s1 + $0xc8] sm:$0xff]  }
  0x4d   : > { %2168 = vmatmul.mubr.bf16.vlgmr.msra.gmra.mxu1 %v688_v23  ;;  %2176 = vmatpush3.bf16.msra.mxu0 %v2352_v18  ;;  %v2376_v18 = vld [vmem:[%s2836_s1 + $0xd8] sm:$0xff]   ;;  %v1875_v23 = vld [vmem:[%s2468_s17 + $0x140] sm:$0xff] }
  0x4e   : > { %2200 = vmatpush3.bf16.msra.mxu1 %v2353_v19  ;;  %2177 = vmatprep.subr.bf16.mxu0 %v2354_v24  ;;  %v2377_v19 = vld [vmem:[%s2836_s1 + $0x158] sm:$0xff]  }
  0x4f   : > { %2201 = vmatprep.subr.bf16.mxu1 %v2355_v28  ;;  %2147 = vmatprep.mubr.bf16.mxu0 %v541_v25  ;;  %v2382_v25 = vld [vmem:[%s2836_s1 + $0xc0] sm:$0xff]  }
  0x50   : > { %2171 = vmatprep.mubr.bf16.mxu1 %v689_v29  ;;  %v1304_v29 = vrot.slane %v1875_v23, 1 }
  0x51   : > { %2178 = vmatpush3.bf16.msra.mxu0 %v2354_v24  ;;  %v1877_v24 = vld [vmem:[%s2468_s17 + $0x150] sm:$0xff] }
  0x52   : > { %2202 = vmatpush3.bf16.msra.mxu1 %v2355_v28  ;;  %2179 = vmatprep.subr.bf16.mxu0 %v2356_v30  ;;  %v1878_v28 = vld [vmem:[%s2468_s17 + $0x158] sm:$0x1] }
  0x53   : > { %2203 = vmatprep.subr.bf16.mxu1 %v2357_v31  ;;  %v1308_v33 = vrot.slane %v1878_v28, 1 }
  0x54   : > { %2148 = vmatmul.mubr.bf16.gmra.mxu0 %v542_v34  ;;  %v1881_v34 = vld [vmem:[%s2468_s17 + $0x170] sm:$0xff] }
  0x55   : > { %2180 = vmatpush3.bf16.msra.mxu0 %v2356_v30  ;;  %2172 = vmatmul.mubr.bf16.gmra.mxu1 %v690_v36  ;;  %v1307_v30 = vrot.slane %v1877_v24, 1  ;;  %v1882_v36 = vld [vmem:[%s2468_s17 + $0x178] sm:$0x1]  ;;  %v1142_v58 = vpack.c.bf16 %v1881_v34, %v1879_v32 }
  0x56   : > { %2204 = vmatpush3.bf16.msra.mxu1 %v2357_v31  ;;  %2181 = vmatprep.subr.bf16.mxu0 %v2358_v38  ;;  %v1305_v31 = vrot.slane %v1876_v26, 1 }
  0x57   : > { %2205 = vmatprep.subr.bf16.mxu1 %v2359_v39  ;;  %2191 = vmatprep.mubr.bf16.mxu0 %v839_v40  ;;  %v1311_v40 = vrot.slane %v1880_v35, 1 }
  0x58   : > { %2215 = vmatprep.mubr.bf16.mxu1 %v981_v41  ;;  %v1314_v41 = vrot.slane %v1882_v36, 1 }
  0x59   : > { %2182 = vmatpush3.bf16.msra.mxu0 %v2358_v38  ;;  %v1310_v38 = vrot.slane %v1879_v32, 1 }
  0x5a   : > { %2206 = vmatpush3.bf16.msra.mxu1 %v2359_v39  ;;  %2183 = vmatprep.subr.bf16.mxu0 %v2360_v42  ;;  %v1313_v39 = vrot.slane %v1881_v34, 1 }
  0x5b   : > { %2207 = vmatprep.subr.bf16.mxu1 %v2361_v43  ;;  %v1312_v51 = vsel %vm259_vm0, %v1310_v38, %v1311_v40 }
  0x5d   : > { %2184 = vmatpush3.bf16.msra.mxu0 %v2360_v42  ;;  %v1306_v42 = vsel %vm259_vm0, %v1304_v29, %v1305_v31 }
  0x5e   : > { %2208 = vmatpush3.bf16.msra.mxu1 %v2361_v43  ;;  %2185 = vmatprep.subr.bf16.mxu0 %v2362_v44  ;;  %v1309_v43 = vsel %vm259_vm0, %v1307_v30, %v1308_v33 }
  0x5f   : > { %2209 = vmatprep.subr.bf16.mxu1 %v2363_v45  ;;  %v1331_v50 = vpack.c.bf16 %v1309_v43, %v1306_v42 }
  0x61   : > { %2186 = vmatpush3.bf16.msra.mxu0 %v2362_v44  ;;  %v2384_v44 = vld [vmem:[%s2836_s1 + $0x138] sm:$0xff]  }
  0x62   : > { %2210 = vmatpush3.bf16.msra.mxu1 %v2363_v45  ;;  %2187 = vmatprep.subr.bf16.mxu0 %v2364_v46  ;;  %v1883_v45 = vld [vmem:[%s2468_s17 + $0x180] sm:$0xff] }
  0x63   : > { %2211 = vmatprep.subr.bf16.mxu1 %v2365_v47 }
  0x65   : > { %2188 = vmatpush3.bf16.msra.mxu0 %v2364_v46  ;;  %v1885_v46 = vld [vmem:[%s2468_s17 + $0x190] sm:$0xff] }
  0x66   : > { %2212 = vmatpush3.bf16.msra.mxu1 %v2365_v47  ;;  %2189 = vmatprep.subr.bf16.mxu0 %v2366_v48  ;;  %v1884_v47 = vld [vmem:[%s2468_s17 + $0x188] sm:$0x1]  ;;  %v1319_v55 = vrot.slane %v1885_v46, 1 }
  0x67   : > { %2213 = vmatprep.subr.bf16.mxu1 %v2367_v49 }
  0x69   : > { %2190 = vmatpush3.bf16.msra.mxu0 %v2366_v48  ;;  %v1886_v48 = vld [vmem:[%s2468_s17 + $0x198] sm:$0x1] }
  0x6a   : > { %2214 = vmatpush3.bf16.msra.mxu1 %v2367_v49  ;;  %2223 = vmatprep.subr.bf16.mxu0 %v2368_v52  ;;  %v1141_v49 = vpack.c.bf16 %v1877_v24, %v1875_v23 }
  0x6b   : > { %2247 = vmatprep.subr.bf16.mxu1 %v2369_v53 }
  0x6c   : > { %2192 = vmatmul.mubr.bf16.vlgmr.msra.gmra.mxu0 %v840_v54  ;;  %v1316_v54 = vrot.slane %v1883_v45, 1 }
  0x6d   : > { %2216 = vmatmul.mubr.bf16.vlgmr.msra.gmra.mxu1 %v982_v56  ;;  %2224 = vmatpush3.bf16.msra.mxu0 %v2368_v52  ;;  %v1315_v52 = vsel %vm259_vm0, %v1313_v39, %v1314_v41  ;;  %v1317_v56 = vrot.slane %v1884_v47, 1 }
  0x6e   : > { %2248 = vmatpush3.bf16.msra.mxu1 %v2369_v53  ;;  %2225 = vmatprep.subr.bf16.mxu0 %v2370_v57  ;;  %v2385_v53 = vld [vmem:[%s2836_s1 + $0x130] sm:$0xff]   ;;  %v1332_v59 = vpack.c.bf16 %v1315_v52, %v1312_v51 }
  0x6f   : > { %2249 = vmatprep.subr.bf16.mxu1 %v2371_v63  ;;  %2195 = vmatprep.mubr.bf16.mxu0 %v841_v0  ;;  %v1318_v61 = vsel %vm259_vm0, %v1316_v54, %v1317_v56  ;;  %v1935_v0 = vld [vmem:[%s2468_s17 + $0x1b0] sm:$0xff] }
  0x70   : > { %2219 = vmatprep.mubr.bf16.mxu1 %v983_v1  ;;  %v1936_v1 = vld [vmem:[%s2468_s17 + $0x1c0] sm:$0xff] }
  0x71   : > { %2226 = vmatpush3.bf16.msra.mxu0 %v2370_v57  ;;  %v1320_v57 = vrot.slane %v1886_v48, 1  ;;  %v1481_v6 = vpack.c.bf16 %v1936_v1, %v1935_v0 }
  0x72   : > { %2250 = vmatpush3.bf16.msra.mxu1 %v2371_v63  ;;  %2227 = vmatprep.subr.bf16.mxu0 %v2372_v7  ;;  %v1143_v63 = vpack.c.bf16 %v1885_v46, %v1883_v45 }
  0x73   : > { %2251 = vmatprep.subr.bf16.mxu1 %v2373_v9  ;;  %v1321_v62 = vsel %vm259_vm0, %v1319_v55, %v1320_v57 }
  0x74   : > { %2196 = vmatmul.mubr.bf16.gmra.mxu0 %v842_v10  ;;  %v1333_v2 = vpack.c.bf16 %v1321_v62, %v1318_v61  ;;  %v2390_v10 = vld [vmem:[%s2836_s1 + $0x108] sm:$0xff]  }
  0x75   : > { %2228 = vmatpush3.bf16.msra.mxu0 %v2372_v7  ;;  %2220 = vmatmul.mubr.bf16.gmra.mxu1 %v984_v11  ;;  %v1483_v7 = vpack.c.bf16 %v1940_v4, %v1939_v3  ;;  %v2391_v11 = vld [vmem:[%s2836_s1 + $0x100] sm:$0xff]  }
  0x76   : > { %2252 = vmatpush3.bf16.msra.mxu1 %v2373_v9  ;;  %2229 = vmatprep.subr.bf16.mxu0 %v2374_v14  ;;  %v2389_v9 = vld [vmem:[%s2836_s1 + $0x110] sm:$0xff]  }
  0x77   : > { %2253 = vmatprep.subr.bf16.mxu1 %v2375_v15  ;;  %2239 = vmatprep.mubr.bf16.mxu0 %v1140_v16  ;;  %v1482_v16 = vpack.c.bf16 %v1938_v13, %v1937_v12 }
  0x78   : > { %2263 = vmatprep.mubr.bf16.mxu1 %v1330_v17 }
  0x79   : > { %2230 = vmatpush3.bf16.msra.mxu0 %v2374_v14  ;;  %v1941_v14 = vld [vmem:[%s2468_s17 + $0x210] sm:$0xff] }
  0x7a   : > { %2254 = vmatpush3.bf16.msra.mxu1 %v2375_v15  ;;  %2231 = vmatprep.subr.bf16.mxu0 %v2376_v18  ;;  %v1942_v15 = vld [vmem:[%s2468_s17 + $0x220] sm:$0xff]  ;;  %s1732_s17 = sshll.u32 %s1725_s16, 3 }
  0x7b   : > { %2255 = vmatprep.subr.bf16.mxu1 %v2377_v19  ;;  %v1484_v17 = vpack.c.bf16 %v1942_v15, %v1941_v14  ;;  %p199_p4 = scmp.lt.s32.totalorder %s1732_s17, 15 }
  0x7d   : > { %2232 = vmatpush3.bf16.msra.mxu0 %v2376_v18  ;;  %s2855_s17 = smov (!%p199_p4, %s1732_s17), 15 }
  0x7e   : > { %2256 = vmatpush3.bf16.msra.mxu1 %v2377_v19  ;;  %2233 = vmatprep.subr.bf16.mxu0 %v2378_v20  ;;  %s1733_s30 = sshll.u32 %s2855_s17, 3 }
  0x7f   : > { %2257 = vmatprep.subr.bf16.mxu1 %v2379_v21  ;;  %s2822_s7 = scalar_lea.vmem %s2839_s4, %s1733_s30 }
  0x81   : > { %2234 = vmatpush3.bf16.msra.mxu0 %v2378_v20 }
  0x82   : > { %2258 = vmatpush3.bf16.msra.mxu1 %v2379_v21  ;;  %2235 = vmatprep.subr.bf16.mxu0 %v2380_v22 }
  0x83   : > { %2259 = vmatprep.subr.bf16.mxu1 %v2381_v27 }
  0x85   : > { %2236 = vmatpush3.bf16.msra.mxu0 %v2380_v22 }
  0x86   : > { %2260 = vmatpush3.bf16.msra.mxu1 %v2381_v27  ;;  %2237 = vmatprep.subr.bf16.mxu0 %v2382_v25 }
  0x87   : > { %2261 = vmatprep.subr.bf16.mxu1 %v2383_v37 }
  0x89   : > { %2238 = vmatpush3.bf16.msra.mxu0 %v2382_v25 }
  0x8a   : > { %2262 = vmatpush3.bf16.msra.mxu1 %v2383_v37  ;;  %2271 = vmatprep.subr.bf16.mxu0 %v2384_v44 }
  0x8b   : > { %2295 = vmatprep.subr.bf16.mxu1 %v2384_v44 }
  0x8c   : > { %2240 = vmatmul.mubr.bf16.vlgmr.msra.gmra.mxu0 %v1141_v49 }
  0x8d   : > { %2264 = vmatmul.mubr.bf16.vlgmr.msra.gmra.mxu1 %v1331_v50  ;;  %2272 = vmatpush3.bf16.msra.mxu0 %v2384_v44 }
  0x8e   : > { %2303 = vmatpush3.bf16.msra.mxu1 %v2384_v44  ;;  %2273 = vmatprep.subr.bf16.mxu0 %v2385_v53 }
  0x8f   : > { %2296 = vmatprep.subr.bf16.mxu1 %v2385_v53  ;;  %2243 = vmatprep.mubr.bf16.mxu0 %v1142_v58 }
  0x90   : > { %2267 = vmatprep.mubr.bf16.mxu1 %v1332_v59 }
  0x91   : > { %2274 = vmatpush3.bf16.msra.mxu0 %v2385_v53 }
  0x92   : > { %2304 = vmatpush3.bf16.msra.mxu1 %v2385_v53  ;;  %2275 = vmatprep.subr.bf16.mxu0 %v2386_v60 }
  0x93   : > { %2297 = vmatprep.subr.bf16.mxu1 %v2386_v60 }
  0x94   : > { %2244 = vmatmul.mubr.bf16.gmra.mxu0 %v1143_v63 }
  0x95   : > { %2276 = vmatpush3.bf16.msra.mxu0 %v2386_v60  ;;  %2268 = vmatmul.mubr.bf16.gmra.mxu1 %v1333_v2 }
  0x96   : > { %2305 = vmatpush3.bf16.msra.mxu1 %v2386_v60  ;;  %2277 = vmatprep.subr.bf16.mxu0 %v2387_v5 }
  0x97   : > { %2298 = vmatprep.subr.bf16.mxu1 %v2387_v5  ;;  %2287 = vmatprep.mubr.bf16.mxu0 %v1481_v6 }
  0x98   : > { %2291 = vmatprep.mubr.bf16.mxu1 %v1483_v7 }
  0x99   : > { %2278 = vmatpush3.bf16.msra.mxu0 %v2387_v5 }
  0x9a   : > { %2306 = vmatpush3.bf16.msra.mxu1 %v2387_v5  ;;  %2279 = vmatprep.subr.bf16.mxu0 %v2388_v8 }
  0x9b   : > { %2299 = vmatprep.subr.bf16.mxu1 %v2388_v8 }
  0x9d   : > { %2280 = vmatpush3.bf16.msra.mxu0 %v2388_v8 }
  0x9e   : > { %2307 = vmatpush3.bf16.msra.mxu1 %v2388_v8  ;;  %2281 = vmatprep.subr.bf16.mxu0 %v2389_v9 }
  0x9f   : > { %2300 = vmatprep.subr.bf16.mxu1 %v2389_v9 }
  0xa1   : > { %2282 = vmatpush3.bf16.msra.mxu0 %v2389_v9 }
  0xa2   : > { %2308 = vmatpush3.bf16.msra.mxu1 %v2389_v9  ;;  %2283 = vmatprep.subr.bf16.mxu0 %v2390_v10 }
  0xa3   : > { %2301 = vmatprep.subr.bf16.mxu1 %v2390_v10 }
  0xa5   : > { %2284 = vmatpush3.bf16.msra.mxu0 %v2390_v10 }
  0xa6   : > { %2309 = vmatpush3.bf16.msra.mxu1 %v2390_v10  ;;  %2285 = vmatprep.subr.bf16.mxu0 %v2391_v11 }
  0xa7   : > { %2302 = vmatprep.subr.bf16.mxu1 %v2391_v11 }
  0xa9   : > { %2286 = vmatpush3.bf16.msra.mxu0 %v2391_v11 }
  0xaa   : > { %2310 = vmatpush3.bf16.msra.mxu1 %v2391_v11 }
  0xac   : > { %2288 = vmatmul.mubr.bf16.vlgmr.msra.gmra.mxu0 %v1482_v16 }
  0xad   : > { %2292 = vmatmul.mubr.bf16.vlgmr.msra.gmra.mxu1 %v1484_v17 }
  0xec   : > { %v2097_v18 = vpop.f32.mrf.mxu0 }
  0xed   : > { %v2121_v20 = vpop.f32.mrf.mxu1 }
  0xee   : > { %v395_v19 = vpop.f32.mrf.mxu0  ;;  %v517_v7 = vadd.f32 %v2121_v20, %v2097_v18 }
  0xef   : > { %v508_v22 = vpop.f32.mrf.mxu1 }
  0xf0   : > { %v2098_v21 = vpop.f32.mrf.mxu0  ;;  %v509_v11 = vadd.f32 %v508_v22, %v395_v19 }
  0xf1   : > { %v2122_v26 = vpop.f32.mrf.mxu1 }
  0xf2   : > { %v398_v23 = vpop.f32.mrf.mxu0  ;;  %v520_v15 = vadd.f32 %v2122_v26, %v2098_v21 }
  0xf3   : > { %v511_v28 = vpop.f32.mrf.mxu1 }
  0xf4   : > { %v2101_v24 = vpop.f32.mrf.mxu0 }
  0xf5   : > { %v2125_v25 = vpop.f32.mrf.mxu1 }
  0xf6   : > { %v411_v27 = vpop.f32.mrf.mxu0  ;;  %v533_v9 = vadd.f32 %v2125_v25, %v2101_v24 }
  0xf7   : > { %v524_v30 = vpop.f32.mrf.mxu1 }
  0xf8   : > { %v2102_v29 = vpop.f32.mrf.mxu0  ;;  %v525_v13 = vadd.f32 %v524_v30, %v411_v27 }
  0xf9   : > { %v2126_v33 = vpop.f32.mrf.mxu1 }
  0xfa   : > { %v414_v31 = vpop.f32.mrf.mxu0 }
  0xfb   : > { %v527_v35 = vpop.f32.mrf.mxu1 }
 0x10c   : > { %v2145_v32 = vpop.f32.mrf.mxu0 }
 0x10d   : > { %v2169_v36 = vpop.f32.mrf.mxu1  ;;  %v675_v12 = vadd.f32 %v2145_v32, %v517_v7 }
 0x10e   : > { %v642_v34 = vpop.f32.mrf.mxu0 }
 0x10f   : > { %v790_v38 = vpop.f32.mrf.mxu1  ;;  %v673_v16 = vadd.f32 %v642_v34, %v509_v11 }
 0x110   : > { %v2146_v37 = vpop.f32.mrf.mxu0 }
 0x111   : > { %v2170_v40 = vpop.f32.mrf.mxu1  ;;  %v676_v18 = vadd.f32 %v2146_v37, %v520_v15  ;;  %v821_v19 = vadd.f32 %v790_v38, %v673_v16 }
 0x112   : > { %v645_v39 = vpop.f32.mrf.mxu0 }
 0x113   : > { %v2787_v42 = vpop.f32.mrf.mxu1  ;;  %v824_v34 = vadd.f32 %v2170_v40, %v676_v18 }
 0x114   : > { %v2149_v41 = vpop.f32.mrf.mxu0  ;;  %2840 = vst [vmem:[#allocation2_spill] sm:$0xff] %v2787_v42  ;;  %v512_v42 = vadd.f32 %v511_v28, %v398_v23 }
 0x115   : > { %v2173_v44 = vpop.f32.mrf.mxu1  ;;  %v679_v14 = vadd.f32 %v2149_v41, %v533_v9  ;;  %v1968_v9 = vld [vmem:[%s2838_s3] ss:$0 sm:$0xff] }
 0x116   : > { %v658_v43 = vpop.f32.mrf.mxu0  ;;  %v674_v22 = vadd.f32 %v645_v39, %v512_v42 }
 0x117   : > { %v806_v46 = vpop.f32.mrf.mxu1  ;;  %v827_v24 = vadd.f32 %v2173_v44, %v679_v14 }
 0x118   : > { %v2150_v45 = vpop.f32.mrf.mxu0 }
 0x119   : > { %v2174_v48 = vpop.f32.mrf.mxu1 }
 0x11a   : > { %v661_v47 = vpop.f32.mrf.mxu0 }
 0x11b   : > { %v809_v50 = vpop.f32.mrf.mxu1  ;;  %v2846_v23 = vld [vmem:[#allocation2_spill] sm:$0xff] }
 0x11c   : > { %v822_v28 = vadd.f32 %v2846_v23, %v674_v22 }
 0x12c   : > { %v2193_v49 = vpop.f32.mrf.mxu0 }
 0x12d   : > { %v2217_v52 = vpop.f32.mrf.mxu1 }
 0x12e   : > { %v942_v51 = vpop.f32.mrf.mxu0 }
 0x12f   : > { %v1084_v54 = vpop.f32.mrf.mxu1  ;;  %v973_v41 = vadd.f32 %v942_v51, %v821_v19 }
 0x130   : > { %v2194_v53 = vpop.f32.mrf.mxu0 }
 0x131   : > { %v2789_v56 = vpop.f32.mrf.mxu1  ;;  %v1115_v42 = vadd.f32 %v1084_v54, %v973_v41 }
 0x132   : > { %v945_v55 = vpop.f32.mrf.mxu0  ;;  %2841 = vst [vmem:[#allocation3_spill] sm:$0xff] %v2789_v56 }
 0x133   : > { %v2791_v58 = vpop.f32.mrf.mxu1  ;;  %v974_v44 = vadd.f32 %v945_v55, %v822_v28 }
 0x134   : > { %v2197_v57 = vpop.f32.mrf.mxu0  ;;  %2842 = vst [vmem:[#allocation4_spill] sm:$0xff] %v2791_v58  ;;  %v536_v58 = vadd.f32 %v2126_v33, %v2102_v29 }
 0x135   : > { %v2221_v59 = vpop.f32.mrf.mxu1  ;;  %v979_v21 = vadd.f32 %v2197_v57, %v827_v24 }
 0x136   : > { %v958_v60 = vpop.f32.mrf.mxu0  ;;  %v680_v25 = vadd.f32 %v2150_v45, %v536_v58 }
 0x137   : > { %v1100_v61 = vpop.f32.mrf.mxu1  ;;  %v1121_v37 = vadd.f32 %v2221_v59, %v979_v21 }
 0x138   : > { %v2198_v62 = vpop.f32.mrf.mxu0  ;;  %v828_v33 = vadd.f32 %v2174_v48, %v680_v25 }
 0x139   : > { %v2222_v63 = vpop.f32.mrf.mxu1  ;;  %v2847_v48 = vld [vmem:[#allocation3_spill] sm:$0xff] }
 0x13a   : > { %v961_v0 = vpop.f32.mrf.mxu0  ;;  %v980_v38 = vadd.f32 %v2198_v62, %v828_v33 }
 0x13b   : > { %v2793_v2 = vpop.f32.mrf.mxu1 }
 0x13c   : > { %2843 = vst [vmem:[#allocation5_spill] sm:$0xff] %v2793_v2  ;;  %v677_v2 = vadd.f32 %v658_v43, %v525_v13  ;;  %v1122_v58 = vadd.f32 %v2222_v63, %v980_v38 }
 0x13e   : > { %v825_v27 = vadd.f32 %v806_v46, %v677_v2 }
 0x140   : > { %v977_v43 = vadd.f32 %v958_v60, %v825_v27 }
 0x142   : > { %v1119_v40 = vadd.f32 %v1100_v61, %v977_v43 }
 0x143   : > { %v2849_v54 = vld [vmem:[#allocation5_spill] sm:$0xff] }
 0x14c   : > { %v2241_v1 = vpop.f32.mrf.mxu0 }
 0x14d   : > { %v2265_v3 = vpop.f32.mrf.mxu1 }
 0x14e   : > { %v1243_v4 = vpop.f32.mrf.mxu0 }
 0x14f   : > { %v2795_v5 = vpop.f32.mrf.mxu1  ;;  %v1274_v57 = vadd.f32 %v1243_v4, %v1115_v42 }
 0x150   : > { %2844 = vst [vmem:[#allocation6_spill] sm:$0xff] %v2795_v5  ;;  %v2242_v6 = vpop.f32.mrf.mxu0  ;;  %v823_v5 = vadd.f32 %v2169_v36, %v675_v12 }
 0x151   : > { %v2797_v8 = vpop.f32.mrf.mxu1 }
 0x152   : > { %2845 = vst [vmem:[#allocation7_spill] sm:$0xff] %v2797_v8  ;;  %v1246_v10 = vpop.f32.mrf.mxu0  ;;  %v528_v8 = vadd.f32 %v527_v35, %v414_v31  ;;  %v975_v32 = vadd.f32 %v2193_v49, %v823_v5  ;;  %v976_v31 = vadd.f32 %v2194_v53, %v824_v34 }
 0x153   : > { %v2799_v17 = vpop.f32.mrf.mxu1 }
 0x154   : > { %v2245_v56 = vpop.f32.mrf.mxu0  ;;  %v678_v30 = vadd.f32 %v661_v47, %v528_v8  ;;  %v1117_v36 = vadd.f32 %v2217_v52, %v975_v32  ;;  %v1118_v51 = vadd.f32 %v2847_v48, %v976_v31  ;;  %v2848_v52 = vld [vmem:[#allocation4_spill] sm:$0xff] }
 0x155   : > { %v2269_v20 = vpop.f32.mrf.mxu1  ;;  %v1280_v49 = vadd.f32 %v2245_v56, %v1121_v37  ;;  %v1116_v53 = vadd.f32 %v2848_v52, %v974_v44  ;;  %v1967_v56 = vld [vmem:[%s2837_s2] ss:$0 sm:$0xff] }
 0x156   : > { %v1259_v26 = vpop.f32.mrf.mxu0  ;;  %v826_v35 = vadd.f32 %v809_v50, %v678_v30  ;;  %v1276_v45 = vadd.f32 %v2241_v1, %v1117_v36  ;;  %v1277_v59 = vadd.f32 %v2242_v6, %v1118_v51 }
 0x157   : > { %v1449_v29 = vpop.f32.mrf.mxu1  ;;  %v1278_v60 = vadd.f32 %v1259_v26, %v1119_v40  ;;  %v1470_v1 = vadd.f32 %v2269_v20, %v1280_v49  ;;  %v2850_v63 = vld [vmem:[#allocation6_spill] sm:$0xff]  ;;  %v1275_v5 = vadd.f32 %v1246_v10, %v1116_v53 }
 0x158   : > { %v2246_v39 = vpop.f32.mrf.mxu0  ;;  %v978_v47 = vadd.f32 %v961_v0, %v826_v35  ;;  %v1466_v50 = vadd.f32 %v2265_v3, %v1276_v45  ;;  %v1464_v4 = vadd.f32 %v2850_v63, %v1274_v57 }
 0x159   : > { %v2270_v46 = vpop.f32.mrf.mxu1  ;;  %v1281_v61 = vadd.f32 %v2246_v39, %v1122_v58  ;;  %v1468_v3 = vadd.f32 %v1449_v29, %v1278_v60  ;;  %v2851_v13 = vld [vmem:[#allocation7_spill] sm:$0xff]  ;;  %v1465_v19 = vadd.f32 %v2799_v17, %v1275_v5 }
 0x15a   : > { %v1262_v2 = vpop.f32.mrf.mxu0  ;;  %v1120_v55 = vadd.f32 %v2849_v54, %v978_v47  ;;  %v1467_v14 = vadd.f32 %v2851_v13, %v1277_v59 }
 0x15b   : > { %v1452_v62 = vpop.f32.mrf.mxu1  ;;  %v1471_v20 = vadd.f32 %v2270_v46, %v1281_v61 }
 0x15c   : > { %v1279_v6 = vadd.f32 %v1262_v2, %v1120_v55 }
 0x15e   : > { %v1469_v21 = vadd.f32 %v1452_v62, %v1279_v6 }
 0x16c   : > { %v2289_v0 = vpop.f32.mrf.mxu0 }
 0x16d   : > { %v1617_v7 = vadd.f32 %v2289_v0, %v1466_v50  ;;  %v2293_v8 = vpop.f32.mrf.mxu1 }
 0x16e   : > { %v1621_v11 = vadd.f32 %v2293_v8, %v1470_v1  ;;  %v1584_v12 = vpop.f32.mrf.mxu0 }
 0x16f   : > { %v1632_v15 = vmul.f32 %v1967_v56, %v1617_v7  ;;  %v1615_v16 = vadd.f32 %v1584_v12, %v1464_v4  ;;  %v1600_v18 = vpop.f32.mrf.mxu1 }
 0x170   : > { %v1636_v24 = vmul.f32 %v1967_v56, %v1621_v11  ;;  %v1619_v25 = vadd.f32 %v1600_v18, %v1468_v3  ;;  %v2290_v10 = vpop.f32.mrf.mxu0 }
 0x171   : > { %v1647_v22 = vadd.f32 %v1968_v9, %v1632_v15  ;;  %v1630_v32 = vmul.f32 %v1967_v56, %v1615_v16  ;;  %v1618_v27 = vadd.f32 %v2290_v10, %v1467_v14  ;;  %v2294_v30 = vpop.f32.mrf.mxu1 }
 0x172   : > { %v1651_v26 = vadd.f32 %v1968_v9, %v1636_v24  ;;  %v1634_v34 = vmul.f32 %v1967_v56, %v1619_v25  ;;  %v1622_v41 = vadd.f32 %v2294_v30, %v1471_v20  ;;  %v1587_v29 = vpop.f32.mrf.mxu0 }
 0x173   : > { %v1655_v33 = vmax.f32 %v1647_v22, 0.0  ;;  %v1645_v43 = vadd.f32 %v1968_v9, %v1630_v32  ;;  %v1633_v17 = vmul.f32 %v1967_v56, %v1618_v27  ;;  %v1616_v23 = vadd.f32 %v1587_v29, %v1465_v19  ;;  %v1603_v28 = vpop.f32.mrf.mxu1 }
 0x174   : > { %v1659_v36 = vmax.f32 %v1651_v26, 0.0  ;;  %v1649_v31 = vadd.f32 %v1968_v9, %v1634_v34  ;;  %v1637_v35 = vmul.f32 %v1967_v56, %v1622_v41  ;;  %v1620_v37 = vadd.f32 %v1603_v28, %v1469_v21 }
 0x175   : > { %1663 = vst [vmem:[%s2822_s7 + $0x10] sm:$0xff] %v1655_v33  ;;  %v1653_v38 = vmax.f32 %v1645_v43, 0.0  ;;  %v1648_v39 = vadd.f32 %v1968_v9, %v1633_v17  ;;  %v1631_v42 = vmul.f32 %v1967_v56, %v1616_v23 }
 0x176   : > { %1667 = vst [vmem:[%s2822_s7 + $0x30] sm:$0xff] %v1659_v36  ;;  %v1657_v44 = vmax.f32 %v1649_v31, 0.0  ;;  %v1652_v45 = vadd.f32 %v1968_v9, %v1637_v35  ;;  %v1635_v46 = vmul.f32 %v1967_v56, %v1620_v37 }
 0x177   : > { %1661 = vst [vmem:[%s2822_s7] sm:$0xff] %v1653_v38  ;;  %v1656_v40 = vmax.f32 %v1648_v39, 0.0  ;;  %v1646_v47 = vadd.f32 %v1968_v9, %v1631_v42 }
 0x178   : > { %1665 = vst [vmem:[%s2822_s7 + $0x20] sm:$0xff] %v1657_v44  ;;  %v1660_v49 = vmax.f32 %v1652_v45, 0.0  ;;  %v1650_v48 = vadd.f32 %v1968_v9, %v1635_v46 }
 0x179   : > { %1664 = vst [vmem:[%s2822_s7 + $0x18] sm:$0xff] %v1656_v40  ;;  %v1654_v51 = vmax.f32 %v1646_v47, 0.0 }
 0x17a   : > { %1668 = vst [vmem:[%s2822_s7 + $0x38] sm:$0xff] %v1660_v49  ;;  %v1658_v57 = vmax.f32 %v1650_v48, 0.0 }
 0x17b   : > { %1662 = vst [vmem:[%s2822_s7 + $0x8] sm:$0xff] %v1654_v51 }
 0x17c   : > { %1666 = vst [vmem:[%s2822_s7 + $0x28] sm:$0xff] %v1658_v57 }
 0x17d PF: > { %s14_s15 = sadd.s32 1, %s2398_s15  }
 0x17e   : > { %p11_p5 = scmp.ge.s32.totalorder %s14_s15, 4  }
 0x180   :  { %13 = sbr.rel (!%p11_p5) target bundleno = 1 (0x1), region = 77 }

// kernel: encoder_forward_pallas.6
= control target key start
LH: loop header
LB: loop body
LE: loop exit
PB: predicated region body
PF: predicated region fallthrough
CT: control target
= control target key end

     0   :  { %s2017_s15 = smov 0   ;;  %s2452_s0 = inlined_call_operand.vmem [shape: f32[8,5,5,128], index: 0, kind: input, shape index: {}]   ;;  %s2453_s1 = inlined_call_operand.vmem [shape: bf16[9,128,128], index: 1, kind: input, shape index: {}]   ;;  %s2454_s2 = inlined_call_operand.vmem [shape: f32[1,128], index: 2, kind: input, shape index: {}]   ;;  %s2455_s3 = inlined_call_operand.vmem [shape: f32[1,128], index: 3, kind: input, shape index: {}]   ;;  %s2456_s4 = inlined_call_operand.vmem [shape: f32[32,128], index: 4, kind: output, shape index: {}]  }
   0x1 LB: > { %s1382_s16 = sadd.s32 4294967295, %s1988_s15   ;;  %p1386_p0 = scmp.ge.s32.totalorder %s1988_s15, 1  ;;  %s1988_s15 = sphi %s2017_s15, %s14_s15  }
   0x2   : > { %p164_p1 = scmp.lt.s32.totalorder %s1988_s15, 3 }
   0x4   : > { %p165_p2 = pnand %p1386_p0, %p164_p1 }
   0x5   : > { %s1387_s23 = sshll.u32 (!%p165_p2), %s1382_s16, 2 }
   0x6   : > { %168 = sbr.rel (%p165_p2) target bundleno = 378 (0x17a), region = 36  ;;  %p192_p3 = scmp.lt.s32.totalorder (!%p165_p2), %s1387_s23, 7 }
   0xb   : > { %v1889_v0 = vld [vmem:[%s2453_s1 + $0xb8] sm:$0xff]   ;;  %v1990_v1 = vmov 0.0   ;;  %v1891_v3 = vld [vmem:[%s2453_s1 + $0xb0] sm:$0xff]   ;;  %vm1991_vm0 = vmmov 0   ;;  %s2460_s23 = smov (!%p192_p3, %s1387_s23), 7  ;;  %v1893_v5 = vld [vmem:[%s2453_s1 + $0xa8] sm:$0xff]  }
   0xc   : > { %1698 = vmatprep.subr.bf16.mxu0 %v1990_v1  ;;  %1718 = vmatprep.subr.bf16.mxu1 %v1990_v1  ;;  %v1890_v2 = vld [vmem:[%s2453_s1 + $0x38] sm:$0xff]   ;;  %v1892_v4 = vld [vmem:[%s2453_s1 + $0x30] sm:$0xff]   ;;  %v1894_v6 = vld [vmem:[%s2453_s1 + $0x28] sm:$0xff]   ;;  %s1878_s30 = smul.u32 40, %s2460_s23  ;;  %vm239_vm1 = vcmask 1042432   ;;  %vm240_vm2 = vcmask 1046532  }
   0xd   : > { %1699 = vmatpush3.bf16.msra.mxu0 %v1889_v0  ;;  %1714 = vmatprep.mubr.msk.bf16.mxu0 %vm1991_vm0, %v1990_v1  ;;  %v1895_v7 = vld [vmem:[%s2453_s1 + $0xa0] sm:$0xff]   ;;  %v1897_v9 = vld [vmem:[%s2453_s1 + $0x98] sm:$0xff]   ;;  %v1899_v19 = vld [vmem:[%s2453_s1 + $0x90] sm:$0xff]  }
   0xe   : > { %1719 = vmatpush3.bf16.msra.mxu1 %v1890_v2  ;;  %1700 = vmatprep.subr.bf16.mxu0 %v1990_v1  ;;  %v1896_v8 = vld [vmem:[%s2453_s1 + $0x20] sm:$0xff]   ;;  %s2066_s11 = scalar_lea.vmem %s2452_s0, %s1878_s30  ;;  %v1898_v10 = vld [vmem:[%s2453_s1 + $0x18] sm:$0xff]   ;;  %v1900_v24 = vld [vmem:[%s2453_s1 + $0x10] sm:$0xff]  }
   0xf   : > { %1720 = vmatprep.subr.bf16.mxu1 %v1990_v1  ;;  %1734 = vmatprep.mubr.msk.bf16.mxu1 %vm1991_vm0, %v1990_v1  ;;  %v205_v11 = vld [vmem:[%s2066_s11] sm:$0x1f]  ;;  %v2078_v12 = vld [vmem:[%s2066_s11 + $0x8] sm:$0x1f]  ;;  %v2081_v13 = vld [vmem:[%s2066_s11 + $0x10] sm:$0x1f] }
  0x10   : > { %v2084_v14 = vld [vmem:[%s2066_s11 + $0x18] sm:$0x1f]  ;;  %v235_v15 = vcombine.high %v205_v11, %v205_v11  ;;  %v236_v16 = vcombine.high %v2078_v12, %v2078_v12  ;;  %v237_v17 = vcombine.high %v2081_v13, %v2081_v13  ;;  %v1391_v18 = vrot.slane %v205_v11, 9  ;;  %vm2104_vm3 = vmor %vm239_vm1, %vm240_vm2  ;;  %v1901_v30 = vld [vmem:[%s2453_s1 + $0x88] sm:$0xff]  }
  0x11   : > { %1701 = vmatpush3.bf16.msra.mxu0 %v1891_v3  ;;  %v238_v20 = vcombine.high %v2084_v14, %v2084_v14  ;;  %v1392_v21 = vrot.slane %v2078_v12, 9  ;;  %v1393_v22 = vrot.slane %v2081_v13, 9  ;;  %v1394_v23 = vrot.slane %v2084_v14, 9  ;;  %v1902_v35 = vld [vmem:[%s2453_s1 + $0x8] sm:$0xff]   ;;  %v1903_v38 = vld [vmem:[%s2453_s1 + $0x80] sm:$0xff]   ;;  %v1912_v44 = vld [vmem:[%s2453_s1 + $0x1b8] sm:$0xff]  }
  0x12   : > { %1721 = vmatpush3.bf16.msra.mxu1 %v1892_v4  ;;  %1702 = vmatprep.subr.bf16.mxu0 %v1990_v1  ;;  %v244_v26 = vrot.slane %v235_v15, 5  ;;  %v248_v27 = vrot.slane %v236_v16, 5  ;;  %v252_v28 = vrot.slane %v237_v17, 5  ;;  %v214_v39 = vcombine.low %v205_v11, %v2078_v12  ;;  %v1904_v41 = vld [vmem:[%s2453_s1] sm:$0xff]   ;;  %v1913_v45 = vld [vmem:[%s2453_s1 + $0x238] sm:$0xff]   ;;  %v1914_v46 = vld [vmem:[%s2453_s1 + $0x1b0] sm:$0xff]  }
  0x13   : > { %1722 = vmatprep.subr.bf16.mxu1 %v1990_v1  ;;  %v256_v29 = vrot.slane %v238_v20, 5  ;;  %v215_v40 = vcombine.low %v2081_v13, %v2084_v14  ;;  %v1915_v47 = vld [vmem:[%s2453_s1 + $0x230] sm:$0xff]   ;;  %v1916_v48 = vld [vmem:[%s2453_s1 + $0x1a8] sm:$0xff]   ;;  %v1918_v50 = vld [vmem:[%s2453_s1 + $0x1a0] sm:$0xff]   ;;  %v459_v63 = vcombine.low %v2078_v12, %v2081_v13 }
  0x14   : > { %v245_v31 = vsel %vm2104_vm3, %v1391_v18, %v244_v26  ;;  %v2116_v32 = vsel %vm2104_vm3, %v1392_v21, %v248_v27  ;;  %v2120_v33 = vsel %vm2104_vm3, %v1393_v22, %v252_v28  ;;  %v1917_v49 = vld [vmem:[%s2453_s1 + $0x228] sm:$0xff]   ;;  %v1919_v51 = vld [vmem:[%s2453_s1 + $0x220] sm:$0xff]   ;;  %v1920_v53 = vld [vmem:[%s2453_s1 + $0x198] sm:$0xff]  }
  0x15   : > { %1703 = vmatpush3.bf16.msra.mxu0 %v1893_v5  ;;  %v2124_v34 = vsel %vm2104_vm3, %v1394_v23, %v256_v29  ;;  %v258_v36 = vcombine.low %v245_v31, %v2116_v32  ;;  %v218_v43 = vpack.c.bf16 %v215_v40, %v214_v39  ;;  %v209_v52 = vld [vmem:[%s2066_s11 + $0x20] sm:$0x1f]  ;;  %v1921_v55 = vld [vmem:[%s2453_s1 + $0x218] sm:$0xff]   ;;  %v1922_v56 = vld [vmem:[%s2453_s1 + $0x190] sm:$0xff]   ;;  %v577_v2 = vcombine.low %v2116_v32, %v2120_v33 }
  0x16   : > { %1723 = vmatpush3.bf16.msra.mxu1 %v1894_v6  ;;  %1704 = vmatprep.subr.bf16.mxu0 %v1990_v1  ;;  %v259_v37 = vcombine.low %v2120_v33, %v2124_v34  ;;  %v572_v54 = vcombine.high %v209_v52, %v209_v52  ;;  %v1451_v57 = vrot.slane %v209_v52, 9  ;;  %v1923_v59 = vld [vmem:[%s2453_s1 + $0x210] sm:$0xff]   ;;  %v1924_v60 = vld [vmem:[%s2453_s1 + $0x188] sm:$0xff]   ;;  %v460_v0 = vcombine.low %v2084_v14, %v209_v52  ;;  %v1926_v4 = vld [vmem:[%s2453_s1 + $0x180] sm:$0xff]  }
  0x17   : > { %1724 = vmatprep.subr.bf16.mxu1 %v1990_v1  ;;  %v1925_v62 = vld [vmem:[%s2453_s1 + $0x208] sm:$0xff]   ;;  %v1927_v5 = vld [vmem:[%s2453_s1 + $0x200] sm:$0xff]   ;;  %v1933_v11 = vld [vmem:[%s2453_s1 + $0x1f0] sm:$0xff]  }
  0x18   : > { %v262_v42 = vpack.c.bf16 %v259_v37, %v258_v36  ;;  %v575_v58 = vrot.slane %v572_v54, 5  ;;  %v463_v6 = vpack.c.bf16 %v460_v0, %v459_v63  ;;  %v2241_v12 = vld [vmem:[%s2066_s11 + $0x50] sm:$0x1f]  ;;  %v2246_v13 = vld [vmem:[%s2066_s11 + $0x58] sm:$0x1f]  ;;  %v1934_v17 = vld [vmem:[%s2453_s1 + $0x68] sm:$0xff]  }
  0x19   : > { %1705 = vmatpush3.bf16.msra.mxu0 %v1895_v7  ;;  %v1930_v7 = vld [vmem:[%s2453_s1 + $0x78] sm:$0xff]   ;;  %v2249_v14 = vld [vmem:[%s2066_s11 + $0x60] sm:$0x1f]  ;;  %v2252_v15 = vld [vmem:[%s2066_s11 + $0x68] sm:$0x1f]  ;;  %v1049_v16 = vcombine.high %v2241_v12, %v2241_v12  ;;  %v1050_v18 = vcombine.high %v2246_v13, %v2246_v13  ;;  %v1557_v22 = vrot.slane %v2241_v12, 9 }
  0x1a   : > { %1725 = vmatpush3.bf16.msra.mxu1 %v1896_v8  ;;  %1706 = vmatprep.subr.bf16.mxu0 %v1990_v1  ;;  %v576_v61 = vsel %vm2104_vm3, %v1451_v57, %v575_v58  ;;  %v1935_v20 = vld [vmem:[%s2453_s1 + $0x1e8] sm:$0xff]   ;;  %v1052_v21 = vcombine.high %v2252_v15, %v2252_v15  ;;  %v1559_v27 = vrot.slane %v2249_v14, 9  ;;  %v1560_v29 = vrot.slane %v2252_v15, 9  ;;  %v1936_v32 = vld [vmem:[%s2453_s1 + $0x60] sm:$0xff]   ;;  %v1938_v39 = vld [vmem:[%s2453_s1 + $0x58] sm:$0xff]  }
  0x1b   : > { %1726 = vmatprep.subr.bf16.mxu1 %v1990_v1  ;;  %v578_v3 = vcombine.low %v2124_v34, %v576_v61  ;;  %v1055_v23 = vrot.slane %v1049_v16, 5  ;;  %v1059_v26 = vrot.slane %v1050_v18, 5  ;;  %v1939_v40 = vld [vmem:[%s2453_s1 + $0x1d8] sm:$0xff]   ;;  %v1940_v25 = vld [vmem:[%s2453_s1 + $0x50] sm:$0xff]   ;;  %v1944_v52 = vld [vmem:[%s2453_s1 + $0x40] sm:$0xff]  }
  0x1c   : > { %v1948_v57 = vld [vmem:[%s2453_s1 + $0xf8] sm:$0xff]   ;;  %v1953_v61 = vld [vmem:[%s2453_s1 + $0x170] sm:$0xff]   ;;  %v1955_v63 = vld [vmem:[%s2453_s1 + $0x168] sm:$0xff]  }
  0x1d   : > { %1707 = vmatpush3.bf16.msra.mxu0 %v1897_v9  ;;  %v581_v8 = vpack.c.bf16 %v578_v3, %v577_v2  ;;  %v1931_v9 = vld [vmem:[%s2453_s1 + $0x1f8] sm:$0xff]   ;;  %v1056_v31 = vsel %vm2104_vm3, %v1557_v22, %v1055_v23  ;;  %v1956_v0 = vld [vmem:[%s2453_s1 + $0xe0] sm:$0xff]   ;;  %v1981_v22 = vld [vmem:[%s2066_s11 + $0x88] ss:$8 sps:$4 sm:$0xff]  }
  0x1e   : > { %1727 = vmatpush3.bf16.msra.mxu1 %v1898_v10  ;;  %1708 = vmatprep.subr.bf16.mxu0 %v1990_v1  ;;  %v1932_v10 = vld [vmem:[%s2453_s1 + $0x70] sm:$0xff]   ;;  %v1957_v2 = vld [vmem:[%s2453_s1 + $0x160] sm:$0xff]   ;;  %v1958_v3 = vld [vmem:[%s2453_s1 + $0xd8] sm:$0xff]  }
  0x1f   : > { %1728 = vmatprep.subr.bf16.mxu1 %v1990_v1  ;;  %v1965_v16 = vld [vmem:[%s2453_s1 + $0x140] sm:$0xff]   ;;  %v1976_v18 = vld [vmem:[%s2453_s1 + $0x118] sm:$0xff]  }
  0x20   : > { %v1979_v23 = vld [vmem:[%s2453_s1 + $0x100] sm:$0xff]  }
  0x21   : > { %1709 = vmatpush3.bf16.msra.mxu0 %v1899_v19  ;;  %v1051_v19 = vcombine.high %v2249_v14, %v2249_v14 }
  0x22   : > { %1729 = vmatpush3.bf16.msra.mxu1 %v1900_v24  ;;  %1710 = vmatprep.subr.bf16.mxu0 %v1990_v1  ;;  %v1558_v24 = vrot.slane %v2246_v13, 9 }
  0x23   : > { %1730 = vmatprep.subr.bf16.mxu1 %v1990_v1  ;;  %v1063_v28 = vrot.slane %v1051_v19, 5  ;;  %v1977_v19 = vld [vmem:[%s2453_s1 + $0x110] sm:$0xff]  }
  0x24   : > { %v1060_v33 = vsel %vm2104_vm3, %v1558_v24, %v1059_v26 }
  0x25   : > { %1711 = vmatpush3.bf16.msra.mxu0 %v1901_v30  ;;  %v1067_v30 = vrot.slane %v1052_v21, 5  ;;  %v1064_v34 = vsel %vm2104_vm3, %v1559_v27, %v1063_v28  ;;  %v1069_v37 = vcombine.low %v1056_v31, %v1060_v33  ;;  %v1980_v21 = vld [vmem:[%s2066_s11 + $0x78] ss:$8 sps:$4 sm:$0xff]  }
  0x26   : > { %1731 = vmatpush3.bf16.msra.mxu1 %v1902_v35  ;;  %1712 = vmatprep.subr.bf16.mxu0 %v1990_v1  ;;  %v1937_v35 = vld [vmem:[%s2453_s1 + $0x1e0] sm:$0xff]   ;;  %v1195_v24 = vpack.c.bf16 %v1981_v22, %v1980_v21 }
  0x27   : > { %1732 = vmatprep.subr.bf16.mxu1 %v1990_v1  ;;  %v1068_v36 = vsel %vm2104_vm3, %v1560_v29, %v1067_v30 }
  0x29   : > { %1713 = vmatpush3.bf16.msra.mxu0 %v1903_v38  ;;  %v1070_v38 = vcombine.low %v1064_v34, %v1068_v36 }
  0x2a   : > { %1733 = vmatpush3.bf16.msra.mxu1 %v1904_v41  ;;  %1738 = vmatprep.subr.bf16.mxu0 %v1990_v1 }
  0x2b   : > { %1758 = vmatprep.subr.bf16.mxu1 %v1990_v1  ;;  %v2296_v41 = vpack.c.bf16 %v1070_v38, %v1069_v37 }
  0x2c   : > { %1715 = vmatmul.mubr.bf16.vlgmr.msra.gmra.mxu0 %v262_v42  ;;  %v1941_v42 = vld [vmem:[%s2453_s1 + $0x1d0] sm:$0xff]  }
  0x2d   : > { %1735 = vmatmul.mubr.bf16.vlgmr.msra.gmra.mxu1 %v218_v43  ;;  %1739 = vmatpush3.bf16.msra.mxu0 %v1912_v44  ;;  %v1942_v43 = vld [vmem:[%s2453_s1 + $0x48] sm:$0xff]  }
  0x2e   : > { %1759 = vmatpush3.bf16.msra.mxu1 %v1913_v45  ;;  %1740 = vmatprep.subr.bf16.mxu0 %v1990_v1  ;;  %v1476_v44 = vld [vmem:[%s2066_s11 + $0x28] sm:$0x1f]  ;;  %v1477_v45 = vld [vmem:[%s2066_s11 + $0x30] sm:$0x1f] }
  0x2f   : > { %1760 = vmatprep.subr.bf16.mxu1 %v1990_v1  ;;  %1754 = vmatprep.mubr.msk.bf16.mxu0 %vm1991_vm0, %v1990_v1 }
  0x30   : > { %1774 = vmatprep.mubr.msk.bf16.mxu1 %vm1991_vm0, %v1990_v1 }
  0x31   : > { %1741 = vmatpush3.bf16.msra.mxu0 %v1914_v46  ;;  %v1478_v46 = vld [vmem:[%s2066_s11 + $0x38] sm:$0x1f] }
  0x32   : > { %1761 = vmatpush3.bf16.msra.mxu1 %v1915_v47  ;;  %1742 = vmatprep.subr.bf16.mxu0 %v1990_v1  ;;  %v1479_v47 = vld [vmem:[%s2066_s11 + $0x40] sm:$0x1f] }
  0x33   : > { %1762 = vmatprep.subr.bf16.mxu1 %v1990_v1 }
  0x35   : > { %1743 = vmatpush3.bf16.msra.mxu0 %v1916_v48  ;;  %v1943_v48 = vld [vmem:[%s2453_s1 + $0x1c8] sm:$0xff]  }
  0x36   : > { %1763 = vmatpush3.bf16.msra.mxu1 %v1917_v49  ;;  %1744 = vmatprep.subr.bf16.mxu0 %v1990_v1  ;;  %v1480_v49 = vld [vmem:[%s2066_s11 + $0x48] sm:$0x1f]  ;;  %s1389_s11 = sshll.u32 %s1382_s16, 1 }
  0x37   : > { %1764 = vmatprep.subr.bf16.mxu1 %v1990_v1  ;;  %v815_v54 = vcombine.low %v1479_v47, %v1480_v49  ;;  %p199_p4 = scmp.lt.s32.totalorder %s1389_s11, 3 }
  0x39   : > { %1745 = vmatpush3.bf16.msra.mxu0 %v1918_v50  ;;  %v700_v50 = vcombine.low %v1476_v44, %v1477_v45  ;;  %s2462_s11 = smov (!%p199_p4, %s1389_s11), 3 }
  0x3a   : > { %1765 = vmatpush3.bf16.msra.mxu1 %v1919_v51  ;;  %1746 = vmatprep.subr.bf16.mxu0 %v1990_v1  ;;  %v701_v51 = vcombine.low %v1478_v46, %v1479_v47  ;;  %s1390_s16 = sshll.u32 %s2462_s11, 3 }
  0x3b   : > { %1766 = vmatprep.subr.bf16.mxu1 %v1990_v1  ;;  %s202_s7 = scalar_lea.vmem %s2456_s4, %s1390_s16 }
  0x3d   : > { %1747 = vmatpush3.bf16.msra.mxu0 %v1920_v53  ;;  %v814_v53 = vcombine.low %v1477_v45, %v1478_v46 }
  0x3e   : > { %1767 = vmatpush3.bf16.msra.mxu1 %v1921_v55  ;;  %1748 = vmatprep.subr.bf16.mxu0 %v1990_v1  ;;  %v1945_v55 = vld [vmem:[%s2453_s1 + $0x1c0] sm:$0xff]  }
  0x3f   : > { %1768 = vmatprep.subr.bf16.mxu1 %v1990_v1  ;;  %v818_v58 = vpack.c.bf16 %v815_v54, %v814_v53 }
  0x41   : > { %1749 = vmatpush3.bf16.msra.mxu0 %v1922_v56  ;;  %v704_v56 = vpack.c.bf16 %v701_v51, %v700_v50 }
  0x42   : > { %1769 = vmatpush3.bf16.msra.mxu1 %v1923_v59  ;;  %1750 = vmatprep.subr.bf16.mxu0 %v1990_v1  ;;  %v1951_v59 = vld [vmem:[%s2453_s1 + $0x178] sm:$0xff]  }
  0x43   : > { %1770 = vmatprep.subr.bf16.mxu1 %v1990_v1 }
  0x45   : > { %1751 = vmatpush3.bf16.msra.mxu0 %v1924_v60  ;;  %v1952_v60 = vld [vmem:[%s2453_s1 + $0xf0] sm:$0xff]  }
  0x46   : > { %1771 = vmatpush3.bf16.msra.mxu1 %v1925_v62  ;;  %1752 = vmatprep.subr.bf16.mxu0 %v1990_v1  ;;  %v1954_v62 = vld [vmem:[%s2453_s1 + $0xe8] sm:$0xff]  }
  0x47   : > { %1772 = vmatprep.subr.bf16.mxu1 %v1990_v1 }
  0x49   : > { %1753 = vmatpush3.bf16.msra.mxu0 %v1926_v4  ;;  %v1959_v4 = vld [vmem:[%s2453_s1 + $0x158] sm:$0xff]  }
  0x4a   : > { %1773 = vmatpush3.bf16.msra.mxu1 %v1927_v5  ;;  %1778 = vmatprep.subr.bf16.mxu0 %v1990_v1  ;;  %v1960_v5 = vld [vmem:[%s2453_s1 + $0xd0] sm:$0xff]  }
  0x4b   : > { %1798 = vmatprep.subr.bf16.mxu1 %v1990_v1 }
  0x4c   : > { %1755 = vmatmul.mubr.bf16.vlgmr.msra.gmra.mxu0 %v463_v6  ;;  %v1961_v6 = vld [vmem:[%s2453_s1 + $0x150] sm:$0xff]  }
  0x4d   : > { %1779 = vmatpush3.bf16.msra.mxu0 %v1930_v7  ;;  %1775 = vmatmul.mubr.bf16.vlgmr.msra.gmra.mxu1 %v581_v8  ;;  %v1962_v7 = vld [vmem:[%s2453_s1 + $0xc8] sm:$0xff]  }
  0x4e   : > { %1799 = vmatpush3.bf16.msra.mxu1 %v1931_v9  ;;  %1780 = vmatprep.subr.bf16.mxu0 %v1990_v1  ;;  %v1963_v8 = vld [vmem:[%s2453_s1 + $0x148] sm:$0xff]   ;;  %v936_v9 = vcombine.low %v2241_v12, %v2246_v13  ;;  %v1972_v12 = vld [vmem:[%s2453_s1 + $0x138] sm:$0xff]   ;;  %v1973_v13 = vld [vmem:[%s2453_s1 + $0x130] sm:$0xff]  }
  0x4f   : > { %1800 = vmatprep.subr.bf16.mxu1 %v1990_v1  ;;  %1794 = vmatprep.mubr.msk.bf16.mxu0 %vm1991_vm0, %v1990_v1 }
  0x50   : > { %1814 = vmatprep.mubr.msk.bf16.mxu1 %vm1991_vm0, %v1990_v1 }
  0x51   : > { %1781 = vmatpush3.bf16.msra.mxu0 %v1932_v10  ;;  %v937_v10 = vcombine.low %v2249_v14, %v2252_v15  ;;  %v1974_v14 = vld [vmem:[%s2453_s1 + $0x128] sm:$0xff]   ;;  %v1975_v15 = vld [vmem:[%s2453_s1 + $0x120] sm:$0xff]  }
  0x52   : > { %1801 = vmatpush3.bf16.msra.mxu1 %v1933_v11  ;;  %1782 = vmatprep.subr.bf16.mxu0 %v1990_v1  ;;  %v1964_v11 = vld [vmem:[%s2453_s1 + $0xc0] sm:$0xff]  }
  0x53   : > { %1802 = vmatprep.subr.bf16.mxu1 %v1990_v1 }
  0x55   : > { %1783 = vmatpush3.bf16.msra.mxu0 %v1934_v17  ;;  %v940_v17 = vpack.c.bf16 %v937_v10, %v936_v9  ;;  %v1614_v9 = vld [vmem:[%s2455_s3] ss:$0 sm:$0xff] }
  0x56   : > { %1803 = vmatpush3.bf16.msra.mxu1 %v1935_v20  ;;  %1784 = vmatprep.subr.bf16.mxu0 %v1990_v1  ;;  %v1978_v20 = vld [vmem:[%s2453_s1 + $0x108] sm:$0xff]  }
  0x57   : > { %1804 = vmatprep.subr.bf16.mxu1 %v1990_v1 }
  0x59   : > { %1785 = vmatpush3.bf16.msra.mxu0 %v1936_v32 }
  0x5a   : > { %1805 = vmatpush3.bf16.msra.mxu1 %v1937_v35  ;;  %1786 = vmatprep.subr.bf16.mxu0 %v1990_v1 }
  0x5b   : > { %1806 = vmatprep.subr.bf16.mxu1 %v1990_v1 }
  0x5d   : > { %1787 = vmatpush3.bf16.msra.mxu0 %v1938_v39 }
  0x5e   : > { %1807 = vmatpush3.bf16.msra.mxu1 %v1939_v40  ;;  %1788 = vmatprep.subr.bf16.mxu0 %v1990_v1 }
  0x5f   : > { %1808 = vmatprep.subr.bf16.mxu1 %v1990_v1 }
  0x61   : > { %1789 = vmatpush3.bf16.msra.mxu0 %v1940_v25 }
  0x62   : > { %1809 = vmatpush3.bf16.msra.mxu1 %v1941_v42  ;;  %1790 = vmatprep.subr.bf16.mxu0 %v1990_v1 }
  0x63   : > { %1810 = vmatprep.subr.bf16.mxu1 %v1990_v1 }
  0x65   : > { %1791 = vmatpush3.bf16.msra.mxu0 %v1942_v43 }
  0x66   : > { %1811 = vmatpush3.bf16.msra.mxu1 %v1943_v48  ;;  %1792 = vmatprep.subr.bf16.mxu0 %v1990_v1 }
  0x67   : > { %1812 = vmatprep.subr.bf16.mxu1 %v1990_v1 }
  0x69   : > { %1793 = vmatpush3.bf16.msra.mxu0 %v1944_v52 }
  0x6a   : > { %1813 = vmatpush3.bf16.msra.mxu1 %v1945_v55  ;;  %1818 = vmatprep.subr.bf16.mxu0 %v1990_v1 }
  0x6b   : > { %1838 = vmatprep.subr.bf16.mxu1 %v1990_v1 }
  0x6c   : > { %1795 = vmatmul.mubr.bf16.vlgmr.msra.gmra.mxu0 %v704_v56 }
  0x6d   : > { %1819 = vmatpush3.bf16.msra.mxu0 %v1948_v57  ;;  %1815 = vmatmul.mubr.bf16.vlgmr.msra.gmra.mxu1 %v818_v58 }
  0x6e   : > { %1839 = vmatpush3.bf16.msra.mxu1 %v1951_v59  ;;  %1820 = vmatprep.subr.bf16.mxu0 %v1990_v1 }
  0x6f   : > { %1840 = vmatprep.subr.bf16.mxu1 %v1990_v1  ;;  %1834 = vmatprep.mubr.msk.bf16.mxu0 %vm1991_vm0, %v1990_v1 }
  0x70   : > { %1854 = vmatprep.mubr.msk.bf16.mxu1 %vm1991_vm0, %v1990_v1 }
  0x71   : > { %1821 = vmatpush3.bf16.msra.mxu0 %v1952_v60 }
  0x72   : > { %1841 = vmatpush3.bf16.msra.mxu1 %v1953_v61  ;;  %1822 = vmatprep.subr.bf16.mxu0 %v1990_v1 }
  0x73   : > { %1842 = vmatprep.subr.bf16.mxu1 %v1990_v1 }
  0x75   : > { %1823 = vmatpush3.bf16.msra.mxu0 %v1954_v62 }
  0x76   : > { %1843 = vmatpush3.bf16.msra.mxu1 %v1955_v63  ;;  %1824 = vmatprep.subr.bf16.mxu0 %v1990_v1 }
  0x77   : > { %1844 = vmatprep.subr.bf16.mxu1 %v1990_v1 }
  0x79   : > { %1825 = vmatpush3.bf16.msra.mxu0 %v1956_v0 }
  0x7a   : > { %1845 = vmatpush3.bf16.msra.mxu1 %v1957_v2  ;;  %1826 = vmatprep.subr.bf16.mxu0 %v1990_v1 }
  0x7b   : > { %1846 = vmatprep.subr.bf16.mxu1 %v1990_v1 }
  0x7d   : > { %1827 = vmatpush3.bf16.msra.mxu0 %v1958_v3 }
  0x7e   : > { %1847 = vmatpush3.bf16.msra.mxu1 %v1959_v4  ;;  %1828 = vmatprep.subr.bf16.mxu0 %v1990_v1 }
  0x7f   : > { %1848 = vmatprep.subr.bf16.mxu1 %v1990_v1 }
  0x81   : > { %1829 = vmatpush3.bf16.msra.mxu0 %v1960_v5 }
  0x82   : > { %1849 = vmatpush3.bf16.msra.mxu1 %v1961_v6  ;;  %1830 = vmatprep.subr.bf16.mxu0 %v1990_v1 }
  0x83   : > { %1850 = vmatprep.subr.bf16.mxu1 %v1990_v1 }
  0x85   : > { %1831 = vmatpush3.bf16.msra.mxu0 %v1962_v7  ;;  %v1613_v7 = vld [vmem:[%s2454_s2] ss:$0 sm:$0xff] }
  0x86   : > { %1851 = vmatpush3.bf16.msra.mxu1 %v1963_v8  ;;  %1832 = vmatprep.subr.bf16.mxu0 %v1990_v1 }
  0x87   : > { %1852 = vmatprep.subr.bf16.mxu1 %v1990_v1 }
  0x89   : > { %1833 = vmatpush3.bf16.msra.mxu0 %v1964_v11 }
  0x8a   : > { %1853 = vmatpush3.bf16.msra.mxu1 %v1965_v16  ;;  %1858 = vmatprep.subr.bf16.mxu0 %v1990_v1 }
  0x8c   : > { %1835 = vmatmul.mubr.bf16.vlgmr.msra.gmra.mxu0 %v940_v17 }
  0x8d   : > { %1859 = vmatpush3.bf16.msra.mxu0 %v1972_v12  ;;  %1855 = vmatmul.mubr.bf16.vlgmr.msra.gmra.mxu1 %v2296_v41 }
  0x8e   : > { %1860 = vmatprep.subr.bf16.mxu0 %v1990_v1  ;;  %1874 = vmatprep.mubr.msk.bf16.mxu0 %vm1991_vm0, %v1990_v1 }
  0x91   : > { %1861 = vmatpush3.bf16.msra.mxu0 %v1973_v13 }
  0x92   : > { %1862 = vmatprep.subr.bf16.mxu0 %v1990_v1 }
  0x95   : > { %1863 = vmatpush3.bf16.msra.mxu0 %v1974_v14 }
  0x96   : > { %1864 = vmatprep.subr.bf16.mxu0 %v1990_v1 }
  0x99   : > { %1865 = vmatpush3.bf16.msra.mxu0 %v1975_v15 }
  0x9a   : > { %1866 = vmatprep.subr.bf16.mxu0 %v1990_v1 }
  0x9d   : > { %1867 = vmatpush3.bf16.msra.mxu0 %v1976_v18 }
  0x9e   : > { %1868 = vmatprep.subr.bf16.mxu0 %v1990_v1 }
  0xa1   : > { %1869 = vmatpush3.bf16.msra.mxu0 %v1977_v19 }
  0xa2   : > { %1870 = vmatprep.subr.bf16.mxu0 %v1990_v1 }
  0xa5   : > { %1871 = vmatpush3.bf16.msra.mxu0 %v1978_v20 }
  0xa6   : > { %1872 = vmatprep.subr.bf16.mxu0 %v1990_v1 }
  0xa9   : > { %1873 = vmatpush3.bf16.msra.mxu0 %v1979_v23 }
  0xac   : > { %1875 = vmatmul.mubr.bf16.vlgmr.msra.gmra.mxu0 %v1195_v24 }
  0xec   : > { %v362_v26 = vpop.f32.mrf.mxu0 }
  0xed   : > { %v451_v27 = vpop.f32.mrf.mxu1 }
  0xee   : > { %v452_v28 = vadd.f32 %v451_v27, %v362_v26  ;;  %v1716_v29 = vpop.f32.mrf.mxu0 }
  0xef   : > { %v1736_v30 = vpop.f32.mrf.mxu1 }
  0xf0   : > { %v365_v31 = vpop.f32.mrf.mxu0 }
  0xf1   : > { %v454_v32 = vpop.f32.mrf.mxu1 }
  0xf2   : > { %v455_v33 = vadd.f32 %v454_v32, %v365_v31  ;;  %v1717_v34 = vpop.f32.mrf.mxu0 }
  0xf3   : > { %v1737_v35 = vpop.f32.mrf.mxu1 }
 0x10c   : > { %v563_v36 = vpop.f32.mrf.mxu0 }
 0x10d   : > { %v570_v37 = vadd.f32 %v563_v36, %v452_v28  ;;  %v681_v38 = vpop.f32.mrf.mxu1 }
 0x10e   : > { %v1756_v39 = vpop.f32.mrf.mxu0 }
 0x10f   : > { %v688_v40 = vadd.f32 %v681_v38, %v570_v37  ;;  %v1776_v41 = vpop.f32.mrf.mxu1 }
 0x110   : > { %v566_v1 = vpop.f32.mrf.mxu0 }
 0x111   : > { %v571_v25 = vadd.f32 %v566_v1, %v455_v33  ;;  %v684_v42 = vpop.f32.mrf.mxu1 }
 0x112   : > { %v1757_v43 = vpop.f32.mrf.mxu0 }
 0x113   : > { %v689_v44 = vadd.f32 %v684_v42, %v571_v25  ;;  %v1777_v45 = vpop.f32.mrf.mxu1 }
 0x12c   : > { %v804_v46 = vpop.f32.mrf.mxu0 }
 0x12d   : > { %v918_v47 = vpop.f32.mrf.mxu1  ;;  %v811_v62 = vadd.f32 %v804_v46, %v688_v40 }
 0x12e   : > { %v1796_v48 = vpop.f32.mrf.mxu0 }
 0x12f   : > { %v1816_v49 = vpop.f32.mrf.mxu1  ;;  %v925_v63 = vadd.f32 %v918_v47, %v811_v62 }
 0x130   : > { %v807_v50 = vpop.f32.mrf.mxu0 }
 0x131   : > { %v921_v51 = vpop.f32.mrf.mxu1  ;;  %v812_v0 = vadd.f32 %v807_v50, %v689_v44 }
 0x132   : > { %v1797_v52 = vpop.f32.mrf.mxu0 }
 0x133   : > { %v1817_v53 = vpop.f32.mrf.mxu1  ;;  %v926_v3 = vadd.f32 %v921_v51, %v812_v0 }
 0x14c   : > { %v1040_v54 = vpop.f32.mrf.mxu0 }
 0x14d   : > { %v1173_v55 = vpop.f32.mrf.mxu1  ;;  %v1047_v2 = vadd.f32 %v1040_v54, %v925_v63 }
 0x14e   : > { %v1836_v56 = vpop.f32.mrf.mxu0 }
 0x14f   : > { %v1856_v57 = vpop.f32.mrf.mxu1  ;;  %v1180_v4 = vadd.f32 %v1173_v55, %v1047_v2 }
 0x150   : > { %v1043_v58 = vpop.f32.mrf.mxu0 }
 0x151   : > { %v1176_v59 = vpop.f32.mrf.mxu1  ;;  %v1048_v5 = vadd.f32 %v1043_v58, %v926_v3 }
 0x152   : > { %v1837_v60 = vpop.f32.mrf.mxu0 }
 0x153   : > { %v1857_v61 = vpop.f32.mrf.mxu1  ;;  %v1181_v11 = vadd.f32 %v1176_v59, %v1048_v5 }
 0x16c   : > { %v1295_v6 = vpop.f32.mrf.mxu0 }
 0x16d   : > { %v1302_v8 = vadd.f32 %v1295_v6, %v1180_v4 }
 0x16e   : > { %v1876_v10 = vpop.f32.mrf.mxu0 }
 0x16f   : > { %v1311_v16 = vmul.f32 %v1613_v7, %v1302_v8 }
 0x170   : > { %v1298_v17 = vpop.f32.mrf.mxu0 }
 0x171   : > { %v1320_v12 = vadd.f32 %v1614_v9, %v1311_v16  ;;  %v1303_v13 = vadd.f32 %v1298_v17, %v1181_v11 }
 0x172   : > { %v1877_v14 = vpop.f32.mrf.mxu0 }
 0x173   : > { %v1322_v15 = vmax.f32 %v1320_v12, 0.0  ;;  %v1312_v18 = vmul.f32 %v1613_v7, %v1303_v13 }
 0x175   : > { %1324 = vst [vmem:[%s202_s7] sm:$0xff] %v1322_v15  ;;  %v1321_v19 = vadd.f32 %v1614_v9, %v1312_v18 }
 0x177   : > { %v1323_v20 = vmax.f32 %v1321_v19, 0.0 }
 0x179   : > { %1325 = vst [vmem:[%s202_s7 + $0x8] sm:$0xff] %v1323_v20 }
 0x17a PF: > { %s14_s15 = sadd.s32 1, %s1988_s15  }
 0x17b   : > { %p11_p5 = scmp.ge.s32.totalorder %s14_s15, 4  }
 0x17d   :  { %13 = sbr.rel (!%p11_p5) target bundleno = 1 (0x1), region = 77 }

// kernel: encoder_forward_pallas.7
= control target key start
LH: loop header
LB: loop body
LE: loop exit
PB: predicated region body
PF: predicated region fallthrough
CT: control target
= control target key end

     0   :  { %v28_v28 = vlaneseq  ;;  %v1951_v36 = vmov 1983009808   ;;  %s2385_s0 = inlined_call_operand.vmem [shape: f32[2,2048], index: 0, kind: input, shape index: {}]   ;;  %s2386_s1 = inlined_call_operand.vmem [shape: bf16[2048,128], index: 1, kind: input, shape index: {}]   ;;  %s2387_s2 = inlined_call_operand.vmem [shape: f32[1,128], index: 2, kind: input, shape index: {}]   ;;  %s2388_s3 = inlined_call_operand.hbm [shape: f32[2,128], index: 3, kind: output, shape index: {}]  }
   0x1   :  { %v1797_v0 = vld [vmem:[%s2386_s1 + $0x78] sm:$0xff]   ;;  %v1801_v4 = vld [vmem:[%s2386_s1 + $0x70] sm:$0xff]   ;;  %v1805_v8 = vld [vmem:[%s2386_s1 + $0x68] sm:$0xff]   ;;  %v26_v37 = vunpack.c.l.s4 %v1951_v36 }
   0x2   :  { %v1798_v1 = vld [vmem:[%s2386_s1 + $0xf8] sm:$0xff]   ;;  %1619 = vmatprep.subr.bf16.mxu0 %v1797_v0  ;;  %v1802_v5 = vld [vmem:[%s2386_s1 + $0xf0] sm:$0xff]   ;;  %v1806_v9 = vld [vmem:[%s2386_s1 + $0xe8] sm:$0xff]   ;;  %v29_v33 = vshrl.u32 %v28_v28, 7 }
   0x3   :  { %v1799_v2 = vld [vmem:[%s2386_s1 + $0x38] sm:$0xff]   ;;  %1641 = vmatprep.subr.bf16.mxu1 %v1798_v1  ;;  %v1803_v6 = vld [vmem:[%s2386_s1 + $0x30] sm:$0xff]   ;;  %v1807_v10 = vld [vmem:[%s2386_s1 + $0x28] sm:$0xff]   ;;  %v27_v39 = vunpack.c.0.s8 %v26_v37 }
   0x4   :  { %v1800_v3 = vld [vmem:[%s2386_s1 + $0xb8] sm:$0xff]   ;;  %1620 = vmatpush3.bf16.msra.mxu0 %v1799_v2  ;;  %v1804_v7 = vld [vmem:[%s2386_s1 + $0xb0] sm:$0xff]   ;;  %v1808_v11 = vld [vmem:[%s2386_s1 + $0xa8] sm:$0xff]  }
   0x5   :  { %1642 = vmatpush3.bf16.msra.mxu1 %v1800_v3  ;;  %1621 = vmatprep.subr.bf16.mxu0 %v1801_v4  ;;  %v1809_v12 = vld [vmem:[%s2386_s1 + $0x60] sm:$0xff]   ;;  %v1813_v16 = vld [vmem:[%s2386_s1 + $0x58] sm:$0xff]   ;;  %v1817_v20 = vld [vmem:[%s2386_s1 + $0x50] sm:$0xff]   ;;  %v2078_v41 = vsub.s32 %v27_v39, %v29_v33 }
   0x6   :  { %1643 = vmatprep.subr.bf16.mxu1 %v1802_v5  ;;  %v1810_v13 = vld [vmem:[%s2386_s1 + $0xe0] sm:$0xff]   ;;  %v1814_v17 = vld [vmem:[%s2386_s1 + $0xd8] sm:$0xff]   ;;  %v1818_v21 = vld [vmem:[%s2386_s1 + $0xd0] sm:$0xff]  }
   0x7   :  { %v1811_v14 = vld [vmem:[%s2386_s1 + $0x20] sm:$0xff]   ;;  %v1815_v18 = vld [vmem:[%s2386_s1 + $0x18] sm:$0xff]   ;;  %v1819_v22 = vld [vmem:[%s2386_s1 + $0x10] sm:$0xff]  }
   0x8   :  { %1622 = vmatpush3.bf16.msra.mxu0 %v1803_v6  ;;  %v1812_v15 = vld [vmem:[%s2386_s1 + $0xa0] sm:$0xff]   ;;  %v1816_v19 = vld [vmem:[%s2386_s1 + $0x98] sm:$0xff]   ;;  %v1820_v23 = vld [vmem:[%s2386_s1 + $0x90] sm:$0xff]  }
   0x9   :  { %1644 = vmatpush3.bf16.msra.mxu1 %v1804_v7  ;;  %1623 = vmatprep.subr.bf16.mxu0 %v1805_v8  ;;  %v1821_v24 = vld [vmem:[%s2386_s1 + $0x48] sm:$0xff]   ;;  %v1825_v29 = vld [vmem:[%s2386_s1 + $0x40] sm:$0xff]   ;;  %v1830_v35 = vld [vmem:[%s2386_s1 + $0x178] sm:$0xff]  }
   0xa   :  { %1645 = vmatprep.subr.bf16.mxu1 %v1806_v9  ;;  %v1822_v25 = vld [vmem:[%s2386_s1 + $0xc8] sm:$0xff]   ;;  %v1826_v30 = vld [vmem:[%s2386_s1 + $0xc0] sm:$0xff]   ;;  %v1831_v38 = vld [vmem:[%s2386_s1 + $0x1f8] sm:$0xff]  }
   0xb   :  { %v1823_v26 = vld [vmem:[%s2386_s1 + $0x8] sm:$0xff]   ;;  %v1827_v31 = vld [vmem:[%s2386_s1] sm:$0xff]   ;;  %v1832_v46 = vld [vmem:[%s2386_s1 + $0x138] sm:$0xff]  }
   0xc   :  { %1624 = vmatpush3.bf16.msra.mxu0 %v1807_v10  ;;  %v1824_v27 = vld [vmem:[%s2386_s1 + $0x88] sm:$0xff]   ;;  %v1828_v32 = vld [vmem:[%s2386_s1 + $0x80] sm:$0xff]   ;;  %v1833_v49 = vld [vmem:[%s2386_s1 + $0x1b8] sm:$0xff]  }
   0xd   :  { %1646 = vmatpush3.bf16.msra.mxu1 %v1808_v11  ;;  %1625 = vmatprep.subr.bf16.mxu0 %v1809_v12  ;;  %v16_v34 = vld [vmem:[%s2385_s0] sm:$0xff]  ;;  %v1834_v52 = vld [vmem:[%s2386_s1 + $0x170] sm:$0xff]   ;;  %v1838_v56 = vld [vmem:[%s2386_s1 + $0x168] sm:$0xff]  }
   0xe   :  { %1647 = vmatprep.subr.bf16.mxu1 %v1810_v13  ;;  %v24_v40 = vcombine.high %v16_v34, %v16_v34  ;;  %v31_v42 = vrot.slane %v16_v34, %v2078_v41  ;;  %v1835_v53 = vld [vmem:[%s2386_s1 + $0x1f0] sm:$0xff]   ;;  %v1839_v57 = vld [vmem:[%s2386_s1 + $0x1e8] sm:$0xff]   ;;  %v1842_v60 = vld [vmem:[%s2386_s1 + $0x160] sm:$0xff]  }
   0xf   :  { %v1836_v54 = vld [vmem:[%s2386_s1 + $0x130] sm:$0xff]   ;;  %v1840_v58 = vld [vmem:[%s2386_s1 + $0x128] sm:$0xff]   ;;  %v1843_v61 = vld [vmem:[%s2386_s1 + $0x1e0] sm:$0xff]  }
  0x10   :  { %1626 = vmatpush3.bf16.msra.mxu0 %v1811_v14  ;;  %v38_v43 = vrot.slane %v24_v40, %v2078_v41  ;;  %v39_v44 = vcombine.high %v31_v42, %v31_v42  ;;  %v108_v47 = vpack.c.bf16 %v31_v42, %v31_v42  ;;  %v1837_v55 = vld [vmem:[%s2386_s1 + $0x1b0] sm:$0xff]   ;;  %v1841_v59 = vld [vmem:[%s2386_s1 + $0x1a8] sm:$0xff]   ;;  %v1844_v62 = vld [vmem:[%s2386_s1 + $0x120] sm:$0xff]  }
  0x11   :  { %1648 = vmatpush3.bf16.msra.mxu1 %v1812_v15  ;;  %1627 = vmatprep.subr.bf16.mxu0 %v1813_v16  ;;  %v1845_v63 = vld [vmem:[%s2386_s1 + $0x1a0] sm:$0xff]   ;;  %v1846_v0 = vld [vmem:[%s2386_s1 + $0x158] sm:$0xff]   ;;  %v1850_v4 = vld [vmem:[%s2386_s1 + $0x150] sm:$0xff]  }
  0x12   :  { %1649 = vmatprep.subr.bf16.mxu1 %v1814_v17  ;;  %v40_v45 = vcombine.high %v38_v43, %v38_v43  ;;  %v110_v48 = vpack.c.bf16 %v38_v43, %v38_v43  ;;  %v109_v50 = vpack.c.bf16 %v39_v44, %v39_v44  ;;  %v1847_v1 = vld [vmem:[%s2386_s1 + $0x1d8] sm:$0xff]   ;;  %v1851_v5 = vld [vmem:[%s2386_s1 + $0x1d0] sm:$0xff]   ;;  %v1854_v8 = vld [vmem:[%s2386_s1 + $0x148] sm:$0xff]  }
  0x13   :  { %v1848_v2 = vld [vmem:[%s2386_s1 + $0x118] sm:$0xff]   ;;  %v1852_v6 = vld [vmem:[%s2386_s1 + $0x110] sm:$0xff]   ;;  %v1855_v9 = vld [vmem:[%s2386_s1 + $0x1c8] sm:$0xff]  }
  0x14   :  { %1628 = vmatpush3.bf16.msra.mxu0 %v1815_v18  ;;  %v111_v51 = vpack.c.bf16 %v40_v45, %v40_v45  ;;  %1187 = vmatprep.mubr.bf16.mxu0 %v109_v50  ;;  %v1849_v3 = vld [vmem:[%s2386_s1 + $0x198] sm:$0xff]   ;;  %v1853_v7 = vld [vmem:[%s2386_s1 + $0x190] sm:$0xff]   ;;  %v17_v10 = vld [vmem:[%s2385_s0 + $0x8] sm:$0xff] }
  0x15   :  { %1650 = vmatpush3.bf16.msra.mxu1 %v1816_v19  ;;  %1629 = vmatprep.subr.bf16.mxu0 %v1817_v20  ;;  %v1856_v11 = vld [vmem:[%s2386_s1 + $0x108] sm:$0xff]   ;;  %v48_v12 = vrot.slane %v17_v10, %v2078_v41  ;;  %v41_v13 = vcombine.high %v17_v10, %v17_v10  ;;  %v1858_v15 = vld [vmem:[%s2386_s1 + $0x140] sm:$0xff]   ;;  %v1870_v33 = vld [vmem:[%s2386_s1 + $0x2b0] sm:$0xff]  }
  0x16   :  { %1651 = vmatprep.subr.bf16.mxu1 %v1818_v21  ;;  %1227 = vmatprep.mubr.bf16.mxu1 %v111_v51  ;;  %v1857_v14 = vld [vmem:[%s2386_s1 + $0x188] sm:$0xff]   ;;  %v1859_v18 = vld [vmem:[%s2386_s1 + $0x1c0] sm:$0xff]   ;;  %v1879_v43 = vld [vmem:[%s2386_s1 + $0x258] sm:$0xff]  }
  0x17   :  { %v56_v16 = vcombine.high %v48_v12, %v48_v12  ;;  %v55_v17 = vrot.slane %v41_v13, %v2078_v41  ;;  %v1860_v19 = vld [vmem:[%s2386_s1 + $0x100] sm:$0xff]   ;;  %v1871_v34 = vld [vmem:[%s2386_s1 + $0x268] sm:$0xff]   ;;  %v1880_v44 = vld [vmem:[%s2386_s1 + $0x2d8] sm:$0xff]  }
  0x18   :  { %1630 = vmatpush3.bf16.msra.mxu0 %v1819_v22  ;;  %v1861_v22 = vld [vmem:[%s2386_s1 + $0x180] sm:$0xff]   ;;  %v1873_v36 = vld [vmem:[%s2386_s1 + $0x228] sm:$0xff]   ;;  %v1881_v45 = vld [vmem:[%s2386_s1 + $0x218] sm:$0xff]  }
  0x19   :  { %1652 = vmatpush3.bf16.msra.mxu1 %v1820_v23  ;;  %1631 = vmatprep.subr.bf16.mxu0 %v1821_v24  ;;  %v113_v20 = vpack.c.bf16 %v56_v16, %v56_v16  ;;  %v57_v21 = vcombine.high %v55_v17, %v55_v17  ;;  %v1863_v24 = vld [vmem:[%s2386_s1 + $0x278] sm:$0xff]   ;;  %v114_v28 = vpack.c.bf16 %v55_v17, %v55_v17  ;;  %v1874_v37 = vld [vmem:[%s2386_s1 + $0x2a8] sm:$0xff]   ;;  %v1876_v39 = vld [vmem:[%s2386_s1 + $0x2e0] sm:$0xff]  }
  0x1a   :  { %1653 = vmatprep.subr.bf16.mxu1 %v1822_v25  ;;  %v1864_v25 = vld [vmem:[%s2386_s1 + $0x2f8] sm:$0xff]   ;;  %v1877_v40 = vld [vmem:[%s2386_s1 + $0x220] sm:$0xff]   ;;  %v1886_v50 = vld [vmem:[%s2386_s1 + $0x290] sm:$0xff]  }
  0x1b   :  { %v115_v23 = vpack.c.bf16 %v57_v21, %v57_v21  ;;  %v1878_v42 = vld [vmem:[%s2386_s1 + $0x2a0] sm:$0xff]   ;;  %v1887_v51 = vld [vmem:[%s2386_s1 + $0x248] sm:$0xff]   ;;  %v1901_v10 = vld [vmem:[%s2386_s1 + $0x3f0] sm:$0xff]  }
  0x1c   :  { %1632 = vmatpush3.bf16.msra.mxu0 %v1823_v26  ;;  %v1865_v26 = vld [vmem:[%s2386_s1 + $0x238] sm:$0xff]   ;;  %v1904_v13 = vld [vmem:[%s2386_s1 + $0x368] sm:$0xff]   ;;  %v1908_v17 = vld [vmem:[%s2386_s1 + $0x360] sm:$0xff]  }
  0x1d   :  { %1654 = vmatpush3.bf16.msra.mxu1 %v1824_v27  ;;  %1633 = vmatprep.subr.bf16.mxu0 %v1825_v29  ;;  %v112_v27 = vpack.c.bf16 %v48_v12, %v48_v12  ;;  %v1866_v29 = vld [vmem:[%s2386_s1 + $0x2b8] sm:$0xff]   ;;  %v1903_v12 = vld [vmem:[%s2386_s1 + $0x3b0] sm:$0xff]   ;;  %v1907_v16 = vld [vmem:[%s2386_s1 + $0x3a8] sm:$0xff]  }
  0x1e   :  { %1655 = vmatprep.subr.bf16.mxu1 %v1826_v30  ;;  %v1867_v30 = vld [vmem:[%s2386_s1 + $0x270] sm:$0xff]   ;;  %v1912_v21 = vld [vmem:[%s2386_s1 + $0x358] sm:$0xff]  }
  0x20   :  { %1634 = vmatpush3.bf16.msra.mxu0 %v1827_v31  ;;  %v1868_v31 = vld [vmem:[%s2386_s1 + $0x2f0] sm:$0xff]  }
  0x21   :  { %1656 = vmatpush3.bf16.msra.mxu1 %v1828_v32  ;;  %1663 = vmatprep.subr.bf16.mxu0 %v1830_v35  ;;  %v1869_v32 = vld [vmem:[%s2386_s1 + $0x230] sm:$0xff]   ;;  %v1872_v35 = vld [vmem:[%s2386_s1 + $0x2e8] sm:$0xff]  }
  0x22   :  { %1685 = vmatprep.subr.bf16.mxu1 %v1831_v38  ;;  %v1875_v38 = vld [vmem:[%s2386_s1 + $0x260] sm:$0xff]  }
  0x23   :  { %1188 = vmatmul.mubr.bf16.vlgmr.msra.gmra.mxu0 %v108_v47  ;;  %v1883_v47 = vld [vmem:[%s2386_s1 + $0x250] sm:$0xff]  }
  0x24   :  { %1228 = vmatmul.mubr.bf16.vlgmr.msra.gmra.mxu1 %v110_v48  ;;  %1664 = vmatpush3.bf16.msra.mxu0 %v1832_v46  ;;  %v1882_v46 = vld [vmem:[%s2386_s1 + $0x298] sm:$0xff]   ;;  %v1884_v48 = vld [vmem:[%s2386_s1 + $0x2d0] sm:$0xff]  }
  0x25   :  { %1686 = vmatpush3.bf16.msra.mxu1 %v1833_v49  ;;  %1665 = vmatprep.subr.bf16.mxu0 %v1834_v52  ;;  %v1885_v49 = vld [vmem:[%s2386_s1 + $0x210] sm:$0xff]   ;;  %v1888_v52 = vld [vmem:[%s2386_s1 + $0x2c8] sm:$0xff]  }
  0x26   :  { %1687 = vmatprep.subr.bf16.mxu1 %v1835_v53  ;;  %1267 = vmatprep.mubr.bf16.mxu0 %v113_v20  ;;  %v18_v53 = vld [vmem:[%s2385_s0 + $0x10] sm:$0xff]  ;;  %v1911_v20 = vld [vmem:[%s2386_s1 + $0x3a0] sm:$0xff]  }
  0x27   :  { %1307 = vmatprep.mubr.bf16.mxu1 %v115_v23  ;;  %v1914_v23 = vld [vmem:[%s2386_s1 + $0x318] sm:$0xff]  }
  0x28   :  { %1666 = vmatpush3.bf16.msra.mxu0 %v1836_v54  ;;  %v1889_v54 = vld [vmem:[%s2386_s1 + $0x208] sm:$0xff]  }
  0x29   :  { %1688 = vmatpush3.bf16.msra.mxu1 %v1837_v55  ;;  %1667 = vmatprep.subr.bf16.mxu0 %v1838_v56  ;;  %v65_v55 = vrot.slane %v18_v53, %v2078_v41  ;;  %v58_v56 = vcombine.high %v18_v53, %v18_v53 }
  0x2a   :  { %1689 = vmatprep.subr.bf16.mxu1 %v1839_v57  ;;  %v1890_v57 = vld [vmem:[%s2386_s1 + $0x288] sm:$0xff]  }
  0x2c   :  { %1668 = vmatpush3.bf16.msra.mxu0 %v1840_v58  ;;  %v1891_v58 = vld [vmem:[%s2386_s1 + $0x240] sm:$0xff]  }
  0x2d   :  { %1690 = vmatpush3.bf16.msra.mxu1 %v1841_v59  ;;  %1669 = vmatprep.subr.bf16.mxu0 %v1842_v60  ;;  %v73_v59 = vcombine.high %v65_v55, %v65_v55  ;;  %v72_v60 = vrot.slane %v58_v56, %v2078_v41 }
  0x2e   :  { %1691 = vmatprep.subr.bf16.mxu1 %v1843_v61  ;;  %v1892_v61 = vld [vmem:[%s2386_s1 + $0x2c0] sm:$0xff]  }
  0x30   :  { %1670 = vmatpush3.bf16.msra.mxu0 %v1844_v62  ;;  %v1893_v62 = vld [vmem:[%s2386_s1 + $0x200] sm:$0xff]  }
  0x31   :  { %1692 = vmatpush3.bf16.msra.mxu1 %v1845_v63  ;;  %1671 = vmatprep.subr.bf16.mxu0 %v1846_v0  ;;  %v117_v63 = vpack.c.bf16 %v73_v59, %v73_v59  ;;  %v74_v0 = vcombine.high %v72_v60, %v72_v60 }
  0x32   :  { %1693 = vmatprep.subr.bf16.mxu1 %v1847_v1  ;;  %v1894_v1 = vld [vmem:[%s2386_s1 + $0x280] sm:$0xff]  }
  0x34   :  { %1672 = vmatpush3.bf16.msra.mxu0 %v1848_v2  ;;  %v119_v2 = vpack.c.bf16 %v74_v0, %v74_v0 }
  0x35   :  { %1694 = vmatpush3.bf16.msra.mxu1 %v1849_v3  ;;  %1673 = vmatprep.subr.bf16.mxu0 %v1850_v4  ;;  %v1896_v3 = vld [vmem:[%s2386_s1 + $0x378] sm:$0xff]  }
  0x36   :  { %1695 = vmatprep.subr.bf16.mxu1 %v1851_v5  ;;  %v1897_v4 = vld [vmem:[%s2386_s1 + $0x3f8] sm:$0xff]  }
  0x37   :  { %v1898_v5 = vld [vmem:[%s2386_s1 + $0x338] sm:$0xff]  }
  0x38   :  { %1674 = vmatpush3.bf16.msra.mxu0 %v1852_v6  ;;  %v116_v6 = vpack.c.bf16 %v65_v55, %v65_v55 }
  0x39   :  { %1696 = vmatpush3.bf16.msra.mxu1 %v1853_v7  ;;  %1675 = vmatprep.subr.bf16.mxu0 %v1854_v8  ;;  %v118_v7 = vpack.c.bf16 %v72_v60, %v72_v60  ;;  %v1899_v8 = vld [vmem:[%s2386_s1 + $0x3b8] sm:$0xff]  }
  0x3a   :  { %1697 = vmatprep.subr.bf16.mxu1 %v1855_v9  ;;  %v1900_v9 = vld [vmem:[%s2386_s1 + $0x370] sm:$0xff]  }
  0x3c   :  { %1676 = vmatpush3.bf16.msra.mxu0 %v1856_v11  ;;  %v1902_v11 = vld [vmem:[%s2386_s1 + $0x330] sm:$0xff]  }
  0x3d   :  { %1698 = vmatpush3.bf16.msra.mxu1 %v1857_v14  ;;  %1677 = vmatprep.subr.bf16.mxu0 %v1858_v15  ;;  %v1905_v14 = vld [vmem:[%s2386_s1 + $0x3e8] sm:$0xff]  }
  0x3e   :  { %1699 = vmatprep.subr.bf16.mxu1 %v1859_v18  ;;  %v1906_v15 = vld [vmem:[%s2386_s1 + $0x328] sm:$0xff]   ;;  %v1909_v18 = vld [vmem:[%s2386_s1 + $0x3e0] sm:$0xff]  }
  0x40   :  { %1678 = vmatpush3.bf16.msra.mxu0 %v1860_v19  ;;  %v1910_v19 = vld [vmem:[%s2386_s1 + $0x320] sm:$0xff]  }
  0x41   :  { %1700 = vmatpush3.bf16.msra.mxu1 %v1861_v22  ;;  %1707 = vmatprep.subr.bf16.mxu0 %v1863_v24  ;;  %v1913_v22 = vld [vmem:[%s2386_s1 + $0x3d8] sm:$0xff]  }
  0x42   :  { %1729 = vmatprep.subr.bf16.mxu1 %v1864_v25  ;;  %v1915_v24 = vld [vmem:[%s2386_s1 + $0x398] sm:$0xff]   ;;  %v1916_v25 = vld [vmem:[%s2386_s1 + $0x350] sm:$0xff]  }
  0x43   :  { %1268 = vmatmul.mubr.bf16.vlgmr.msra.gmra.mxu0 %v112_v27  ;;  %v1918_v27 = vld [vmem:[%s2386_s1 + $0x310] sm:$0xff]  }
  0x44   :  { %1308 = vmatmul.mubr.bf16.vlgmr.msra.gmra.mxu1 %v114_v28  ;;  %1708 = vmatpush3.bf16.msra.mxu0 %v1865_v26  ;;  %v1917_v26 = vld [vmem:[%s2386_s1 + $0x3d0] sm:$0xff]  }
  0x45   :  { %1730 = vmatpush3.bf16.msra.mxu1 %v1866_v29  ;;  %1709 = vmatprep.subr.bf16.mxu0 %v1867_v30  ;;  %v1919_v28 = vld [vmem:[%s2386_s1 + $0x390] sm:$0xff]   ;;  %v1920_v29 = vld [vmem:[%s2386_s1 + $0x348] sm:$0xff]  }
  0x46   :  { %1731 = vmatprep.subr.bf16.mxu1 %v1868_v31  ;;  %1347 = vmatprep.mubr.bf16.mxu0 %v117_v63  ;;  %v1921_v30 = vld [vmem:[%s2386_s1 + $0x3c8] sm:$0xff]   ;;  %v19_v31 = vld [vmem:[%s2385_s0 + $0x18] sm:$0xff] }
  0x47   :  { %1387 = vmatprep.mubr.bf16.mxu1 %v119_v2 }
  0x48   :  { %1710 = vmatpush3.bf16.msra.mxu0 %v1869_v32 }
  0x49   :  { %1732 = vmatpush3.bf16.msra.mxu1 %v1870_v33  ;;  %1711 = vmatprep.subr.bf16.mxu0 %v1871_v34 }
  0x4a   :  { %1733 = vmatprep.subr.bf16.mxu1 %v1872_v35 }
  0x4c   :  { %1712 = vmatpush3.bf16.msra.mxu0 %v1873_v36 }
  0x4d   :  { %1734 = vmatpush3.bf16.msra.mxu1 %v1874_v37  ;;  %1713 = vmatprep.subr.bf16.mxu0 %v1875_v38 }
  0x4e   :  { %1735 = vmatprep.subr.bf16.mxu1 %v1876_v39 }
  0x50   :  { %1714 = vmatpush3.bf16.msra.mxu0 %v1877_v40 }
  0x51   :  { %1736 = vmatpush3.bf16.msra.mxu1 %v1878_v42  ;;  %1715 = vmatprep.subr.bf16.mxu0 %v1879_v43 }
  0x52   :  { %1737 = vmatprep.subr.bf16.mxu1 %v1880_v44 }
  0x54   :  { %1716 = vmatpush3.bf16.msra.mxu0 %v1881_v45 }
  0x55   :  { %1738 = vmatpush3.bf16.msra.mxu1 %v1882_v46  ;;  %1717 = vmatprep.subr.bf16.mxu0 %v1883_v47 }
  0x56   :  { %1739 = vmatprep.subr.bf16.mxu1 %v1884_v48 }
  0x58   :  { %1718 = vmatpush3.bf16.msra.mxu0 %v1885_v49 }
  0x59   :  { %1740 = vmatpush3.bf16.msra.mxu1 %v1886_v50  ;;  %1719 = vmatprep.subr.bf16.mxu0 %v1887_v51 }
  0x5a   :  { %1741 = vmatprep.subr.bf16.mxu1 %v1888_v52 }
  0x5c   :  { %1720 = vmatpush3.bf16.msra.mxu0 %v1889_v54 }
  0x5d   :  { %1742 = vmatpush3.bf16.msra.mxu1 %v1890_v57  ;;  %1721 = vmatprep.subr.bf16.mxu0 %v1891_v58 }
  0x5e   :  { %1743 = vmatprep.subr.bf16.mxu1 %v1892_v61 }
  0x60   :  { %1722 = vmatpush3.bf16.msra.mxu0 %v1893_v62 }
  0x61   :  { %1744 = vmatpush3.bf16.msra.mxu1 %v1894_v1  ;;  %1751 = vmatprep.subr.bf16.mxu0 %v1896_v3 }
  0x62   :  { %1773 = vmatprep.subr.bf16.mxu1 %v1897_v4 }
  0x63   :  { %1348 = vmatmul.mubr.bf16.vlgmr.msra.gmra.mxu0 %v116_v6 }
  0x64   :  { %1388 = vmatmul.mubr.bf16.vlgmr.msra.gmra.mxu1 %v118_v7  ;;  %1752 = vmatpush3.bf16.msra.mxu0 %v1898_v5 }
  0x65   :  { %1774 = vmatpush3.bf16.msra.mxu1 %v1899_v8  ;;  %1753 = vmatprep.subr.bf16.mxu0 %v1900_v9 }
  0x66   :  { %1775 = vmatprep.subr.bf16.mxu1 %v1901_v10 }
  0x68   :  { %1754 = vmatpush3.bf16.msra.mxu0 %v1902_v11 }
  0x69   :  { %1776 = vmatpush3.bf16.msra.mxu1 %v1903_v12  ;;  %1755 = vmatprep.subr.bf16.mxu0 %v1904_v13 }
  0x6a   :  { %1777 = vmatprep.subr.bf16.mxu1 %v1905_v14 }
  0x6c   :  { %1756 = vmatpush3.bf16.msra.mxu0 %v1906_v15 }
  0x6d   :  { %1778 = vmatpush3.bf16.msra.mxu1 %v1907_v16  ;;  %1757 = vmatprep.subr.bf16.mxu0 %v1908_v17 }
  0x6e   :  { %1779 = vmatprep.subr.bf16.mxu1 %v1909_v18 }
  0x70   :  { %1758 = vmatpush3.bf16.msra.mxu0 %v1910_v19 }
  0x71   :  { %1780 = vmatpush3.bf16.msra.mxu1 %v1911_v20  ;;  %1759 = vmatprep.subr.bf16.mxu0 %v1912_v21 }
  0x72   :  { %1781 = vmatprep.subr.bf16.mxu1 %v1913_v22 }
  0x74   :  { %1760 = vmatpush3.bf16.msra.mxu0 %v1914_v23 }
  0x75   :  { %1782 = vmatpush3.bf16.msra.mxu1 %v1915_v24  ;;  %1761 = vmatprep.subr.bf16.mxu0 %v1916_v25 }
  0x76   :  { %1783 = vmatprep.subr.bf16.mxu1 %v1917_v26 }
  0x77   :  { %8 = vsyncpa [#allocation3], 0  ;;  %v82_v32 = vrot.slane %v19_v31, %v2078_v41  ;;  %v75_v33 = vcombine.high %v19_v31, %v19_v31  ;;  %v1922_v34 = vld [vmem:[%s2386_s1 + $0x308] sm:$0xff]   ;;  %v1924_v36 = vld [vmem:[%s2386_s1 + $0x340] sm:$0xff]  }
  0x78   :  { %1762 = vmatpush3.bf16.msra.mxu0 %v1918_v27  ;;  %v1923_v35 = vld [vmem:[%s2386_s1 + $0x388] sm:$0xff]   ;;  %v1925_v37 = vld [vmem:[%s2386_s1 + $0x3c0] sm:$0xff]  }
  0x79   :  { %1784 = vmatpush3.bf16.msra.mxu1 %v1919_v28  ;;  %1763 = vmatprep.subr.bf16.mxu0 %v1920_v29  ;;  %v90_v38 = vcombine.high %v82_v32, %v82_v32  ;;  %v89_v39 = vrot.slane %v75_v33, %v2078_v41  ;;  %v1926_v43 = vld [vmem:[%s2386_s1 + $0x300] sm:$0xff]   ;;  %v120_v46 = vpack.c.bf16 %v82_v32, %v82_v32 }
  0x7a   :  { %1785 = vmatprep.subr.bf16.mxu1 %v1921_v30  ;;  %v1927_v44 = vld [vmem:[%s2386_s1 + $0x380] sm:$0xff]   ;;  %s1952_s1 = smov [#allocation2]  }
  0x7b   :  { %v121_v40 = vpack.c.bf16 %v90_v38, %v90_v38  ;;  %v91_v42 = vcombine.high %v89_v39, %v89_v39  ;;  %v122_v47 = vpack.c.bf16 %v89_v39, %v89_v39  ;;  %v1490_v49 = vld [vmem:[%s2387_s2] ss:$0 sm:$0xff]  ;;  %s1482_s2 = sshll.u32 %s1952_s1, 4  ;;  %s1483_s2 = int_to_ptr.vmem [resolvable:$true] %s1482_s2 }
  0x7c   :  { %1764 = vmatpush3.bf16.msra.mxu0 %v1922_v34  ;;  %s1929_s7 = scalar_lea.vmem %s1483_s2, 32  ;;  %p1934_p1 = scmp.lt.s32.totalorder %s1483_s2, %s1483_s2 }
  0x7d   :  { %1786 = vmatpush3.bf16.msra.mxu1 %v1923_v35  ;;  %1765 = vmatprep.subr.bf16.mxu0 %v1924_v36  ;;  %v123_v45 = vpack.c.bf16 %v91_v42, %v91_v42  ;;  %p1930_p0 = scmp.ne.s32.totalorder %s1483_s2, %s1929_s7  ;;  %p1935_p2 = scmp.lt.s32.totalorder %s1929_s7, %s1929_s7 }
  0x7e   :  { %1787 = vmatprep.subr.bf16.mxu1 %v1925_v37  ;;  %1427 = vmatprep.mubr.bf16.mxu0 %v121_v40 }
  0x7f   :  { %1467 = vmatprep.mubr.bf16.mxu1 %v123_v45  ;;  %p1936_p3 = por %p1935_p2, %p1934_p1 }
  0x80   :  { %1766 = vmatpush3.bf16.msra.mxu0 %v1926_v43 }
  0x81   :  { %1788 = vmatpush3.bf16.msra.mxu1 %v1927_v44  ;;  %p1937_p4 = pnand %p1936_p3, %p1930_p0 }
  0x83   :  { %1428 = vmatmul.mubr.bf16.vlgmr.msra.gmra.mxu0 %v120_v46 }
  0x84   :  { %1468 = vmatmul.mubr.bf16.vlgmr.msra.gmra.mxu1 %v122_v47 }
  0xe3   :  { %v1635_v41 = vpop.f32.mrf.mxu0 }
  0xe4   :  { %v1657_v48 = vpop.f32.mrf.mxu1 }
  0xe5   :  { %v1636_v50 = vpop.f32.mrf.mxu0 }
  0xe6   :  { %v1658_v51 = vpop.f32.mrf.mxu1  ;;  %v1637_v52 = vadd.f32 %v1636_v50, %v1635_v41 }
  0xe7   :  { %v1659_v53 = vadd.f32 %v1658_v51, %v1657_v48  ;;  %v1638_v54 = vpop.f32.mrf.mxu0 }
  0xe8   :  { %v1660_v55 = vpop.f32.mrf.mxu1  ;;  %v1190_v56 = vadd.f32 %v1637_v52, %v1490_v49 }
  0xe9   :  { %v1639_v57 = vpop.f32.mrf.mxu0 }
  0xea   :  { %v1661_v58 = vpop.f32.mrf.mxu1  ;;  %v1230_v59 = vadd.f32 %v1659_v53, %v1190_v56 }
 0x103   :  { %v1679_v60 = vpop.f32.mrf.mxu0 }
 0x104   :  { %v1701_v61 = vpop.f32.mrf.mxu1 }
 0x105   :  { %v1680_v62 = vpop.f32.mrf.mxu0 }
 0x106   :  { %v1702_v63 = vpop.f32.mrf.mxu1  ;;  %v1681_v12 = vadd.f32 %v1680_v62, %v1679_v60 }
 0x107   :  { %v1682_v0 = vpop.f32.mrf.mxu0  ;;  %v1703_v14 = vadd.f32 %v1702_v63, %v1701_v61 }
 0x108   :  { %v1704_v1 = vpop.f32.mrf.mxu1  ;;  %v1270_v13 = vadd.f32 %v1681_v12, %v1230_v59 }
 0x109   :  { %v1683_v2 = vpop.f32.mrf.mxu0 }
 0x10a   :  { %v1705_v3 = vpop.f32.mrf.mxu1  ;;  %v1310_v16 = vadd.f32 %v1703_v14, %v1270_v13 }
 0x123   :  { %v1723_v4 = vpop.f32.mrf.mxu0 }
 0x124   :  { %v1745_v5 = vpop.f32.mrf.mxu1 }
 0x125   :  { %v1724_v6 = vpop.f32.mrf.mxu0 }
 0x126   :  { %v1746_v7 = vpop.f32.mrf.mxu1  ;;  %v1725_v15 = vadd.f32 %v1724_v6, %v1723_v4 }
 0x127   :  { %v1726_v8 = vpop.f32.mrf.mxu0  ;;  %v1747_v18 = vadd.f32 %v1746_v7, %v1745_v5 }
 0x128   :  { %v1748_v9 = vpop.f32.mrf.mxu1  ;;  %v1350_v17 = vadd.f32 %v1725_v15, %v1310_v16 }
 0x129   :  { %v1727_v10 = vpop.f32.mrf.mxu0 }
 0x12a   :  { %v1749_v11 = vpop.f32.mrf.mxu1  ;;  %v1390_v23 = vadd.f32 %v1747_v18, %v1350_v17 }
 0x143   :  { %v1767_v19 = vpop.f32.mrf.mxu0 }
 0x144   :  { %v1789_v20 = vpop.f32.mrf.mxu1 }
 0x145   :  { %v1768_v21 = vpop.f32.mrf.mxu0 }
 0x146   :  { %v1790_v22 = vpop.f32.mrf.mxu1  ;;  %v1769_v24 = vadd.f32 %v1768_v21, %v1767_v19 }
 0x147   :  { %v1770_v25 = vpop.f32.mrf.mxu0  ;;  %v1791_v28 = vadd.f32 %v1790_v22, %v1789_v20 }
 0x148   :  { %v1792_v26 = vpop.f32.mrf.mxu1  ;;  %v1430_v27 = vadd.f32 %v1769_v24, %v1390_v23 }
 0x149   :  { %v1771_v29 = vpop.f32.mrf.mxu0 }
 0x14a   :  { %v1793_v30 = vpop.f32.mrf.mxu1  ;;  %v1470_v31 = vadd.f32 %v1791_v28, %v1430_v27 }
 0x14c   :  { %1475 = vst [vmem:[#allocation2] sm:$0x3] %v1470_v31 }
 0x14d   :  { %1940 = shalt.err (!%p1937_p4)
}
 0x14e   :  { %1485 = dma.vmem_to_hbm [thread:$0]  %s1483_s2, 32, %s2388_s3, [#allocation3]  }
 0x14f   :  { %1949 = dma.done.wait [#allocation3], 32  }
 0x150   :  { %1950 = vsyncadd [#allocation3], 4294967264 }
 0x151   :  { %1489 = vsyncpa [#allocation3], 1 }

</bundles_post_ra>
